<compile_context>
chip_gen: v7x
topology: tpu7x:2x2x1
jax: 0.10.0
libtpu: 0.0.40
codegen_flags: <defaults>
</compile_context>

<pallas_src>
import functools

import jax
import jax.numpy as jnp
import numpy as np
from jax.experimental import pallas as pl
from jax.experimental.pallas import tpu as pltpu

# ---------------------------------------------------------------------------
# Phase decomposition: nearest-2x upsample followed by a 3x3 conv is equivalent to
# four "phase" outputs (py, px in {0,1}), each a 2x2 conv over the ORIGINAL-resolution
# input with phase-specific effective weights (sums of the original 3x3 taps).
#
# For output phase p in {0,1} and low-res tap offset d in {0,1}, the original 3x3
# kernel taps k that land on that low-res pixel after nearest upsampling:
_SRC = {(0, 0): (0,), (0, 1): (1, 2), (1, 0): (0, 1), (1, 1): (2,)}
# For a padded-input row/col offset a in {0,1,2} (slab shift), the phases that read it:
_PHASES_OF = {0: (0,), 1: (0, 1), 2: (1,)}


def _round_up(x, m):
    return ((x + m - 1) // m) * m


def _slab_plan():
    """Static schedule: 9 shifted slabs; per slab the (flat) output phases it feeds
    and the chunk offset of its grouped weight columns."""
    plan = []
    off = 0
    for a in range(3):
        for b in range(3):
            phases = tuple(py * 2 + px for py in _PHASES_OF[a] for px in _PHASES_OF[b])
            plan.append((a, b, off, phases))
            off += len(phases)
    assert off == 16
    return tuple(plan)


_PLAN = _slab_plan()


def _pack_weights(weight, cp, n_co, tco, compute_dtype):
    """(Cout, Cin, 3, 3) OIHW -> (n_co, cp, 16*tco) slab-grouped effective weights.

    Chunk j of the last dim (slab-major order, matching _PLAN) is the (Cin, Cout-tile)
    effective matrix of one (slab, phase) pair; padded channels are zero so they never
    contribute.  Column layout lets the kernel take lane-aligned slices per slab."""
    c_out, c_in = weight.shape[0], weight.shape[1]
    wf = weight.astype(jnp.float32)
    chunks = []
    for (a, b, _off, phases) in _PLAN:
        for p in phases:
            py, px = p // 2, p % 2
            dy, dx = a - py, b - px
            m = jnp.zeros((c_out, c_in), jnp.float32)
            for ky in _SRC[(py, dy)]:
                for kx in _SRC[(px, dx)]:
                    m = m + wf[:, :, ky, kx]
            chunks.append(jnp.pad(m.T, ((0, cp - c_in), (0, cp - c_out))))
    arr = jnp.stack(chunks, axis=0)                       # (16, cp, cp)  [chunk, Cin, Cout]
    arr = arr.reshape(16, cp, n_co, tco)
    arr = jnp.transpose(arr, (2, 1, 0, 3)).reshape(n_co, cp, 16 * tco)
    return arr.astype(compute_dtype)


# ---------------------------------------------------------------------------
# Generation-aware VMEM planning.

def _vmem_capacity_bytes():
    try:
        return int(pltpu.get_tpu_info().vmem_capacity_bytes)
    except Exception:
        return 64 << 20            # conservative fallback (v7x per-TensorCore VMEM)


def _estimate_vmem(hp, wp, cp, tco, th, width, n_co, x_buf, in_bytes, out_bytes):
    """Per-grid-step VMEM footprint, including in-kernel intermediates."""
    x_blk = (hp + 2) * wp * cp * in_bytes          # whole padded image, resident
    w_blk = cp * 16 * tco * in_bytes               # grouped effective weights
    o_blk = 4 * th * width * tco * out_bytes       # phase-separated f32 output block
    acc = 4 * th * width * tco * 4                 # f32 phase accumulators
    slab = 2 * th * width * cp * in_bytes          # <= 2 live activation slabs
    res = 2 * th * width * 4 * tco * 4             # largest (n_s = 4) matmul results
    bias = 2 * tco * 4
    misc = 2 << 20                                 # compiler scratch / headroom
    w_bufs = 1 if n_co == 1 else 2                 # constant-index weights: 1 buffer
    return x_buf * x_blk + w_bufs * w_blk + 2 * o_blk + acc + slab + res + bias + misc


def _plan_tiling(h, width, wp, cp, budget, in_bytes, out_bytes, tco_max, th_max):
    """Pick (n_co, tco, th, hp, x_buf) so the per-step footprint fits `budget`."""
    groups = cp // 128
    co_options = [d for d in range(1, groups + 1) if groups % d == 0]
    for n_co in co_options:                        # prefer fewest out-channel tiles
        tco = cp // n_co
        if tco_max is not None and tco > tco_max:
            continue
        th0 = max(1, min(h, th_max if th_max is not None else h))
        for th in range(th0, 0, -1):               # prefer largest row tile
            hp = _round_up(h, th)
            x_blk = (hp + 2) * wp * cp * in_bytes
            x_buf = 2 if 2 * x_blk <= budget // 2 else 1
            if _estimate_vmem(hp, wp, cp, tco, th, width, n_co, x_buf,
                              in_bytes, out_bytes) <= budget:
                return n_co, tco, th, hp, x_buf
    # TODO(synk): add a manual double-buffered halo DMA path (memory_space=pl.ANY)
    # for spatial sizes too large to keep one whole image VMEM-resident.
    raise ValueError(
        "UpSample kernel: even the smallest tiling exceeds the VMEM budget "
        f"({budget} bytes) for H={h}, W={width}, padded C={cp}.")


def _block_spec(shape, index_map, single_buffered=False):
    if single_buffered:
        try:
            return pl.BlockSpec(shape, index_map, pipeline_mode=pl.Buffered(1))
        except Exception:          # older jaxlib without pipeline_mode support
            pass
    return pl.BlockSpec(shape, index_map)


# ---------------------------------------------------------------------------
# Kernel.

def _upsample_conv_kernel(x_ref, w_ref, b_ref, o_ref, *, th, width, cp, tco, plan):
    """One grid step: rows [i*th, (i+1)*th) of one image, one output-channel tile.

    x_ref : (1, hp+2, Wp, cp)        bf16 zero-padded low-res image (NHWC), resident
    w_ref : (1, cp, 16*tco)          bf16 slab-grouped effective weights for this co tile
    b_ref : (1, 1, tco)              f32 bias tile
    o_ref : (1, 1, 4, th*width, tco) f32 phase-separated, lane-dense output
    """
    i = pl.program_id(2)
    r0 = i * th
    if th % 8 == 0:
        r0 = pl.multiple_of(r0, 8)

    acc = [None, None, None, None]
    for (a, b, off, phases) in plan:               # 9 shifted slabs
        n_s = len(phases)
        # One live slab at a time, sliced straight from the ref (no memoized copies).
        slab = x_ref[0, pl.ds(r0 + a, th), b:b + width, :].reshape(th * width, cp)
        # One matmul per slab against the grouped weight columns (N = n_s * tco).
        res = jnp.dot(slab, w_ref[0, :, off * tco:(off + n_s) * tco],
                      preferred_element_type=jnp.float32)
        for j, p in enumerate(phases):             # lane-aligned column chunks
            part = res[:, j * tco:(j + 1) * tco]
            acc[p] = part if acc[p] is None else acc[p] + part

    bias = b_ref[0]                                # (1, tco), loaded once
    for p in range(4):
        o_ref[0, 0, p] = acc[p] + bias             # f32 out (matches the torch module)


# ---------------------------------------------------------------------------
# Wrapper: equivalent of UpSample.forward (NCHW in / NCHW out, like PyTorch).

def upsample_forward(x, weight, bias, *, compute_dtype=jnp.bfloat16,
                     tco_max=None, th_max=None):
    """x: (N, C, H, W) f32, weight: (C, C, 3, 3) OIHW, bias: (C,) -> (N, C, 2H, 2W) f32."""
    n, c, h, w = x.shape
    assert weight.shape == (c, c, 3, 3) and bias.shape == (c,)

    cp = _round_up(c, 128)                 # lane-dense channels (no-op at 128/256/512/640/1280)
    wp = _round_up(w + 2, 8)               # sublane-aligned padded width
    in_bytes = jnp.dtype(compute_dtype).itemsize
    out_bytes = 4

    cap = _vmem_capacity_bytes()
    budget = int(cap * 0.75)               # ~48 MiB on v7x (64 MiB), ~96 MiB on v5e/v6e (128 MiB)
    if tco_max is not None:
        tco_max = max(128, _round_up(tco_max, 128))
    n_co, tco, th, hp, x_buf = _plan_tiling(h, w, wp, cp, budget, in_bytes,
                                            out_bytes, tco_max, th_max)
    n_t = hp // th

    # Input glue: cast first (halves transpose bytes), then transpose + zero-pad.
    # These fuse into one small HBM pass; the upsampled tensor is never materialized.
    x_nhwc = jnp.transpose(x.astype(compute_dtype), (0, 2, 3, 1))       # (N, H, W, C)
    x_pad = jnp.pad(x_nhwc, ((0, 0), (1, 1 + hp - h), (1, wp - w - 1), (0, cp - c)))

    w_grp = _pack_weights(weight, cp, n_co, tco, compute_dtype)         # (n_co, cp, 16*tco)
    b_grp = jnp.pad(bias.astype(jnp.float32), (0, cp - c)).reshape(n_co, 1, tco)

    est = _estimate_vmem(hp, wp, cp, tco, th, w, n_co, x_buf, in_bytes, out_bytes)
    vmem_limit = int(min(cap - (8 << 20), max(est + (16 << 20), 32 << 20)))

    kernel = functools.partial(_upsample_conv_kernel, th=th, width=w, cp=cp,
                               tco=tco, plan=_PLAN)
    out = pl.pallas_call(
        kernel,
        out_shape=jax.ShapeDtypeStruct((n, n_t, 4, th * w, cp), jnp.float32),
        grid_spec=pltpu.PrefetchScalarGridSpec(
            num_scalar_prefetch=0,
            grid=(n, n_co, n_t),
            in_specs=[
                # Whole padded image: fetched once per image, resident across (co, i).
                _block_spec((1, hp + 2, wp, cp), lambda b, co, i: (b, 0, 0, 0),
                            single_buffered=(x_buf == 1)),
                # Grouped effective weights for this out-channel tile.
                _block_spec((1, cp, 16 * tco), lambda b, co, i: (co, 0, 0),
                            single_buffered=(n_co == 1)),
                # Bias tile.
                _block_spec((1, 1, tco), lambda b, co, i: (co, 0, 0),
                            single_buffered=(n_co == 1)),
            ],
            out_specs=pl.BlockSpec((1, 1, 4, th * w, tco),
                                   lambda b, co, i: (b, i, 0, 0, co)),
        ),
        compiler_params=pltpu.CompilerParams(
            dimension_semantics=("parallel", "parallel", "arbitrary"),
            vmem_limit_bytes=vmem_limit),
    )(x_pad, w_grp, b_grp)

    # Phase re-interleave + NHWC->NCHW folded into ONE fused XLA transpose (the tax of
    # the PyTorch NCHW interface).  Channel padding is sliced off *before* the
    # transpose so padded channels are never moved.
    # TODO(synk): expose an NHWC output path (kernel-side interleave) for NHWC consumers.
    out = out.reshape(n, n_t, 2, 2, th, w, cp)[..., :c]   # (n, t, py, px, iy, ix, c)
    out = jnp.transpose(out, (0, 6, 1, 4, 2, 5, 3))       # (n, c, t, iy, py, ix, px)
    out = out.reshape(n, c, 2 * hp, 2 * w)
    return out[:, :, :2 * h, :]


# ---------------------------------------------------------------------------

if __name__ == "__main__":
    key = jax.random.PRNGKey(0)

    def _reference(x, weight, bias, compute_dtype=jnp.bfloat16):
        # Same forward pass in plain JAX.  Operands pre-rounded to the kernel's MXU
        # input precision; accumulation is f32 in both paths.  (The kernel sums the
        # 3x3 taps in f32 before the bf16 cast, a small documented rounding delta.)
        c = weight.shape[0]
        x_q = x.astype(compute_dtype).astype(jnp.float32)
        w_q = weight.astype(compute_dtype).astype(jnp.float32)
        x_up = jnp.repeat(jnp.repeat(x_q, 2, axis=2), 2, axis=3)
        y = jax.lax.conv_general_dilated(
            x_up, w_q, window_strides=(1, 1), padding=((1, 1), (1, 1)),
            dimension_numbers=("NCHW", "OIHW", "NCHW"),
            precision=jax.lax.Precision.HIGHEST)
        return y + bias.reshape(1, c, 1, 1)

    # Case 1: module-sized smoke test (single row tile, single out-channel group).
    k1, k2, k3, key = jax.random.split(key, 4)
    N, C, H, W = 2, 4, 16, 16
    x = jax.random.normal(k1, (N, C, H, W), jnp.float32)
    weight = jax.random.normal(k2, (C, C, 3, 3), jnp.float32) * 0.1
    bias = jax.random.normal(k3, (C,), jnp.float32) * 0.1

    out = jax.block_until_ready(jax.jit(upsample_forward)(x, weight, bias))
    assert out.shape == (N, C, 2 * H, 2 * W), out.shape
    np.testing.assert_allclose(np.asarray(out), np.asarray(_reference(x, weight, bias)),
                               rtol=2e-2, atol=2e-2)

    # Case 2: exercises multiple out-channel tiles (n_co=2), multiple row tiles and a
    # ragged tail tile (H % th != 0) — paths case 1 does not cover.
    k1, k2, k3, key = jax.random.split(key, 4)
    N2, C2, H2, W2 = 1, 256, 7, 8
    x2 = jax.random.normal(k1, (N2, C2, H2, W2), jnp.float32)
    weight2 = jax.random.normal(k2, (C2, C2, 3, 3), jnp.float32) * 0.05
    bias2 = jax.random.normal(k3, (C2,), jnp.float32) * 0.1

    fwd2 = jax.jit(functools.partial(upsample_forward, tco_max=128, th_max=4))
    out2 = jax.block_until_ready(fwd2(x2, weight2, bias2))
    assert out2.shape == (N2, C2, 2 * H2, 2 * W2), out2.shape
    np.testing.assert_allclose(np.asarray(out2), np.asarray(_reference(x2, weight2, bias2)),
                               rtol=2e-2, atol=3e-2)

    print("KERNEL_OK")
</pallas_src>

<mosaic_0001>
module attributes {stable_mosaic.version = 11 : i64} {
  func.func @_upsample_conv_kernel(%arg0: i32, %arg1: i32, %arg2: i32, %arg3: memref<1x18x24x128xbf16, #tpu.memory_space<vmem>>, %arg4: memref<1x128x2048xbf16, #tpu.memory_space<vmem>>, %arg5: memref<1x1x128xf32, #tpu.memory_space<vmem>>, %arg6: memref<1x1x4x256x128xf32, #tpu.memory_space<vmem>>) attributes {dimension_semantics = [#tpu.dimension_semantics<parallel>, #tpu.dimension_semantics<parallel>, #tpu.dimension_semantics<arbitrary>], iteration_bounds = array<i64: 2, 1, 1>, scalar_prefetch = 0 : i64, scratch_operands = 0 : i64, tpu.core_type = #tpu.core_type<tc>, window_params = [{transform_indices = @transform_0, window_bounds = array<i64: 1, 18, 24, 128>}, {pipeline_mode = #tpu.pipeline_mode<synchronous>, transform_indices = @transform_1, window_bounds = array<i64: 1, 128, 2048>}, {pipeline_mode = #tpu.pipeline_mode<synchronous>, transform_indices = @transform_2, window_bounds = array<i64: 1, 1, 128>}, {transform_indices = @transform_3, window_bounds = array<i64: 1, 1, 4, 256, 128>}]} {
    %c16_i32 = arith.constant 16 : i32
    %0 = arith.muli %arg2, %c16_i32 : i32
    %1 = tpu.assume_multiple %0, 8 : i32
    %c0_i32 = arith.constant 0 : i32
    %2 = arith.addi %1, %c0_i32 : i32
    %c0 = arith.constant 0 : index
    %3 = arith.index_cast %2 : i32 to index
    %c0_0 = arith.constant 0 : index
    %c0_1 = arith.constant 0 : index
    %4 = vector.load %arg3[%c0, %3, %c0_0, %c0_1] : memref<1x18x24x128xbf16, #tpu.memory_space<vmem>>, vector<1x16x16x128xbf16>
    %5 = vector.shape_cast %4 : vector<1x16x16x128xbf16> to vector<16x16x128xbf16>
    %6 = vector.shape_cast %5 : vector<16x16x128xbf16> to vector<256x128xbf16>
    %c0_2 = arith.constant 0 : index
    %c0_3 = arith.constant 0 : index
    %c0_4 = arith.constant 0 : index
    %7 = vector.load %arg4[%c0_2, %c0_3, %c0_4] : memref<1x128x2048xbf16, #tpu.memory_space<vmem>>, vector<1x128x128xbf16>
    %8 = vector.shape_cast %7 : vector<1x128x128xbf16> to vector<128x128xbf16>
    %cst = arith.constant dense<0.000000e+00> : vector<256x128xf32>
    %9 = tpu.matmul %6, %8, %cst {dimension_numbers = #tpu.dot_dimension_numbers<[1], [0], [0], [1], [0, 0, 1, 1], [], []>} : vector<256x128xbf16>, vector<128x128xbf16>, vector<256x128xf32> -> vector<256x128xf32>
    %c0_i32_5 = arith.constant 0 : i32
    %10 = arith.addi %1, %c0_i32_5 : i32
    %c0_6 = arith.constant 0 : index
    %11 = arith.index_cast %10 : i32 to index
    %c1 = arith.constant 1 : index
    %c0_7 = arith.constant 0 : index
    %12 = vector.load %arg3[%c0_6, %11, %c1, %c0_7] : memref<1x18x24x128xbf16, #tpu.memory_space<vmem>>, vector<1x16x16x128xbf16>
    %13 = vector.shape_cast %12 : vector<1x16x16x128xbf16> to vector<16x16x128xbf16>
    %14 = vector.shape_cast %13 : vector<16x16x128xbf16> to vector<256x128xbf16>
    %c0_8 = arith.constant 0 : index
    %c0_9 = arith.constant 0 : index
    %c128 = arith.constant 128 : index
    %15 = vector.load %arg4[%c0_8, %c0_9, %c128] : memref<1x128x2048xbf16, #tpu.memory_space<vmem>>, vector<1x128x256xbf16>
    %16 = vector.shape_cast %15 : vector<1x128x256xbf16> to vector<128x256xbf16>
    %cst_10 = arith.constant dense<0.000000e+00> : vector<256x256xf32>
    %17 = tpu.matmul %14, %16, %cst_10 {dimension_numbers = #tpu.dot_dimension_numbers<[1], [0], [0], [1], [0, 0, 1, 1], [], []>} : vector<256x128xbf16>, vector<128x256xbf16>, vector<256x256xf32> -> vector<256x256xf32>
    %18 = vector.extract_strided_slice %17 {offsets = [0, 0], sizes = [256, 128], strides = [1, 1]} : vector<256x256xf32> to vector<256x128xf32>
    %19 = arith.addf %9, %18 : vector<256x128xf32>
    %20 = vector.extract_strided_slice %17 {offsets = [0, 128], sizes = [256, 128], strides = [1, 1]} : vector<256x256xf32> to vector<256x128xf32>
    %c0_i32_11 = arith.constant 0 : i32
    %21 = arith.addi %1, %c0_i32_11 : i32
    %c0_12 = arith.constant 0 : index
    %22 = arith.index_cast %21 : i32 to index
    %c2 = arith.constant 2 : index
    %c0_13 = arith.constant 0 : index
    %23 = vector.load %arg3[%c0_12, %22, %c2, %c0_13] : memref<1x18x24x128xbf16, #tpu.memory_space<vmem>>, vector<1x16x16x128xbf16>
    %24 = vector.shape_cast %23 : vector<1x16x16x128xbf16> to vector<16x16x128xbf16>
    %25 = vector.shape_cast %24 : vector<16x16x128xbf16> to vector<256x128xbf16>
    %c0_14 = arith.constant 0 : index
    %c0_15 = arith.constant 0 : index
    %c384 = arith.constant 384 : index
    %26 = vector.load %arg4[%c0_14, %c0_15, %c384] : memref<1x128x2048xbf16, #tpu.memory_space<vmem>>, vector<1x128x128xbf16>
    %27 = vector.shape_cast %26 : vector<1x128x128xbf16> to vector<128x128xbf16>
    %cst_16 = arith.constant dense<0.000000e+00> : vector<256x128xf32>
    %28 = tpu.matmul %25, %27, %cst_16 {dimension_numbers = #tpu.dot_dimension_numbers<[1], [0], [0], [1], [0, 0, 1, 1], [], []>} : vector<256x128xbf16>, vector<128x128xbf16>, vector<256x128xf32> -> vector<256x128xf32>
    %29 = arith.addf %20, %28 : vector<256x128xf32>
    %c1_i32 = arith.constant 1 : i32
    %30 = arith.addi %1, %c1_i32 : i32
    %c0_17 = arith.constant 0 : index
    %31 = arith.index_cast %30 : i32 to index
    %c0_18 = arith.constant 0 : index
    %c0_19 = arith.constant 0 : index
    %32 = vector.load %arg3[%c0_17, %31, %c0_18, %c0_19] : memref<1x18x24x128xbf16, #tpu.memory_space<vmem>>, vector<1x16x16x128xbf16>
    %33 = vector.shape_cast %32 : vector<1x16x16x128xbf16> to vector<16x16x128xbf16>
    %34 = vector.shape_cast %33 : vector<16x16x128xbf16> to vector<256x128xbf16>
    %c0_20 = arith.constant 0 : index
    %c0_21 = arith.constant 0 : index
    %c512 = arith.constant 512 : index
    %35 = vector.load %arg4[%c0_20, %c0_21, %c512] : memref<1x128x2048xbf16, #tpu.memory_space<vmem>>, vector<1x128x256xbf16>
    %36 = vector.shape_cast %35 : vector<1x128x256xbf16> to vector<128x256xbf16>
    %cst_22 = arith.constant dense<0.000000e+00> : vector<256x256xf32>
    %37 = tpu.matmul %34, %36, %cst_22 {dimension_numbers = #tpu.dot_dimension_numbers<[1], [0], [0], [1], [0, 0, 1, 1], [], []>} : vector<256x128xbf16>, vector<128x256xbf16>, vector<256x256xf32> -> vector<256x256xf32>
    %38 = vector.extract_strided_slice %37 {offsets = [0, 0], sizes = [256, 128], strides = [1, 1]} : vector<256x256xf32> to vector<256x128xf32>
    %39 = arith.addf %19, %38 : vector<256x128xf32>
    %40 = vector.extract_strided_slice %37 {offsets = [0, 128], sizes = [256, 128], strides = [1, 1]} : vector<256x256xf32> to vector<256x128xf32>
    %c1_i32_23 = arith.constant 1 : i32
    %41 = arith.addi %1, %c1_i32_23 : i32
    %c0_24 = arith.constant 0 : index
    %42 = arith.index_cast %41 : i32 to index
    %c1_25 = arith.constant 1 : index
    %c0_26 = arith.constant 0 : index
    %43 = vector.load %arg3[%c0_24, %42, %c1_25, %c0_26] : memref<1x18x24x128xbf16, #tpu.memory_space<vmem>>, vector<1x16x16x128xbf16>
    %44 = vector.shape_cast %43 : vector<1x16x16x128xbf16> to vector<16x16x128xbf16>
    %45 = vector.shape_cast %44 : vector<16x16x128xbf16> to vector<256x128xbf16>
    %c0_27 = arith.constant 0 : index
    %c0_28 = arith.constant 0 : index
    %c768 = arith.constant 768 : index
    %46 = vector.load %arg4[%c0_27, %c0_28, %c768] : memref<1x128x2048xbf16, #tpu.memory_space<vmem>>, vector<1x128x512xbf16>
    %47 = vector.shape_cast %46 : vector<1x128x512xbf16> to vector<128x512xbf16>
    %cst_29 = arith.constant dense<0.000000e+00> : vector<256x512xf32>
    %48 = tpu.matmul %45, %47, %cst_29 {dimension_numbers = #tpu.dot_dimension_numbers<[1], [0], [0], [1], [0, 0, 1, 1], [], []>} : vector<256x128xbf16>, vector<128x512xbf16>, vector<256x512xf32> -> vector<256x512xf32>
    %49 = vector.extract_strided_slice %48 {offsets = [0, 0], sizes = [256, 128], strides = [1, 1]} : vector<256x512xf32> to vector<256x128xf32>
    %50 = arith.addf %39, %49 : vector<256x128xf32>
    %51 = vector.extract_strided_slice %48 {offsets = [0, 128], sizes = [256, 128], strides = [1, 1]} : vector<256x512xf32> to vector<256x128xf32>
    %52 = arith.addf %29, %51 : vector<256x128xf32>
    %53 = vector.extract_strided_slice %48 {offsets = [0, 256], sizes = [256, 128], strides = [1, 1]} : vector<256x512xf32> to vector<256x128xf32>
    %54 = arith.addf %40, %53 : vector<256x128xf32>
    %55 = vector.extract_strided_slice %48 {offsets = [0, 384], sizes = [256, 128], strides = [1, 1]} : vector<256x512xf32> to vector<256x128xf32>
    %c1_i32_30 = arith.constant 1 : i32
    %56 = arith.addi %1, %c1_i32_30 : i32
    %c0_31 = arith.constant 0 : index
    %57 = arith.index_cast %56 : i32 to index
    %c2_32 = arith.constant 2 : index
    %c0_33 = arith.constant 0 : index
    %58 = vector.load %arg3[%c0_31, %57, %c2_32, %c0_33] : memref<1x18x24x128xbf16, #tpu.memory_space<vmem>>, vector<1x16x16x128xbf16>
    %59 = vector.shape_cast %58 : vector<1x16x16x128xbf16> to vector<16x16x128xbf16>
    %60 = vector.shape_cast %59 : vector<16x16x128xbf16> to vector<256x128xbf16>
    %c0_34 = arith.constant 0 : index
    %c0_35 = arith.constant 0 : index
    %c1280 = arith.constant 1280 : index
    %61 = vector.load %arg4[%c0_34, %c0_35, %c1280] : memref<1x128x2048xbf16, #tpu.memory_space<vmem>>, vector<1x128x256xbf16>
    %62 = vector.shape_cast %61 : vector<1x128x256xbf16> to vector<128x256xbf16>
    %cst_36 = arith.constant dense<0.000000e+00> : vector<256x256xf32>
    %63 = tpu.matmul %60, %62, %cst_36 {dimension_numbers = #tpu.dot_dimension_numbers<[1], [0], [0], [1], [0, 0, 1, 1], [], []>} : vector<256x128xbf16>, vector<128x256xbf16>, vector<256x256xf32> -> vector<256x256xf32>
    %64 = vector.extract_strided_slice %63 {offsets = [0, 0], sizes = [256, 128], strides = [1, 1]} : vector<256x256xf32> to vector<256x128xf32>
    %65 = arith.addf %52, %64 : vector<256x128xf32>
    %66 = vector.extract_strided_slice %63 {offsets = [0, 128], sizes = [256, 128], strides = [1, 1]} : vector<256x256xf32> to vector<256x128xf32>
    %67 = arith.addf %55, %66 : vector<256x128xf32>
    %c2_i32 = arith.constant 2 : i32
    %68 = arith.addi %1, %c2_i32 : i32
    %c0_37 = arith.constant 0 : index
    %69 = arith.index_cast %68 : i32 to index
    %c0_38 = arith.constant 0 : index
    %c0_39 = arith.constant 0 : index
    %70 = vector.load %arg3[%c0_37, %69, %c0_38, %c0_39] : memref<1x18x24x128xbf16, #tpu.memory_space<vmem>>, vector<1x16x16x128xbf16>
    %71 = vector.shape_cast %70 : vector<1x16x16x128xbf16> to vector<16x16x128xbf16>
    %72 = vector.shape_cast %71 : vector<16x16x128xbf16> to vector<256x128xbf16>
    %c0_40 = arith.constant 0 : index
    %c0_41 = arith.constant 0 : index
    %c1536 = arith.constant 1536 : index
    %73 = vector.load %arg4[%c0_40, %c0_41, %c1536] : memref<1x128x2048xbf16, #tpu.memory_space<vmem>>, vector<1x128x128xbf16>
    %74 = vector.shape_cast %73 : vector<1x128x128xbf16> to vector<128x128xbf16>
    %cst_42 = arith.constant dense<0.000000e+00> : vector<256x128xf32>
    %75 = tpu.matmul %72, %74, %cst_42 {dimension_numbers = #tpu.dot_dimension_numbers<[1], [0], [0], [1], [0, 0, 1, 1], [], []>} : vector<256x128xbf16>, vector<128x128xbf16>, vector<256x128xf32> -> vector<256x128xf32>
    %76 = arith.addf %54, %75 : vector<256x128xf32>
    %c2_i32_43 = arith.constant 2 : i32
    %77 = arith.addi %1, %c2_i32_43 : i32
    %c0_44 = arith.constant 0 : index
    %78 = arith.index_cast %77 : i32 to index
    %c1_45 = arith.constant 1 : index
    %c0_46 = arith.constant 0 : index
    %79 = vector.load %arg3[%c0_44, %78, %c1_45, %c0_46] : memref<1x18x24x128xbf16, #tpu.memory_space<vmem>>, vector<1x16x16x128xbf16>
    %80 = vector.shape_cast %79 : vector<1x16x16x128xbf16> to vector<16x16x128xbf16>
    %81 = vector.shape_cast %80 : vector<16x16x128xbf16> to vector<256x128xbf16>
    %c0_47 = arith.constant 0 : index
    %c0_48 = arith.constant 0 : index
    %c1664 = arith.constant 1664 : index
    %82 = vector.load %arg4[%c0_47, %c0_48, %c1664] : memref<1x128x2048xbf16, #tpu.memory_space<vmem>>, vector<1x128x256xbf16>
    %83 = vector.shape_cast %82 : vector<1x128x256xbf16> to vector<128x256xbf16>
    %cst_49 = arith.constant dense<0.000000e+00> : vector<256x256xf32>
    %84 = tpu.matmul %81, %83, %cst_49 {dimension_numbers = #tpu.dot_dimension_numbers<[1], [0], [0], [1], [0, 0, 1, 1], [], []>} : vector<256x128xbf16>, vector<128x256xbf16>, vector<256x256xf32> -> vector<256x256xf32>
    %85 = vector.extract_strided_slice %84 {offsets = [0, 0], sizes = [256, 128], strides = [1, 1]} : vector<256x256xf32> to vector<256x128xf32>
    %86 = arith.addf %76, %85 : vector<256x128xf32>
    %87 = vector.extract_strided_slice %84 {offsets = [0, 128], sizes = [256, 128], strides = [1, 1]} : vector<256x256xf32> to vector<256x128xf32>
    %88 = arith.addf %67, %87 : vector<256x128xf32>
    %c2_i32_50 = arith.constant 2 : i32
    %89 = arith.addi %1, %c2_i32_50 : i32
    %c0_51 = arith.constant 0 : index
    %90 = arith.index_cast %89 : i32 to index
    %c2_52 = arith.constant 2 : index
    %c0_53 = arith.constant 0 : index
    %91 = vector.load %arg3[%c0_51, %90, %c2_52, %c0_53] : memref<1x18x24x128xbf16, #tpu.memory_space<vmem>>, vector<1x16x16x128xbf16>
    %92 = vector.shape_cast %91 : vector<1x16x16x128xbf16> to vector<16x16x128xbf16>
    %93 = vector.shape_cast %92 : vector<16x16x128xbf16> to vector<256x128xbf16>
    %c0_54 = arith.constant 0 : index
    %c0_55 = arith.constant 0 : index
    %c1920 = arith.constant 1920 : index
    %94 = vector.load %arg4[%c0_54, %c0_55, %c1920] : memref<1x128x2048xbf16, #tpu.memory_space<vmem>>, vector<1x128x128xbf16>
    %95 = vector.shape_cast %94 : vector<1x128x128xbf16> to vector<128x128xbf16>
    %cst_56 = arith.constant dense<0.000000e+00> : vector<256x128xf32>
    %96 = tpu.matmul %93, %95, %cst_56 {dimension_numbers = #tpu.dot_dimension_numbers<[1], [0], [0], [1], [0, 0, 1, 1], [], []>} : vector<256x128xbf16>, vector<128x128xbf16>, vector<256x128xf32> -> vector<256x128xf32>
    %97 = arith.addf %88, %96 : vector<256x128xf32>
    %c0_57 = arith.constant 0 : index
    %c0_58 = arith.constant 0 : index
    %c0_59 = arith.constant 0 : index
    %98 = vector.load %arg5[%c0_57, %c0_58, %c0_59] : memref<1x1x128xf32, #tpu.memory_space<vmem>>, vector<1x1x128xf32>
    %99 = vector.shape_cast %98 : vector<1x1x128xf32> to vector<1x128xf32>
    %100 = vector.broadcast %99 : vector<1x128xf32> to vector<256x128xf32>
    %101 = arith.addf %50, %100 : vector<256x128xf32>
    %c0_60 = arith.constant 0 : index
    %c0_61 = arith.constant 0 : index
    %c0_62 = arith.constant 0 : index
    %c0_63 = arith.constant 0 : index
    %c0_64 = arith.constant 0 : index
    %102 = vector.load %arg6[%c0_60, %c0_61, %c0_62, %c0_63, %c0_64] : memref<1x1x4x256x128xf32, #tpu.memory_space<vmem>>, vector<1x1x1x256x128xf32>
    %103 = vector.shape_cast %102 : vector<1x1x1x256x128xf32> to vector<256x128xf32>
    %104 = vector.shape_cast %101 : vector<256x128xf32> to vector<1x1x1x256x128xf32>
    tpu.vector_store %arg6[%c0_60, %c0_61, %c0_62, %c0_63, %c0_64], %104 {strides = array<i32>} : memref<1x1x4x256x128xf32, #tpu.memory_space<vmem>>, vector<1x1x1x256x128xf32>,
    %105 = vector.broadcast %99 : vector<1x128xf32> to vector<256x128xf32>
    %106 = arith.addf %65, %105 : vector<256x128xf32>
    %c0_65 = arith.constant 0 : index
    %c0_66 = arith.constant 0 : index
    %c1_67 = arith.constant 1 : index
    %c0_68 = arith.constant 0 : index
    %c0_69 = arith.constant 0 : index
    %107 = vector.load %arg6[%c0_65, %c0_66, %c1_67, %c0_68, %c0_69] : memref<1x1x4x256x128xf32, #tpu.memory_space<vmem>>, vector<1x1x1x256x128xf32>
    %108 = vector.shape_cast %107 : vector<1x1x1x256x128xf32> to vector<256x128xf32>
    %109 = vector.shape_cast %106 : vector<256x128xf32> to vector<1x1x1x256x128xf32>
    tpu.vector_store %arg6[%c0_65, %c0_66, %c1_67, %c0_68, %c0_69], %109 {strides = array<i32>} : memref<1x1x4x256x128xf32, #tpu.memory_space<vmem>>, vector<1x1x1x256x128xf32>,
    %110 = vector.broadcast %99 : vector<1x128xf32> to vector<256x128xf32>
    %111 = arith.addf %86, %110 : vector<256x128xf32>
    %c0_70 = arith.constant 0 : index
    %c0_71 = arith.constant 0 : index
    %c2_72 = arith.constant 2 : index
    %c0_73 = arith.constant 0 : index
    %c0_74 = arith.constant 0 : index
    %112 = vector.load %arg6[%c0_70, %c0_71, %c2_72, %c0_73, %c0_74] : memref<1x1x4x256x128xf32, #tpu.memory_space<vmem>>, vector<1x1x1x256x128xf32>
    %113 = vector.shape_cast %112 : vector<1x1x1x256x128xf32> to vector<256x128xf32>
    %114 = vector.shape_cast %111 : vector<256x128xf32> to vector<1x1x1x256x128xf32>
    tpu.vector_store %arg6[%c0_70, %c0_71, %c2_72, %c0_73, %c0_74], %114 {strides = array<i32>} : memref<1x1x4x256x128xf32, #tpu.memory_space<vmem>>, vector<1x1x1x256x128xf32>,
    %115 = vector.broadcast %99 : vector<1x128xf32> to vector<256x128xf32>
    %116 = arith.addf %97, %115 : vector<256x128xf32>
    %c0_75 = arith.constant 0 : index
    %c0_76 = arith.constant 0 : index
    %c3 = arith.constant 3 : index
    %c0_77 = arith.constant 0 : index
    %c0_78 = arith.constant 0 : index
    %117 = vector.load %arg6[%c0_75, %c0_76, %c3, %c0_77, %c0_78] : memref<1x1x4x256x128xf32, #tpu.memory_space<vmem>>, vector<1x1x1x256x128xf32>
    %118 = vector.shape_cast %117 : vector<1x1x1x256x128xf32> to vector<256x128xf32>
    %119 = vector.shape_cast %116 : vector<256x128xf32> to vector<1x1x1x256x128xf32>
    tpu.vector_store %arg6[%c0_75, %c0_76, %c3, %c0_77, %c0_78], %119 {strides = array<i32>} : memref<1x1x4x256x128xf32, #tpu.memory_space<vmem>>, vector<1x1x1x256x128xf32>,
    return
  }
  func.func @transform_0(%arg0: i32, %arg1: i32, %arg2: i32) -> (i32, i32, i32, i32) {
    %c0_i32 = arith.constant 0 : i32
    %c0_i32_0 = arith.constant 0 : i32
    %c0_i32_1 = arith.constant 0 : i32
    %c0_i32_2 = arith.constant 0 : i32
    return %arg0, %c0_i32, %c0_i32_0, %c0_i32_1 : i32, i32, i32, i32
  }
  func.func @transform_1(%arg0: i32, %arg1: i32, %arg2: i32) -> (i32, i32, i32) {
    %c0_i32 = arith.constant 0 : i32
    %c0_i32_0 = arith.constant 0 : i32
    %c0_i32_1 = arith.constant 0 : i32
    return %arg1, %c0_i32, %c0_i32_0 : i32, i32, i32
  }
  func.func @transform_2(%arg0: i32, %arg1: i32, %arg2: i32) -> (i32, i32, i32) {
    %c0_i32 = arith.constant 0 : i32
    %c0_i32_0 = arith.constant 0 : i32
    %c0_i32_1 = arith.constant 0 : i32
    return %arg1, %c0_i32, %c0_i32_0 : i32, i32, i32
  }
  func.func @transform_3(%arg0: i32, %arg1: i32, %arg2: i32) -> (i32, i32, i32, i32, i32) {
    %c0_i32 = arith.constant 0 : i32
    %c0_i32_0 = arith.constant 0 : i32
    %c0_i32_1 = arith.constant 0 : i32
    return %arg0, %arg2, %c0_i32, %c0_i32_0, %arg1 : i32, i32, i32, i32, i32
  }
}

</mosaic_0001>

<bundles_post_ra>
// kernel: upsample_forward.1
= control target key start
LH: loop header
LB: loop body
LE: loop exit
PB: predicated region body
PF: predicated region fallthrough
CT: control target
= control target key end

     0   :  { %s7236_s12 = smov 0   ;;  %s7238_s13 = smov 0   ;;  %s10712_s0 = inlined_call_operand.vmem [shape: bf16[2,18,24,128], index: 0, kind: input, shape index: {}]   ;;  %s10713_s1 = inlined_call_operand.vmem [shape: bf16[1,128,2048], index: 1, kind: input, shape index: {}]   ;;  %s10714_s2 = inlined_call_operand.vmem [shape: f32[1,1,128], index: 2, kind: input, shape index: {}]   ;;  %s10715_s3 = inlined_call_operand.vmem [shape: f32[2,1,4,256,128], index: 3, kind: output, shape index: {}]  }
   0x1   :  { %s7240_s14 = smov 0  }
   0x2 LB: > { %s32_s15 = sadd.s32 1, %s7209_s13  ;;  %p6197_p0 = scmp.ge.s32.totalorder %s7213_s14, 1  ;;  %s7213_s14 = sphi %s7240_s14, %s13_s14   ;;  %s7209_s13 = sphi %s7238_s13, %s11065_s13   ;;  %s7205_s12 = sphi %s7236_s12, %s11064_s12  }
   0x3   : > { %p34_p1 = scmp.ge.s32.totalorder %s32_s15, 2  ;;  %p178_p2 = scmp.lt.s32.totalorder %s7213_s14, 3 }
   0x5   : > { %s11067_s15 = smov (%p34_p1, %s32_s15), 0  ;;  %p179_p3 = pnand %p6197_p0, %p178_p2 }
   0x7   : > { %182 = sbr.rel (%p179_p3) target bundleno = 778 (0x30a), region = 32 }
   0xe   : > { %v698_v0 = vld [vmem:[%s10713_s1 + $0x4] sm:$0xff]  ;;  %v279_v2 = vld [vmem:[%s10713_s1] sm:$0xf]  ;;  %p217_p4 = scmp.lt.s32.totalorder %s7205_s12, 1  ;;  %v10718_v8 = vmov 0   ;;  %vm1404_vm3 = vcmask 1042432  }
   0xf   : > { %v699_v1 = vld [vmem:[%s10713_s1 + $0x44] sm:$0xff]  ;;  %v280_v4 = vld [vmem:[%s10713_s1 + $0x40] sm:$0xf]  ;;  %890 = vmatprep.mubr.bf16.mxu0 %v10718_v8  ;;  %vm311_vm0 = vsmask.f32 3328  ;;  %vm1405_vm4 = vcmask 1046532  }
  0x10   : > { %v6218_v3 = vcombine.high %v698_v0, %v699_v1  ;;  %v6217_v5 = vcombine.low %v698_v0, %v699_v1  ;;  %v700_v6 = vld [vmem:[%s10713_s1 + $0x84] sm:$0xff]  ;;  %v6249_v9 = vcombine.low %v279_v2, %v280_v4  ;;  %v281_v11 = vld [vmem:[%s10713_s1 + $0x80] sm:$0xf]  ;;  %s11069_s12 = smov (!%p217_p4, %s7205_s12), 1  ;;  %vm312_vm1 = vsmask.f32 7440  ;;  %vm7746_vm5 = vmor %vm1404_vm3, %vm1405_vm4 }
  0x11   : > { %v701_v7 = vld [vmem:[%s10713_s1 + $0xc4] sm:$0xff]  ;;  %v282_v12 = vld [vmem:[%s10713_s1 + $0xc0] sm:$0xf]  ;;  %s7101_s17 = smul.u32 216, %s11069_s12  ;;  %vm7386_vm2 = vmor %vm311_vm0, %vm312_vm1  ;;  %s6812_s24 = sshll.u32 %s11069_s12, 10 }
  0x12   : > { %v6220_v10 = vcombine.high %v700_v6, %v701_v7  ;;  %v702_v13 = vld [vmem:[%s10713_s1 + $0x104] sm:$0xff]  ;;  %858 = vmatprep.subr.bf16.mxu0 %v6218_v3  ;;  %v6250_v14 = vcombine.low %v281_v11, %v282_v12  ;;  %v283_v16 = vld [vmem:[%s10713_s1 + $0x100] sm:$0xf]  ;;  %6909 = vmatprep.subr.bf16.mxu1 %v6249_v9  ;;  %v6219_v18 = vcombine.low %v700_v6, %v701_v7  ;;  %s9104_s29 = scalar_lea.vmem %s10715_s3, %s6812_s24 }
  0x13   : > { %v703_v15 = vld [vmem:[%s10713_s1 + $0x144] sm:$0xff]  ;;  %v284_v17 = vld [vmem:[%s10713_s1 + $0x140] sm:$0xf]  ;;  %859 = vmatpush1.bf16.msra.mxu0 %v6217_v5  ;;  %6910 = vmatpush3.bf16.msra.mxu1 %v6249_v9  ;;  %s7309_s28 = scalar_lea.vmem %s10712_s0, %s7101_s17 }
  0x14   : > { %860 = vmatprep.subr.bf16.mxu0 %v6220_v10  ;;  %v6222_v19 = vcombine.high %v702_v13, %v703_v15  ;;  %6911 = vmatprep.subr.bf16.mxu1 %v6250_v14  ;;  %v6251_v20 = vcombine.low %v283_v16, %v284_v17  ;;  %v704_v21 = vld [vmem:[%s10713_s1 + $0x184] sm:$0xff]  ;;  %v285_v23 = vld [vmem:[%s10713_s1 + $0x180] sm:$0xf]  ;;  %v6221_v25 = vcombine.low %v702_v13, %v703_v15  ;;  %v7348_v52 = vld [vmem:[%s7309_s28 + $0xc] sm:$0xf]  ;;  %v10751_v16 = vmov 0 }
  0x15   : > { %v705_v22 = vld [vmem:[%s10713_s1 + $0x1c4] sm:$0xff]  ;;  %v286_v24 = vld [vmem:[%s10713_s1 + $0x1c0] sm:$0xf]  ;;  %v7351_v54 = vld [vmem:[%s7309_s28 + $0x10] sm:$0xf]  ;;  %v339_v63 = vshrl.u32 %v7348_v52, 16 }
  0x16   : > { %v6224_v26 = vcombine.high %v704_v21, %v705_v22  ;;  %v706_v27 = vld [vmem:[%s10713_s1 + $0x204] sm:$0xff]  ;;  %v6252_v28 = vcombine.low %v285_v23, %v286_v24  ;;  %v287_v30 = vld [vmem:[%s10713_s1 + $0x200] sm:$0xf]  ;;  %v6223_v36 = vcombine.low %v704_v21, %v705_v22  ;;  %v342_v1 = vshll.u32 %v7348_v52, 16  ;;  %v7384_v15 = vld [vmem:[%s7309_s28 + $0x18] sm:$0xf] }
  0x17   : > { %861 = vmatpush1.bf16.msra.mxu0 %v6219_v18  ;;  %6912 = vmatpush3.bf16.msra.mxu1 %v6250_v14  ;;  %v707_v29 = vld [vmem:[%s10713_s1 + $0x244] sm:$0xff]  ;;  %v247_v31 = vld [vmem:[%s7309_s28] sm:$0xf]  ;;  %v352_v2 = vshrl.u32 %v7351_v54, 16  ;;  %v348_v3 = vshll.u32 %v7351_v54, 16  ;;  %v341_v14 = vrot.slane %v339_v63, 4 }
  0x18   : > { %862 = vmatprep.subr.bf16.mxu0 %v6222_v19  ;;  %6913 = vmatprep.subr.bf16.mxu1 %v6251_v20  ;;  %v288_v32 = vld [vmem:[%s10713_s1 + $0x240] sm:$0xf]  ;;  %v7325_v33 = vld [vmem:[%s7309_s28 + $0x4] sm:$0xf]  ;;  %v315_v34 = vshrl.u32 %v247_v31, 16  ;;  %v318_v35 = vshll.u32 %v247_v31, 16  ;;  %v6226_v40 = vcombine.high %v706_v27, %v707_v29  ;;  %v6225_v48 = vcombine.low %v706_v27, %v707_v29 }
  0x19   : > { %v324_v37 = vshll.u32 %v7325_v33, 16  ;;  %v328_v38 = vshrl.u32 %v7325_v33, 16  ;;  %v6233_v39 = vcombine.low %v247_v31, %v7325_v33  ;;  %v6253_v41 = vcombine.low %v287_v30, %v288_v32  ;;  %v708_v42 = vld [vmem:[%s10713_s1 + $0x284] sm:$0xff]  ;;  %v289_v44 = vld [vmem:[%s10713_s1 + $0x280] sm:$0xf] }
  0x1a   : > { %v709_v43 = vld [vmem:[%s10713_s1 + $0x2c4] sm:$0xff]  ;;  %v290_v45 = vld [vmem:[%s10713_s1 + $0x2c0] sm:$0xf]  ;;  %v317_v46 = vrot.slane %v315_v34, 4  ;;  %v320_v47 = vrot.slane %v318_v35, 5  ;;  %v10752_v16 = vsel %vm7386_vm2, 4294967295, %v10751_v16 }
  0x1b   : > { %863 = vmatpush1.bf16.msra.mxu0 %v6221_v25  ;;  %6914 = vmatpush3.bf16.msra.mxu1 %v6251_v20  ;;  %v7342_v49 = vrot.slane %v324_v37, 5  ;;  %v330_v50 = vrot.slane %v328_v38, 4  ;;  %v7345_v51 = vld [vmem:[%s7309_s28 + $0x8] sm:$0x1]  ;;  %v6228_v53 = vcombine.high %v708_v42, %v709_v43  ;;  %v6254_v55 = vcombine.low %v289_v44, %v290_v45  ;;  %v291_v59 = vld [vmem:[%s10713_s1 + $0x300] sm:$0xf] }
  0x1c   : > { %864 = vmatprep.subr.bf16.mxu0 %v6224_v26  ;;  %6915 = vmatprep.subr.bf16.mxu1 %v6252_v28  ;;  %v710_v56 = vld [vmem:[%s10713_s1 + $0x304] sm:$0xff]  ;;  %v6227_v58 = vcombine.low %v708_v42, %v709_v43  ;;  %v292_v60 = vld [vmem:[%s10713_s1 + $0x340] sm:$0xf]  ;;  %v321_v61 = vor.u32 %v320_v47, %v317_v46  ;;  %v334_v62 = vshll.u32 %v7345_v51, 16  ;;  %10753 = vst [vmem:[#allocation2_spill] sm:$0xff] %v10752_v16  ;;  %v344_v18 = vrot.slane %v342_v1, 5 }
  0x1d   : > { %6925 = vmatprep.mubr.bf16.mxu1 %v6233_v39  ;;  %v711_v57 = vld [vmem:[%s10713_s1 + $0x344] sm:$0xff]  ;;  %v331_v0 = vor.u32 %v330_v50, %v7342_v49  ;;  %v6255_v6 = vcombine.low %v291_v59, %v292_v60  ;;  %v293_v9 = vld [vmem:[%s10713_s1 + $0x380] sm:$0xf]  ;;  %v7391_v19 = vld [vmem:[%s7309_s28 + $0x1c] sm:$0xf]  ;;  %v7393_v20 = vrot.slane %v348_v3, 5  ;;  %v6234_v46 = vcombine.low %v7348_v52, %v7351_v54 }
  0x1e   : > { %v6230_v4 = vcombine.high %v710_v56, %v711_v57  ;;  %v712_v5 = vld [vmem:[%s10713_s1 + $0x384] sm:$0xff]  ;;  %v294_v10 = vld [vmem:[%s10713_s1 + $0x3c0] sm:$0xf]  ;;  %v6229_v11 = vcombine.low %v710_v56, %v711_v57  ;;  %v322_v12 = vrot.slane %v321_v61, 4  ;;  %v336_v13 = vrot.slane %v334_v62, 5  ;;  %v1876_v25 = vld [vmem:[%s10713_s1 + $0x10] sm:$0xff] }
  0x1f   : > { %865 = vmatpush1.bf16.msra.mxu0 %v6223_v36  ;;  %6916 = vmatpush3.bf16.msra.mxu1 %v6252_v28  ;;  %v713_v7 = vld [vmem:[%s10713_s1 + $0x3c4] sm:$0xff]  ;;  %v332_v17 = vrot.slane %v331_v0, 4  ;;  %v354_v21 = vrot.slane %v352_v2, 4  ;;  %v7396_v23 = vld [vmem:[%s7309_s28 + $0x14] sm:$0x1]  ;;  %v6256_v24 = vcombine.low %v293_v9, %v294_v10  ;;  %v363_v27 = vshrl.u32 %v7384_v15, 16 }
  0x20   : > { %866 = vmatprep.subr.bf16.mxu0 %v6226_v40  ;;  %6917 = vmatprep.subr.bf16.mxu1 %v6253_v41  ;;  %v6232_v22 = vcombine.high %v712_v5, %v713_v7  ;;  %v1877_v26 = vld [vmem:[%s10713_s1 + $0x50] sm:$0xff]  ;;  %v366_v28 = vshll.u32 %v7384_v15, 16  ;;  %v6231_v29 = vcombine.low %v712_v5, %v713_v7  ;;  %v327_v30 = vsel %vm7386_vm2, %v322_v12, %v7342_v49  ;;  %v1519_v31 = vld [vmem:[%s10713_s1 + $0xc] sm:$0xf]  ;;  %v253_v60 = vld [vmem:[%s7309_s28 + $0x24] sm:$0xf] }
  0x21   : > { %v1520_v32 = vld [vmem:[%s10713_s1 + $0x4c] sm:$0xf]  ;;  %v376_v34 = vshrl.u32 %v7391_v19, 16  ;;  %v372_v35 = vshll.u32 %v7391_v19, 16  ;;  %v337_v36 = vsel %vm7386_vm2, %v332_v17, %v336_v13  ;;  %v345_v37 = vor.u32 %v344_v18, %v341_v14  ;;  %v1878_v44 = vld [vmem:[%s10713_s1 + $0x90] sm:$0xff] }
  0x22   : > { %v355_v38 = vor.u32 %v354_v21, %v7393_v20  ;;  %v358_v39 = vshll.u32 %v7396_v23, 16  ;;  %v6346_v40 = vcombine.high %v1876_v25, %v1877_v26  ;;  %v365_v42 = vrot.slane %v363_v27, 4  ;;  %v1521_v47 = vld [vmem:[%s10713_s1 + $0x8c] sm:$0xf]  ;;  %v1879_v52 = vld [vmem:[%s10713_s1 + $0xd0] sm:$0xff] }
  0x23   : > { %867 = vmatpush1.bf16.msra.mxu0 %v6225_v48  ;;  %6918 = vmatpush3.bf16.msra.mxu1 %v6253_v41  ;;  %v6289_v41 = vcombine.low %v1519_v31, %v1520_v32  ;;  %v368_v43 = vrot.slane %v366_v28, 5  ;;  %v6201_v45 = vcombine.low %v327_v30, %v337_v36  ;;  %v1522_v48 = vld [vmem:[%s10713_s1 + $0xcc] sm:$0xf]  ;;  %v7432_v49 = vrot.slane %v372_v35, 5  ;;  %v7444_v61 = vld [vmem:[%s7309_s28 + $0x28] sm:$0xf] }
  0x24   : > { %868 = vmatprep.subr.bf16.mxu0 %v6228_v53  ;;  %6919 = vmatprep.subr.bf16.mxu1 %v6254_v55  ;;  %v378_v50 = vrot.slane %v376_v34, 4  ;;  %v6345_v53 = vcombine.low %v1876_v25, %v1877_v26  ;;  %v356_v56 = vrot.slane %v355_v38, 4  ;;  %v360_v57 = vrot.slane %v358_v39, 5  ;;  %v1523_v5 = vld [vmem:[%s10713_s1 + $0x10c] sm:$0xf]  ;;  %v1880_v32 = vld [vmem:[%s10713_s1 + $0x110] sm:$0xff] }
  0x25   : > { %v6235_v59 = vcombine.low %v7384_v15, %v7391_v19  ;;  %v387_v62 = vshrl.u32 %v253_v60, 16  ;;  %v390_v63 = vshll.u32 %v253_v60, 16  ;;  %v6290_v0 = vcombine.low %v1521_v47, %v1522_v48  ;;  %v255_v13 = vld [vmem:[%s7309_s28 + $0x30] sm:$0xf]  ;;  %v7464_v17 = vld [vmem:[%s7309_s28 + $0x34] sm:$0xf] }
  0x26   : > { %v369_v1 = vor.u32 %v368_v43, %v365_v42  ;;  %v400_v2 = vshrl.u32 %v7444_v61, 16  ;;  %v379_v3 = vor.u32 %v378_v50, %v7432_v49  ;;  %v6348_v7 = vcombine.high %v1878_v44, %v1879_v52  ;;  %v1525_v25 = vld [vmem:[%s10713_s1 + $0x18c] sm:$0xf]  ;;  %v1881_v34 = vld [vmem:[%s10713_s1 + $0x150] sm:$0xff] }
  0x27   : > { %869 = vmatpush1.bf16.msra.mxu0 %v6227_v58  ;;  %6920 = vmatpush3.bf16.msra.mxu1 %v6254_v55  ;;  %v346_v55 = vrot.slane %v345_v37, 4  ;;  %v7435_v58 = vld [vmem:[%s7309_s28 + $0x20] sm:$0x1]  ;;  %v361_v10 = vsel %vm7386_vm2, %v356_v56, %v360_v57  ;;  %v396_v12 = vshll.u32 %v7444_v61, 16  ;;  %v389_v14 = vrot.slane %v387_v62, 4 }
  0x28   : > { %870 = vmatprep.subr.bf16.mxu0 %v6230_v4  ;;  %6921 = vmatprep.subr.bf16.mxu1 %v6255_v6  ;;  %v382_v4 = vshll.u32 %v7435_v58, 16  ;;  %v392_v15 = vrot.slane %v390_v63, 5  ;;  %v370_v18 = vrot.slane %v369_v1, 4  ;;  %v1526_v26 = vld [vmem:[%s10713_s1 + $0x1cc] sm:$0xf]  ;;  %v6236_v27 = vcombine.low %v253_v60, %v7444_v61 }
  0x29   : > { %v351_v9 = vsel %vm7386_vm2, %v346_v55, %v7393_v20  ;;  %v7474_v28 = vld [vmem:[%s7309_s28 + $0x2c] sm:$0x1]  ;;  %v402_v30 = vrot.slane %v400_v2, 4  ;;  %v6237_v31 = vcombine.low %v255_v13, %v7464_v17  ;;  %v411_v35 = vshrl.u32 %v255_v13, 16  ;;  %v7506_v55 = vld [vmem:[%s7309_s28 + $0x48] sm:$0xf] }
  0x2a   : > { %v6202_v20 = vcombine.low %v351_v9, %v361_v10  ;;  %v414_v36 = vshll.u32 %v255_v13, 16  ;;  %v424_v37 = vshrl.u32 %v7464_v17, 16  ;;  %v6292_v38 = vcombine.low %v1525_v25, %v1526_v26  ;;  %v1527_v43 = vld [vmem:[%s10713_s1 + $0x20c] sm:$0xf] }
  0x2b   : > { %871 = vmatpush1.bf16.msra.mxu0 %v6229_v11  ;;  %6922 = vmatpush3.bf16.msra.mxu1 %v6255_v6  ;;  %v1524_v6 = vld [vmem:[%s10713_s1 + $0x14c] sm:$0xf]  ;;  %v6347_v11 = vcombine.low %v1878_v44, %v1879_v52  ;;  %v375_v39 = vsel %vm7386_vm2, %v370_v18, %v7432_v49  ;;  %v406_v42 = vshll.u32 %v7474_v28, 16  ;;  %v420_v48 = vshll.u32 %v7464_v17, 16  ;;  %v7534_v18 = vld [vmem:[%s7309_s28 + $0x54] sm:$0xf] }
  0x2c   : > { %872 = vmatprep.subr.bf16.mxu0 %v6232_v22  ;;  %6923 = vmatprep.subr.bf16.mxu1 %v6256_v24  ;;  %v6291_v21 = vcombine.low %v1523_v5, %v1524_v6  ;;  %v380_v22 = vrot.slane %v379_v3, 4  ;;  %v1528_v44 = vld [vmem:[%s10713_s1 + $0x24c] sm:$0xf]  ;;  %v6349_v49 = vcombine.low %v1880_v32, %v1881_v34  ;;  %v6350_v50 = vcombine.high %v1880_v32, %v1881_v34  ;;  %v7519_v3 = vld [vmem:[%s7309_s28 + $0x38] sm:$0x1] }
  0x2d   : > { %v7509_v56 = vld [vmem:[%s7309_s28 + $0x4c] sm:$0xf]  ;;  %v6293_v57 = vcombine.low %v1527_v43, %v1528_v44  ;;  %v416_v52 = vrot.slane %v414_v36, 5  ;;  %v408_v2 = vrot.slane %v406_v42, 5  ;;  %v426_v5 = vrot.slane %v424_v37, 4 }
  0x2e   : > { %v1529_v63 = vld [vmem:[%s10713_s1 + $0x28c] sm:$0xf]  ;;  %v6239_v6 = vcombine.low %v7506_v55, %v7509_v56  ;;  %v430_v13 = vshll.u32 %v7519_v3, 16  ;;  %v7557_v32 = vld [vmem:[%s7309_s28 + $0x64] sm:$0xf]  ;;  %v10716_v42 = vrot.slane %v7351_v54, 5 }
  0x2f   : > { %873 = vmatpush1.bf16.msra.mxu0 %v6231_v29  ;;  %6924 = vmatpush3.bf16.msra.mxu1 %v6256_v24  ;;  %v384_v24 = vrot.slane %v382_v4, 5  ;;  %v7476_v29 = vrot.slane %v396_v12, 5  ;;  %v7521_v4 = vrot.slane %v420_v48, 5  ;;  %v1531_v25 = vld [vmem:[%s10713_s1 + $0x30c] sm:$0xf]  ;;  %10754 = vst [vmem:[#allocation3_spill] sm:$0xff] %v7557_v32 }
  0x30   : > { %2068 = vmatprep.subr.bf16.mxu0 %v6346_v40  ;;  %6957 = vmatprep.subr.bf16.mxu1 %v6289_v41  ;;  %v1532_v26 = vld [vmem:[%s10713_s1 + $0x34c] sm:$0xf]  ;;  %v432_v37 = vrot.slane %v430_v13, 5  ;;  %v459_v43 = vshrl.u32 %v7506_v55, 16 }
  0x31   : > { %v385_v40 = vsel %vm7386_vm2, %v380_v22, %v384_v24  ;;  %v403_v47 = vor.u32 %v402_v30, %v7476_v29  ;;  %v1882_v24 = vld [vmem:[%s10713_s1 + $0x190] sm:$0xff] }
  0x32   : > { %891 = vmatmul.mubr.bf16.vlgmr.msra.gmra.mrb[0].mxu0 %v6201_v45  ;;  %6926 = vmatmul.mubr.bf16.vlgmr.msra.gmra.mrb[0].mxu1 %v6234_v46  ;;  %v257_v45 = vld [vmem:[%s7309_s28 + $0x3c] sm:$0xf]  ;;  %v7501_v46 = vld [vmem:[%s7309_s28 + $0x40] sm:$0xf] }
  0x33   : > { %2069 = vmatpush1.bf16.msra.mxu0 %v6345_v53  ;;  %6958 = vmatpush3.bf16.msra.mxu1 %v6289_v41  ;;  %v393_v41 = vor.u32 %v392_v15, %v389_v14  ;;  %v413_v53 = vrot.slane %v411_v35, 4  ;;  %v6238_v60 = vcombine.low %v257_v45, %v7501_v46  ;;  %v404_v1 = vrot.slane %v403_v47, 4 }
  0x34   : > { %900 = vmatprep.mubr.bf16.mxu0 %v10718_v8  ;;  %6929 = vmatprep.mubr.bf16.mxu1 %v6235_v59  ;;  %v6203_v59 = vcombine.low %v375_v39, %v385_v40  ;;  %v438_v9 = vshll.u32 %v257_v45, 16  ;;  %v444_v22 = vshll.u32 %v7501_v46, 16 }
  0x35   : > { %6959 = vmatprep.subr.bf16.mxu1 %v6290_v0  ;;  %2070 = vmatprep.subr.bf16.mxu0 %v6348_v7  ;;  %v394_v62 = vrot.slane %v393_v41, 4  ;;  %v435_v7 = vshrl.u32 %v257_v45, 16  ;;  %v417_v12 = vor.u32 %v416_v52, %v413_v53  ;;  %v409_v15 = vsel %vm7386_vm2, %v404_v1, %v408_v2  ;;  %v7568_v45 = vld [vmem:[%s7309_s28 + $0x44] sm:$0x1]  ;;  %v1533_v52 = vld [vmem:[%s10713_s1 + $0x38c] sm:$0xf] }
  0x36   : > { %v440_v30 = vrot.slane %v438_v9, 5  ;;  %v7561_v39 = vrot.slane %v444_v22, 5  ;;  %v6295_v41 = vcombine.low %v1531_v25, %v1532_v26  ;;  %v468_v1 = vshll.u32 %v7509_v56, 16  ;;  %v7601_v9 = vld [vmem:[%s7309_s28 + $0x78] sm:$0xf] }
  0x37   : > { %2071 = vmatpush1.bf16.msra.mxu0 %v6347_v11  ;;  %6960 = vmatpush3.bf16.msra.mxu1 %v6290_v0  ;;  %v1530_v0 = vld [vmem:[%s10713_s1 + $0x2cc] sm:$0xf]  ;;  %v448_v11 = vshrl.u32 %v7501_v46, 16  ;;  %v399_v14 = vsel %vm7386_vm2, %v394_v62, %v7476_v29  ;;  %v437_v29 = vrot.slane %v435_v7, 4  ;;  %v418_v36 = vrot.slane %v417_v12, 4 }
  0x38   : > { %6961 = vmatprep.subr.bf16.mxu1 %v6291_v21  ;;  %2072 = vmatprep.subr.bf16.mxu0 %v6350_v50  ;;  %v6294_v10 = vcombine.low %v1529_v63, %v1530_v0  ;;  %v6204_v34 = vcombine.low %v399_v14, %v409_v15  ;;  %v472_v50 = vshrl.u32 %v7509_v56, 16  ;;  %v7588_v62 = vld [vmem:[%s7309_s28 + $0x70] sm:$0xf]  ;;  %v454_v0 = vshll.u32 %v7568_v45, 16 }
  0x39   : > { %v450_v40 = vrot.slane %v448_v11, 4  ;;  %v423_v53 = vsel %vm7386_vm2, %v418_v36, %v7521_v4  ;;  %v10717_v2 = vrot.slane %v7325_v33, 5  ;;  %v486_v7 = vshll.u32 %v7534_v18, 16 }
  0x3a   : > { %901 = vmatmul.mubr.bf16.gmra.mrb[4].mxu0 %v6202_v20  ;;  %6930 = vmatmul.mubr.bf16.gmra.mrb[4].mxu1 %v6236_v27  ;;  %v427_v20 = vor.u32 %v426_v5, %v7521_v4  ;;  %v1883_v27 = vld [vmem:[%s10713_s1 + $0x1d0] sm:$0xff]  ;;  %v7596_v4 = vrot.slane %v10716_v42, 4  ;;  %v461_v5 = vrot.slane %v459_v43, 4  ;;  %v456_v22 = vrot.slane %v454_v0, 5 }
  0x3b   : > { %910 = vmatprep.mubr.bf16.mxu0 %v10718_v8  ;;  %6933 = vmatprep.mubr.bf16.mxu1 %v6237_v31  ;;  %v7554_v31 = vld [vmem:[%s7309_s28 + $0x60] sm:$0xf]  ;;  %v6352_v47 = vcombine.high %v1882_v24, %v1883_v27  ;;  %v6351_v48 = vcombine.low %v1882_v24, %v1883_v27  ;;  %v451_v63 = vor.u32 %v450_v40, %v7561_v39  ;;  %v7608_v24 = vrot.slane %v468_v1, 5  ;;  %v1884_v40 = vld [vmem:[%s10713_s1 + $0x210] sm:$0xff] }
  0x3c   : > { %6962 = vmatpush3.bf16.msra.mxu1 %v6291_v21  ;;  %2073 = vmatpush1.bf16.msra.mxu0 %v6349_v49  ;;  %v7537_v21 = vld [vmem:[%s7309_s28 + $0x58] sm:$0xf]  ;;  %v6241_v44 = vcombine.low %v7554_v31, %v7557_v32  ;;  %v462_v49 = vshll.u32 %v7506_v55, 16  ;;  %v474_v25 = vrot.slane %v472_v50, 4  ;;  %v507_v26 = vshrl.u32 %v7554_v31, 16 }
  0x3d   : > { %6963 = vmatprep.subr.bf16.mxu1 %v6292_v38  ;;  %v6240_v35 = vcombine.low %v7534_v18, %v7537_v21  ;;  %2074 = vmatprep.subr.bf16.mxu0 %v6352_v47  ;;  %v7629_v36 = vrot.slane %v486_v7, 5  ;;  %v520_v43 = vshrl.u32 %v7557_v32, 16  ;;  %v7649_v50 = vld [vmem:[%s7309_s28 + $0x88] sm:$0xf]  ;;  %v7665_v7 = vld [vmem:[%s7309_s28 + $0x94] sm:$0xf] }
  0x3e   : > { %v464_v12 = vrot.slane %v462_v49, 5 }
  0x40   : > { %6964 = vmatpush3.bf16.msra.mxu1 %v6292_v38  ;;  %v428_v38 = vrot.slane %v427_v20, 4  ;;  %2075 = vmatpush1.bf16.msra.mxu0 %v6351_v48  ;;  %v452_v20 = vrot.slane %v451_v63, 4  ;;  %v269_v48 = vld [vmem:[%s7309_s28 + $0x84] sm:$0xf] }
  0x41   : > { %6965 = vmatprep.subr.bf16.mxu1 %v6293_v57 }
  0x42   : > { %911 = vmatmul.mubr.bf16.gmra.mrb[8].mxu0 %v6203_v59  ;;  %6934 = vmatmul.mubr.bf16.gmra.mrb[8].mxu1 %v6238_v60  ;;  %v1534_v59 = vld [vmem:[%s10713_s1 + $0x3cc] sm:$0xf]  ;;  %v433_v55 = vsel %vm7386_vm2, %v428_v38, %v432_v37  ;;  %v496_v37 = vshrl.u32 %v7537_v21, 16  ;;  %v510_v38 = vshll.u32 %v7554_v31, 16  ;;  %v465_v31 = vor.u32 %v464_v12, %v461_v5 }
  0x43   : > { %920 = vmatprep.mubr.bf16.mxu0 %v10718_v8  ;;  %6937 = vmatprep.mubr.bf16.mxu1 %v6239_v6  ;;  %v7585_v60 = vld [vmem:[%s7309_s28 + $0x6c] sm:$0xf]  ;;  %v483_v6 = vshrl.u32 %v7534_v18, 16  ;;  %v6296_v11 = vcombine.low %v1533_v52, %v1534_v59  ;;  %v6205_v13 = vcombine.low %v423_v53, %v433_v55  ;;  %v457_v49 = vsel %vm7386_vm2, %v452_v20, %v456_v22  ;;  %v271_v55 = vld [vmem:[%s7309_s28 + $0x90] sm:$0xf] }
  0x44   : > { %6966 = vmatpush3.bf16.msra.mxu1 %v6293_v57  ;;  %v441_v57 = vor.u32 %v440_v30, %v437_v29  ;;  %v6242_v14 = vcombine.low %v7585_v60, %v7588_v62  ;;  %v7615_v29 = vld [vmem:[%s7309_s28 + $0x50] sm:$0x1]  ;;  %v7620_v30 = vld [vmem:[%s10713_s1 + $0x18] sm:$0xff]  ;;  %v475_v53 = vor.u32 %v474_v25, %v7608_v24  ;;  %v492_v52 = vshll.u32 %v7537_v21, 16  ;;  %v7728_v18 = vld [vmem:[%s7309_s28 + $0xb4] sm:$0xf] }
  0x45   : > { %6967 = vmatprep.subr.bf16.mxu1 %v6294_v10  ;;  %v7654_v59 = vrot.slane %v507_v26, 4  ;;  %v7660_v1 = vrot.slane %v510_v38, 5  ;;  %v498_v25 = vrot.slane %v496_v37, 4  ;;  %v606_v37 = vshll.u32 %v271_v55, 16 }
  0x46   : > { %v442_v15 = vrot.slane %v441_v57, 4  ;;  %v478_v57 = vshll.u32 %v7615_v29, 16  ;;  %v7670_v22 = vrot.slane %v492_v52, 5  ;;  %v516_v52 = vshll.u32 %v7557_v32, 16 }
  0x48   : > { %6968 = vmatpush3.bf16.msra.mxu1 %v6294_v10  ;;  %v7604_v10 = vld [vmem:[%s7309_s28 + $0x7c] sm:$0xf]  ;;  %v447_v47 = vsel %vm7386_vm2, %v442_v15, %v7561_v39  ;;  %v534_v39 = vshll.u32 %v7585_v60, 16  ;;  %v476_v15 = vrot.slane %v475_v53, 4  ;;  %v480_v20 = vrot.slane %v478_v57, 5 }
  0x49   : > { %6969 = vmatprep.subr.bf16.mxu1 %v6295_v41  ;;  %v6243_v27 = vcombine.low %v7601_v9, %v7604_v10  ;;  %v7683_v53 = vld [vmem:[%s7309_s28 + $0x9c] sm:$0xf] }
  0x4a   : > { %921 = vmatmul.mubr.bf16.gmra.mrb[12].mxu0 %v6204_v34  ;;  %6938 = vmatmul.mubr.bf16.gmra.mrb[12].mxu1 %v6240_v35  ;;  %v7625_v34 = vld [vmem:[%s10713_s1 + $0x58] sm:$0xff]  ;;  %v7627_v35 = vrot.slane %v483_v6, 4  ;;  %v555_v6 = vshrl.u32 %v7601_v9, 16  ;;  %v7672_v26 = vrot.slane %v534_v39, 5  ;;  %v481_v39 = vsel %vm7386_vm2, %v476_v15, %v480_v20 }
  0x4b   : > { %930 = vmatprep.mubr.bf16.mxu0 %v10718_v8  ;;  %6941 = vmatprep.mubr.bf16.mxu1 %v6241_v44  ;;  %v531_v44 = vshrl.u32 %v7585_v60, 16  ;;  %v6426_v63 = vcombine.high %v7620_v30, %v7625_v34  ;;  %v6244_v60 = vcombine.low %v269_v48, %v7649_v50  ;;  %v513_v15 = vor.u32 %v7660_v1, %v7654_v59  ;;  %v1358_v59 = vld [vmem:[%s7309_s28 + $0x18] sm:$0xe] }
  0x4c   : > { %6970 = vmatpush3.bf16.msra.mxu1 %v6295_v41  ;;  %v1885_v41 = vld [vmem:[%s10713_s1 + $0x250] sm:$0xff]  ;;  %v489_v57 = vor.u32 %v7629_v36, %v7627_v35  ;;  %v630_v5 = vshll.u32 %v7683_v53, 16  ;;  %v1423_v1 = vrot.slane %v7391_v19, 5 }
  0x4d   : > { %6971 = vmatprep.subr.bf16.mxu1 %v6296_v11  ;;  %v6353_v0 = vcombine.low %v1884_v40, %v1885_v41  ;;  %v7667_v12 = vrot.slane %v531_v44, 4  ;;  %v7680_v44 = vrot.slane %v555_v6, 4  ;;  %v522_v6 = vrot.slane %v520_v43, 4 }
  0x4e   : > { %v627_v43 = vshrl.u32 %v7683_v53, 16 }
  0x50   : > { %6972 = vmatpush3.bf16.msra.mxu1 %v6296_v11  ;;  %v6354_v11 = vcombine.high %v1884_v40, %v1885_v41  ;;  %v6245_v40 = vcombine.low %v271_v55, %v7665_v7  ;;  %v7678_v41 = vld [vmem:[%s7309_s28 + $0x5c] sm:$0x1] }
  0x51   : > { %2981 = vmatprep.subr.bf16.mxu1 %v6426_v63  ;;  %v7701_v63 = vld [vmem:[%s7309_s28 + $0xac] sm:$0xf]  ;;  %v502_v35 = vshll.u32 %v7678_v41, 16 }
  0x52   : > { %931 = vmatmul.mubr.bf16.gmra.mrb[16].mxu0 %v6205_v13  ;;  %6942 = vmatmul.mubr.bf16.gmra.mrb[16].mxu1 %v6242_v14  ;;  %v6206_v13 = vcombine.low %v447_v47, %v457_v49  ;;  %v466_v14 = vrot.slane %v465_v31, 4  ;;  %v579_v47 = vshrl.u32 %v269_v48, 16  ;;  %v582_v31 = vshll.u32 %v269_v48, 16 }
  0x53   : > { %940 = vmatprep.mubr.bf16.mxu0 %v10718_v8  ;;  %6945 = vmatprep.mubr.bf16.mxu1 %v6243_v27  ;;  %v558_v27 = vshll.u32 %v7601_v9, 16  ;;  %v603_v49 = vshrl.u32 %v271_v55, 16  ;;  %v7686_v9 = vld [vmem:[%s7309_s28 + $0xa0] sm:$0xf]  ;;  %v7698_v55 = vld [vmem:[%s7309_s28 + $0xa8] sm:$0xf] }
  0x54   : > { %2076 = vmatprep.subr.bf16.mxu0 %v6354_v11  ;;  %v471_v48 = vsel %vm7386_vm2, %v466_v14, %v7608_v24  ;;  %v1356_v11 = vld [vmem:[%s7309_s28] sm:$0xe]  ;;  %v7712_v24 = vrot.slane %v579_v47, 4  ;;  %v6246_v47 = vcombine.low %v7683_v53, %v7686_v9 }
  0x55   : > { %2077 = vmatpush1.bf16.msra.mxu0 %v6353_v0  ;;  %v499_v0 = vor.u32 %v498_v25, %v7670_v22  ;;  %v7705_v36 = vrot.slane %v558_v27, 5  ;;  %v7716_v14 = vrot.slane %v603_v49, 4  ;;  %v6207_v20 = vcombine.low %v471_v48, %v481_v39  ;;  %v1886_v49 = vld [vmem:[%s10713_s1 + $0x290] sm:$0xff] }
  0x56   : > { %v490_v25 = vrot.slane %v489_v57, 4  ;;  %v7719_v27 = vrot.slane %v516_v52, 5  ;;  %v1887_v57 = vld [vmem:[%s10713_s1 + $0x2d0] sm:$0xff]  ;;  %v7740_v52 = vld [vmem:[%s7309_s28 + $0xb8] sm:$0xf]  ;;  %v6257_v48 = vrot.slane %v1356_v11, 9 }
  0x57   : > { %10756 = vst [vmem:[#allocation5_spill] sm:$0xff] %v7716_v14  ;;  %v500_v38 = vrot.slane %v499_v0, 4  ;;  %v1411_v39 = vrot.slane %v10717_v2, 4  ;;  %v10760_v14 = vmov 0   ;;  %v6356_v53 = vcombine.high %v1886_v49, %v1887_v57 }
  0x58   : > { %v495_v11 = vsel %vm7386_vm2, %v490_v25, %v7670_v22  ;;  %v523_v2 = vor.u32 %v522_v6, %v7719_v27  ;;  %v6248_v6 = vcombine.low %v7728_v18, %v7740_v52  ;;  %v10761_v25 = vrot.slane %v7325_v33, 5  ;;  %v7779_v22 = vld [vmem:[%s7309_s28 + $0x74] sm:$0x1] }
  0x59   : > { %2078 = vmatprep.subr.bf16.mxu0 %v6356_v53  ;;  %v1425_v33 = vrot.slane %v1423_v1, 4 }
  0x5a   : > { %941 = vmatmul.mubr.bf16.gmra.mrb[20].mxu0 %v6206_v13  ;;  %6946 = vmatmul.mubr.bf16.gmra.mrb[20].mxu1 %v6244_v60  ;;  %v7710_v13 = vld [vmem:[%s7309_s28 + $0x68] sm:$0x1]  ;;  %v7714_v60 = vrot.slane %v582_v31, 5  ;;  %v504_v31 = vrot.slane %v502_v35, 5  ;;  %v1412_v35 = vrot.slane %v7345_v51, 5 }
  0x5b   : > { %950 = vmatprep.mubr.bf16.mxu0 %v10718_v8  ;;  %6949 = vmatprep.mubr.bf16.mxu1 %v6245_v40  ;;  %10755 = vst [vmem:[#allocation4_spill] sm:$0xff] %v7710_v13  ;;  %v7723_v40 = vrot.slane %v606_v37, 5  ;;  %v6247_v37 = vcombine.low %v7698_v55, %v7701_v63  ;;  %v526_v42 = vshll.u32 %v7710_v13, 16  ;;  %v1357_v8 = vld [vmem:[%s7309_s28 + $0xc] sm:$0xe]  ;;  %v7766_v13 = vrot.slane %v627_v43, 4 }
  0x5c   : > { %v505_v51 = vsel %vm7386_vm2, %v500_v38, %v504_v31  ;;  %v1410_v38 = vsel %vm7746_vm5, %v6257_v48, %v10761_v25  ;;  %v1413_v19 = vsel %vm7746_vm5, %v1411_v39, %v1412_v35  ;;  %v6258_v32 = vrot.slane %v1357_v8, 9 }
  0x5d   : > { %10757 = vst [vmem:[#allocation6_spill] sm:$0xff] %v7723_v40  ;;  %v6355_v40 = vcombine.low %v1886_v49, %v1887_v57  ;;  %v528_v31 = vrot.slane %v526_v42, 5  ;;  %v6208_v49 = vcombine.low %v495_v11, %v505_v51  ;;  %v524_v57 = vrot.slane %v523_v2, 4 }
  0x5e   : > { %v6259_v43 = vrot.slane %v1358_v59, 9  ;;  %v537_v48 = vor.u32 %v7672_v26, %v7667_v12  ;;  %v7787_v8 = vrot.slane %v630_v5, 5  ;;  %v651_v2 = vshrl.u32 %v7698_v55, 16 }
  0x5f   : > { %2079 = vmatpush1.bf16.msra.mxu0 %v6355_v40  ;;  %v654_v39 = vshll.u32 %v7698_v55, 16  ;;  %v664_v35 = vshrl.u32 %v7701_v63, 16  ;;  %v10763_v40 = vrot.slane %v7351_v54, 5  ;;  %v10764_v12 = vrot.slane %v7396_v23, 5  ;;  %v1359_v54 = vld [vmem:[%s7309_s28 + $0x24] sm:$0xe] }
  0x60   : > { %v550_v5 = vshll.u32 %v7779_v22, 16  ;;  %v529_v59 = vsel %vm7386_vm2, %v524_v57, %v528_v31  ;;  %v564_v23 = vshll.u32 %v7604_v10, 16  ;;  %v1437_v31 = vrot.slane %v7464_v17, 5  ;;  %v1889_v17 = vld [vmem:[%s10713_s1 + $0x350] sm:$0xff] }
  0x61   : > { %v1417_v11 = vsel %vm7746_vm5, %v6258_v32, %v10763_v40  ;;  %v1420_v26 = vsel %vm7746_vm5, %v7596_v4, %v10764_v12  ;;  %v1430_v32 = vrot.slane %v7444_v61, 5  ;;  %v1424_v4 = vsel %vm7746_vm5, %v6259_v43, %v1423_v1  ;;  %v7830_v1 = vld [vmem:[%s10713_s1 + $0xd8] sm:$0xff] }
  0x62   : > { %951 = vmatmul.mubr.bf16.gmra.mrb[24].mxu0 %v6207_v20  ;;  %6950 = vmatmul.mubr.bf16.gmra.mrb[24].mxu1 %v6246_v47  ;;  %v540_v20 = vshll.u32 %v7588_v62, 16  ;;  %v514_v47 = vrot.slane %v513_v15, 4  ;;  %v10762_v15 = vshrl.u32 %v7588_v62, 16  ;;  %v6274_v61 = vcombine.low %v1417_v11, %v1420_v26 }
  0x63   : > { %960 = vmatprep.mubr.bf16.mxu0 %v10760_v14  ;;  %6953 = vmatprep.mubr.bf16.mxu1 %v6247_v37  ;;  %v1426_v37 = vrot.slane %v7435_v58, 5  ;;  %v6273_v58 = vcombine.low %v1410_v38, %v1413_v19  ;;  %v7818_v38 = vrot.slane %v651_v2, 4  ;;  %v6425_v19 = vcombine.low %v7620_v30, %v7625_v34  ;;  %v1888_v34 = vld [vmem:[%s10713_s1 + $0x310] sm:$0xff] }
  0x64   : > { %v7783_v25 = vrot.slane %v540_v20, 5  ;;  %v546_v42 = vrot.slane %v10762_v15, 4  ;;  %v519_v51 = vsel %vm7386_vm2, %v514_v47, %v7719_v27  ;;  %v7815_v27 = vrot.slane %v537_v48, 4  ;;  %v1360_v47 = vld [vmem:[%s7309_s28 + $0x30] sm:$0xe] }
  0x65   : > { %v1427_v20 = vsel %vm7746_vm5, %v1425_v33, %v1426_v37  ;;  %v6209_v57 = vcombine.low %v519_v51, %v529_v59  ;;  %v552_v43 = vrot.slane %v550_v5, 5  ;;  %v6260_v37 = vrot.slane %v1359_v54, 9 }
  0x66   : > { %v547_v53 = vor.u32 %v546_v42, %v7783_v25  ;;  %v1433_v30 = vrot.slane %v7474_v28, 5  ;;  %v6275_v33 = vcombine.low %v1424_v4, %v1427_v20  ;;  %v1432_v48 = vrot.slane %v1430_v32, 4  ;;  %v1361_v4 = vld [vmem:[%s7309_s28 + $0x3c] sm:$0xe] }
  0x67   : > { %v7841_v15 = vrot.slane %v564_v23, 5  ;;  %v10765_v42 = vshrl.u32 %v7604_v10, 16  ;;  %v543_v28 = vsel %vm7386_vm2, %v7815_v27, %v7783_v25  ;;  %v6261_v40 = vrot.slane %v1360_v47, 9  ;;  %v2733_v20 = vld [vmem:[%s10713_s1 + $0x118] sm:$0xff] }
  0x68   : > { %v561_v11 = vor.u32 %v7705_v36, %v7680_v44  ;;  %v1439_v12 = vrot.slane %v1437_v31, 4  ;;  %v1440_v26 = vrot.slane %v7519_v3, 5  ;;  %v588_v51 = vshll.u32 %v7649_v50, 16 }
  0x69   : > { %v570_v2 = vrot.slane %v10765_v42, 4  ;;  %v1444_v25 = vrot.slane %v7501_v46, 5  ;;  %v6358_v23 = vcombine.high %v1888_v34, %v1889_v17  ;;  %v1431_v44 = vsel %vm7746_vm5, %v6260_v37, %v1430_v32  ;;  %v2735_v46 = vld [vmem:[%s10713_s1 + $0x158] sm:$0xff] }
  0x6a   : > { %961 = vmatmul.mubr.bf16.gmra.mrb[28].mxu0 %v6208_v49  ;;  %6954 = vmatmul.mubr.bf16.gmra.mrb[28].mxu1 %v6248_v6  ;;  %v7825_v6 = vld [vmem:[%s10713_s1 + $0x98] sm:$0xff]  ;;  %v7835_v49 = vld [vmem:[%s7309_s28 + $0x80] sm:$0x1]  ;;  %v1434_v3 = vsel %vm7746_vm5, %v1432_v48, %v1433_v30  ;;  %v6357_v27 = vcombine.low %v1888_v34, %v1889_v17  ;;  %v1451_v47 = vrot.slane %v7509_v56, 5  ;;  %v7890_v30 = vrot.slane %v588_v51, 5 }
  0x6b   : > { %970 = vmatprep.mubr.bf16.mxu0 %v10760_v14  ;;  %6973 = vmatprep.mubr.bf16.mxu1 %v6273_v58  ;;  %v548_v58 = vrot.slane %v547_v53, 4  ;;  %v574_v5 = vshll.u32 %v7835_v49, 16  ;;  %v6429_v59 = vcombine.low %v7825_v6, %v7830_v1  ;;  %v6430_v54 = vcombine.high %v7825_v6, %v7830_v1  ;;  %v1362_v1 = vld [vmem:[%s7309_s28 + $0x48] sm:$0xe]  ;;  %v2739_v42 = vld [vmem:[%s10713_s1 + $0x1d8] sm:$0xff] }
  0x6c   : > { %v571_v36 = vor.u32 %v570_v2, %v7841_v15  ;;  %v1438_v53 = vsel %vm7746_vm5, %v6261_v40, %v1437_v31  ;;  %v7879_v6 = vrot.slane %v561_v11, 4  ;;  %v7897_v31 = vld [vmem:[%s10713_s1 + $0x198] sm:$0xff]  ;;  %v6262_v56 = vrot.slane %v1361_v4, 9  ;;  %2080 = vmatprep.subr.bf16.mxu0 %v6358_v23 }
  0x6d   : > { %v553_v32 = vsel %vm7386_vm2, %v548_v58, %v552_v43  ;;  %v7885_v37 = vrot.slane %v574_v5, 5  ;;  %v10766_v43 = vshrl.u32 %v7649_v50, 16  ;;  %v6434_v48 = vcombine.high %v2733_v20, %v2735_v46  ;;  %2081 = vmatpush1.bf16.msra.mxu0 %v6357_v27  ;;  %v2743_v4 = vld [vmem:[%s10713_s1 + $0x258] sm:$0xff] }
  0x6e   : > { %v6210_v2 = vcombine.low %v543_v28, %v553_v32  ;;  %v572_v17 = vrot.slane %v571_v36, 4  ;;  %v6263_v58 = vrot.slane %v1362_v1, 9  ;;  %v585_v40 = vor.u32 %v7714_v60, %v7712_v24  ;;  %v10767_v32 = vld [vmem:[#allocation3_spill] sm:$0xff] }
  0x6f   : > { %v594_v34 = vrot.slane %v10766_v43, 4  ;;  %v6276_v11 = vcombine.low %v1431_v44, %v1434_v3  ;;  %v1454_v5 = vrot.slane %v7615_v29, 5  ;;  %v6433_v51 = vcombine.low %v2733_v20, %v2735_v46  ;;  %v7946_v43 = vld [vmem:[%s10713_s1 + $0x298] sm:$0xff] }
  0x70   : > { %v1458_v28 = vrot.slane %v7537_v21, 5  ;;  %v567_v24 = vsel %vm7386_vm2, %v7879_v6, %v7841_v15  ;;  %v1445_v60 = vsel %vm7746_vm5, %v6262_v56, %v1444_v25  ;;  %v6438_v29 = vcombine.high %v7897_v31, %v2739_v42  ;;  %v7940_v6 = vld [vmem:[%s7309_s28 + $0x98] sm:$0x1] }
  0x71   : > { %v612_v44 = vshll.u32 %v7665_v7, 16  ;;  %v577_v21 = vsel %vm7386_vm2, %v572_v17, %v7885_v37  ;;  %v1452_v15 = vsel %vm7746_vm5, %v6263_v58, %v1451_v47  ;;  %v7926_v36 = vrot.slane %v585_v40, 4 }
  0x72   : > { %971 = vmatmul.mubr.bf16.gmra.mrb[32].mxu0 %v6209_v57  ;;  %6974 = vmatmul.mubr.bf16.vlgmr.msra.gmra.mrb[32].mxu1 %v6274_v61  ;;  %v1441_v57 = vsel %vm7746_vm5, %v1439_v12, %v1440_v26  ;;  %v7888_v61 = vld [vmem:[%s7309_s28 + $0x8c] sm:$0x1]  ;;  %v1453_v26 = vrot.slane %v1451_v47, 4  ;;  %v1461_v27 = vrot.slane %v7678_v41, 5  ;;  %v6437_v37 = vcombine.low %v7897_v31, %v2739_v42  ;;  %v7951_v41 = vld [vmem:[%s10713_s1 + $0x2d8] sm:$0xff]  ;;  %v1891_v42 = vld [vmem:[%s10713_s1 + $0x3d0] sm:$0xff] }
  0x73   : > { %980 = vmatprep.mubr.bf16.mxu0 %v10760_v14  ;;  %2982 = vmatpush1.bf16.msra.mxu1 %v6425_v19  ;;  %v1446_v19 = vrot.slane %v1444_v25, 4  ;;  %v6277_v12 = vcombine.low %v1438_v53, %v1441_v57  ;;  %v598_v23 = vshll.u32 %v7888_v61, 16  ;;  %v2741_v25 = vld [vmem:[%s10713_s1 + $0x218] sm:$0xff]  ;;  %v1465_v53 = vrot.slane %v10767_v32, 5 }
  0x74   : > { %6977 = vmatprep.mubr.bf16.mxu1 %v6275_v33  ;;  %2983 = vmatprep.subr.bf16.mxu1 %v6430_v54  ;;  %v1447_v33 = vrot.slane %v7568_v45, 5  ;;  %v1363_v45 = vld [vmem:[%s7309_s28 + $0x54] sm:$0xe]  ;;  %v595_v54 = vor.u32 %v594_v34, %v7890_v30  ;;  %v1455_v20 = vsel %vm7746_vm5, %v1453_v26, %v1454_v5  ;;  %v1460_v57 = vrot.slane %v1458_v28, 4  ;;  %v10770_v5 = vld [vmem:[#allocation5_spill] sm:$0xff] }
  0x75   : > { %v6264_v46 = vrot.slane %v1363_v45, 9  ;;  %v600_v47 = vrot.slane %v598_v23, 5  ;;  %v1890_v34 = vld [vmem:[%s10713_s1 + $0x390] sm:$0xff]  ;;  %v10768_v31 = vshrl.u32 %v7665_v7, 16  ;;  %v6279_v58 = vcombine.low %v1452_v15, %v1455_v20  ;;  %v10771_v45 = vld [vmem:[#allocation6_spill] sm:$0xff] }
  0x76   : > { %v1448_v3 = vsel %vm7746_vm5, %v1446_v19, %v1447_v33  ;;  %v596_v1 = vrot.slane %v595_v54, 4  ;;  %v7956_v19 = vrot.slane %v612_v44, 5  ;;  %v591_v40 = vsel %vm7386_vm2, %v7926_v36, %v7890_v30  ;;  %v1365_v23 = vld [vmem:[%s7309_s28 + $0x6c] sm:$0xe] }
  0x77   : > { %2984 = vmatpush1.bf16.msra.mxu1 %v6429_v59  ;;  %v1364_v59 = vld [vmem:[%s7309_s28 + $0x60] sm:$0xe]  ;;  %v618_v33 = vrot.slane %v10768_v31, 4  ;;  %v6278_v17 = vcombine.low %v1445_v60, %v1448_v3  ;;  %v622_v54 = vshll.u32 %v7940_v6, 16  ;;  %v6360_v60 = vcombine.high %v1890_v34, %v1891_v42 }
  0x78   : > { %2985 = vmatprep.subr.bf16.mxu1 %v6434_v48  ;;  %v6265_v56 = vrot.slane %v1364_v59, 9  ;;  %v6442_v48 = vcombine.high %v2741_v25, %v2743_v4  ;;  %v1459_v59 = vsel %vm7746_vm5, %v6264_v46, %v1458_v28  ;;  %v6446_v30 = vcombine.high %v7946_v43, %v7951_v41 }
  0x79   : > { %v619_v44 = vor.u32 %v618_v33, %v7956_v19  ;;  %v6359_v3 = vcombine.low %v1890_v34, %v1891_v42  ;;  %v601_v28 = vsel %vm7386_vm2, %v596_v1, %v600_v47  ;;  %v1462_v15 = vsel %vm7746_vm5, %v1460_v57, %v1461_v27  ;;  %2082 = vmatprep.subr.bf16.mxu0 %v6360_v60  ;;  %v8007_v47 = vld [vmem:[%s10713_s1 + $0x398] sm:$0xff] }
  0x7a   : > { %981 = vmatmul.mubr.bf16.gmra.mrb[36].mxu0 %v6210_v2  ;;  %6978 = vmatmul.mubr.bf16.gmra.mrb[36].mxu1 %v6276_v11  ;;  %v6211_v2 = vcombine.low %v567_v24, %v577_v21  ;;  %v1467_v11 = vrot.slane %v1465_v53, 4  ;;  %v6441_v24 = vcombine.low %v2741_v25, %v2743_v4  ;;  %v7981_v21 = vld [vmem:[%s10713_s1 + $0x318] sm:$0xff]  ;;  %v1466_v36 = vsel %vm7746_vm5, %v6265_v56, %v1465_v53 }
  0x7b   : > { %990 = vmatprep.mubr.bf16.mxu0 %v10760_v14  ;;  %6981 = vmatprep.mubr.bf16.mxu1 %v6277_v12  ;;  %v10769_v12 = vld [vmem:[#allocation4_spill] sm:$0xff]  ;;  %v2751_v25 = vld [vmem:[%s10713_s1 + $0x358] sm:$0xff]  ;;  %v6266_v4 = vrot.slane %v1365_v23, 9  ;;  %v636_v20 = vshll.u32 %v7686_v9, 16  ;;  %v624_v46 = vrot.slane %v622_v54, 5  ;;  %v1475_v32 = vrot.slane %v7779_v22, 5 }
  0x7c   : > { %2986 = vmatpush1.bf16.msra.mxu1 %v6433_v51  ;;  %v1468_v26 = vrot.slane %v10769_v12, 5  ;;  %v609_v51 = vor.u32 %v10771_v45, %v10770_v5  ;;  %v1366_v53 = vld [vmem:[%s7309_s28 + $0x78] sm:$0xe]  ;;  %v6445_v1 = vcombine.low %v7946_v43, %v7951_v41  ;;  %v620_v57 = vrot.slane %v619_v44, 4  ;;  %2083 = vmatpush1.bf16.msra.mxu0 %v6359_v3  ;;  %v8039_v45 = vld [vmem:[%s10713_s1 + $0x20] sm:$0xff] }
  0x7d   : > { %2987 = vmatprep.subr.bf16.mxu1 %v6438_v29  ;;  %v1472_v29 = vrot.slane %v7588_v62, 5  ;;  %v7985_v62 = vrot.slane %v654_v39, 5  ;;  %v6450_v34 = vcombine.high %v7981_v21, %v2751_v25  ;;  %v675_v22 = vshrl.u32 %v7728_v18, 16  ;;  %v2755_v43 = vld [vmem:[%s10713_s1 + $0x3d8] sm:$0xff] }
  0x7e   : > { %v1469_v55 = vsel %vm7746_vm5, %v1467_v11, %v1468_v26  ;;  %v610_v39 = vrot.slane %v609_v51, 4  ;;  %v6212_v56 = vcombine.low %v591_v40, %v601_v28  ;;  %v6280_v31 = vcombine.low %v1459_v59, %v1462_v15  ;;  %v8029_v40 = vld [vmem:[%s7309_s28 + $0xa4] sm:$0x1]  ;;  %v1367_v59 = vld [vmem:[%s7309_s28 + $0x84] sm:$0xe] }
  0x7f   : > { %v1474_v27 = vrot.slane %v1472_v29, 4  ;;  %v6281_v41 = vcombine.low %v1466_v36, %v1469_v55  ;;  %v6449_v11 = vcombine.low %v7981_v21, %v2751_v25  ;;  %v1482_v26 = vrot.slane %v7835_v49, 5  ;;  %v8044_v51 = vld [vmem:[%s10713_s1 + $0x60] sm:$0xff]  ;;  %v1368_v21 = vld [vmem:[%s7309_s28 + $0x90] sm:$0xe] }
  0x80   : > { %2988 = vmatpush1.bf16.msra.mxu1 %v6437_v37  ;;  %v1479_v37 = vrot.slane %v7604_v10, 5  ;;  %v615_v33 = vsel %vm7386_vm2, %v610_v39, %v7956_v19  ;;  %v10772_v10 = vshrl.u32 %v7686_v9, 16  ;;  %v625_v19 = vsel %vm7386_vm2, %v620_v57, %v624_v46  ;;  %v8076_v55 = vld [vmem:[%s7309_s28 + $0xb0] sm:$0x1] }
  0x81   : > { %2989 = vmatprep.subr.bf16.mxu1 %v6442_v48  ;;  %v8018_v48 = vrot.slane %v636_v20, 5  ;;  %v6454_v5 = vcombine.high %v8007_v47, %v2755_v43  ;;  %v678_v54 = vshll.u32 %v7728_v18, 16  ;;  %v633_v49 = vor.u32 %v7787_v8, %v7766_v13 }
  0x82   : > { %991 = vmatmul.mubr.bf16.gmra.mrb[40].mxu0 %v6211_v2  ;;  %6982 = vmatmul.mubr.bf16.gmra.mrb[40].mxu1 %v6278_v17  ;;  %v642_v42 = vrot.slane %v10772_v10, 4  ;;  %v8024_v2 = vsel %vm7746_vm5, %v6266_v4, %v1472_v29  ;;  %v1476_v17 = vsel %vm7746_vm5, %v1474_v27, %v1475_v32  ;;  %v1481_v12 = vrot.slane %v1479_v37, 4  ;;  %v8053_v29 = vld [vmem:[%s10713_s1 + $0x28] sm:$0xff] }
  0x83   : > { %1000 = vmatprep.mubr.bf16.mxu0 %v10760_v14  ;;  %6985 = vmatprep.mubr.bf16.mxu1 %v6279_v58  ;;  %v6267_v58 = vrot.slane %v1366_v53, 9  ;;  %v660_v23 = vshll.u32 %v7701_v63, 16  ;;  %v6282_v60 = vcombine.low %v8024_v2, %v1476_v17  ;;  %v646_v8 = vshll.u32 %v8029_v40, 16 }
  0x84   : > { %2990 = vmatpush1.bf16.msra.mxu1 %v6441_v24  ;;  %v8058_v24 = vld [vmem:[%s10713_s1 + $0x68] sm:$0xff]  ;;  %v643_v13 = vor.u32 %v642_v42, %v8018_v48  ;;  %v1486_v44 = vrot.slane %v7649_v50, 5  ;;  %v6453_v3 = vcombine.low %v8007_v47, %v2755_v43  ;;  %v6428_v28 = vcombine.high %v8039_v45, %v8044_v51 }
  0x85   : > { %2991 = vmatprep.subr.bf16.mxu1 %v6446_v30  ;;  %v6213_v30 = vcombine.low %v615_v33, %v625_v19  ;;  %v1480_v15 = vsel %vm7746_vm5, %v6267_v58, %v1479_v37  ;;  %v1483_v36 = vsel %vm7746_vm5, %v1481_v12, %v1482_v26  ;;  %v1493_v25 = vrot.slane %v7665_v7, 5 }
  0x86   : > { %v6506_v50 = vcombine.high %v8053_v29, %v8058_v24  ;;  %v634_v39 = vrot.slane %v633_v49, 4  ;;  %v6268_v4 = vrot.slane %v1367_v59, 9  ;;  %v8080_v20 = vrot.slane %v660_v23, 5  ;;  %3174 = vmatprep.subr.bf16.mxu0 %v6428_v28 }
  0x87   : > { %v666_v46 = vrot.slane %v664_v35, 4  ;;  %v644_v27 = vrot.slane %v643_v13, 4  ;;  %v648_v32 = vrot.slane %v646_v8, 5  ;;  %v1488_v53 = vrot.slane %v1486_v44, 4  ;;  %v310_v8 = vld [vmem:[%s7309_s28 + $0xbc] sm:$0x1] }
  0x88   : > { %2992 = vmatpush1.bf16.msra.mxu1 %v6445_v1  ;;  %v1489_v7 = vrot.slane %v7888_v61, 5  ;;  %v688_v1 = vshrl.u32 %v7740_v52, 16  ;;  %v6283_v47 = vcombine.low %v1480_v15, %v1483_v36  ;;  %v657_v57 = vor.u32 %v7985_v62, %v7818_v38 }
  0x89   : > { %2993 = vmatprep.subr.bf16.mxu1 %v6450_v34  ;;  %v670_v37 = vshll.u32 %v8076_v55, 16  ;;  %v1369_v34 = vld [vmem:[%s7309_s28 + $0x9c] sm:$0xe]  ;;  %v1496_v35 = vrot.slane %v7940_v6, 5  ;;  %v1500_v43 = vrot.slane %v7686_v9, 5  ;;  %v677_v61 = vrot.slane %v675_v22, 4 }
  0x8a   : > { %1001 = vmatmul.mubr.bf16.gmra.mrb[44].mxu0 %v6212_v56  ;;  %6986 = vmatmul.mubr.bf16.gmra.mrb[44].mxu1 %v6280_v31  ;;  %v6269_v56 = vrot.slane %v1368_v21, 9  ;;  %v1495_v31 = vrot.slane %v1493_v25, 4  ;;  %v639_v38 = vsel %vm7386_vm2, %v634_v39, %v8018_v48  ;;  %v1487_v62 = vsel %vm7746_vm5, %v6268_v4, %v1486_v44  ;;  %v1370_v6 = vld [vmem:[%s7309_s28 + $0xa8] sm:$0xe] }
  0x8b   : > { %1010 = vmatprep.mubr.bf16.mxu0 %v10760_v14  ;;  %6989 = vmatprep.mubr.bf16.mxu1 %v6281_v41  ;;  %v667_v41 = vor.u32 %v666_v46, %v8080_v20  ;;  %v649_v9 = vsel %vm7386_vm2, %v644_v27, %v648_v32  ;;  %v1490_v18 = vsel %vm7746_vm5, %v1488_v53, %v1489_v7  ;;  %v1507_v22 = vrot.slane %v7701_v63, 5 }
  0x8c   : > { %2994 = vmatpush1.bf16.msra.mxu1 %v6449_v11  ;;  %v684_v33 = vshll.u32 %v7740_v52, 16  ;;  %v680_v48 = vrot.slane %v678_v54, 5  ;;  %v658_v10 = vrot.slane %v657_v57, 4  ;;  %v672_v42 = vrot.slane %v670_v37, 5 }
  0x8d   : > { %2995 = vmatprep.subr.bf16.mxu1 %v6454_v5  ;;  %v6270_v2 = vrot.slane %v1369_v34, 9  ;;  %v1494_v17 = vsel %vm7746_vm5, %v6269_v56, %v1493_v25  ;;  %v1497_v58 = vsel %vm7746_vm5, %v1495_v31, %v1496_v35  ;;  %v1502_v11 = vrot.slane %v1500_v43, 4  ;;  %v6364_v31 = vld [vmem:[%s7309_s28 + $0x18] sm:$0xf] }
  0x8e   : > { %v1503_v19 = vrot.slane %v8029_v40, 5  ;;  %v6214_v63 = vcombine.low %v639_v38, %v649_v9  ;;  %v6284_v12 = vcombine.low %v1487_v62, %v1490_v18  ;;  %v668_v26 = vrot.slane %v667_v41, 4  ;;  %v6361_v40 = vld [vmem:[%s7309_s28 + $0xc] sm:$0xf]  ;;  %v6365_v38 = vld [vmem:[%s7309_s28 + $0x1c] sm:$0xf] }
  0x8f   : > { %v6271_v5 = vrot.slane %v1370_v6, 9  ;;  %v1509_v54 = vrot.slane %v1507_v22, 4  ;;  %v1510_v49 = vrot.slane %v8076_v55, 5  ;;  %v686_v23 = vrot.slane %v684_v33, 5  ;;  %v6363_v62 = vld [vmem:[%s7309_s28 + $0x14] sm:$0x1] }
  0x90   : > { %2996 = vmatpush1.bf16.msra.mxu1 %v6453_v3  ;;  %v6285_v13 = vcombine.low %v1494_v17, %v1497_v58  ;;  %v663_v59 = vsel %vm7386_vm2, %v658_v10, %v8080_v20  ;;  %v1501_v44 = vsel %vm7746_vm5, %v6270_v2, %v1500_v43  ;;  %v673_v21 = vsel %vm7386_vm2, %v668_v26, %v672_v42 }
  0x91   : > { %3799 = vmatprep.subr.bf16.mxu1 %v6506_v50  ;;  %v1504_v3 = vsel %vm7746_vm5, %v1502_v11, %v1503_v19  ;;  %v1508_v28 = vsel %vm7746_vm5, %v6271_v5, %v1507_v22  ;;  %v681_v15 = vor.u32 %v680_v48, %v677_v61  ;;  %v1511_v36 = vsel %vm7746_vm5, %v1509_v54, %v1510_v49  ;;  %v1371_v50 = vld [vmem:[%s7309_s28 + $0xb4] sm:$0xe]  ;;  %v6367_v5 = vld [vmem:[%s7309_s28 + $0x24] sm:$0xf] }
  0x92   : > { %1011 = vmatmul.mubr.bf16.gmra.mrb[48].mxu0 %v6213_v30  ;;  %6990 = vmatmul.mubr.bf16.gmra.mrb[48].mxu1 %v6282_v60  ;;  %v690_v60 = vrot.slane %v688_v1, 4  ;;  %v6362_v30 = vld [vmem:[%s7309_s28 + $0x10] sm:$0xf]  ;;  %v694_v55 = vshll.u32 %v310_v8, 16  ;;  %v1514_v39 = vrot.slane %v7740_v52, 5  ;;  %v2342_v4 = vshrl.u32 %v6361_v40, 16 }
  0x93   : > { %1020 = vmatprep.mubr.bf16.mxu0 %v10760_v14  ;;  %6993 = vmatprep.mubr.bf16.mxu1 %v6283_v47  ;;  %v2345_v20 = vshll.u32 %v6361_v40, 16  ;;  %v2351_v46 = vshll.u32 %v6362_v30, 16  ;;  %v2355_v27 = vshrl.u32 %v6362_v30, 16  ;;  %v6286_v32 = vcombine.low %v1501_v44, %v1504_v3 }
  0x94   : > { %v691_v25 = vor.u32 %v690_v60, %v686_v23  ;;  %v6215_v53 = vcombine.low %v663_v59, %v673_v21  ;;  %v6287_v7 = vcombine.low %v1508_v28, %v1511_v36  ;;  %v682_v1 = vrot.slane %v681_v15, 4  ;;  %v6366_v60 = vld [vmem:[%s7309_s28 + $0x20] sm:$0x1]  ;;  %v7143_v36 = vld [vmem:[%s7309_s28 + $0xc] sm:$0xff]  }
  0x95   : > { %v6272_v47 = vrot.slane %v1371_v50, 9  ;;  %v696_v37 = vrot.slane %v694_v55, 5  ;;  %v1516_v34 = vrot.slane %v1514_v39, 4  ;;  %v1517_v56 = vrot.slane %v310_v8, 5  ;;  %v6369_v50 = vld [vmem:[%s7309_s28 + $0x2c] sm:$0x1] }
  0x96   : > { %v692_v57 = vrot.slane %v691_v25, 4  ;;  %v2344_v35 = vrot.slane %v2342_v4, 4  ;;  %v2347_v43 = vrot.slane %v2345_v20, 5  ;;  %v2353_v52 = vrot.slane %v2351_v46, 5  ;;  %v3641_v25 = vld [vmem:[%s10713_s1 + $0xa8] sm:$0xff] }
  0x97   : > { %v2357_v61 = vrot.slane %v2355_v27, 4  ;;  %v687_v41 = vsel %vm7386_vm2, %v682_v1, %v686_v23  ;;  %v2366_v9 = vshrl.u32 %v6364_v31, 16  ;;  %v2369_v18 = vshll.u32 %v6364_v31, 16  ;;  %v3642_v20 = vld [vmem:[%s10713_s1 + $0xe8] sm:$0xff]  ;;  %v2732_v1 = vld [vmem:[%s10713_s1 + $0xe0] sm:$0xff] }
  0x98   : > { %v697_v6 = vsel %vm7386_vm2, %v692_v57, %v696_v37  ;;  %v1515_v22 = vsel %vm7746_vm5, %v6272_v47, %v1514_v39  ;;  %v2375_v33 = vshll.u32 %v6365_v38, 16  ;;  %v2379_v48 = vshrl.u32 %v6365_v38, 16  ;;  %v3644_v38 = vld [vmem:[%s10713_s1 + $0x168] sm:$0xff] }
  0x99   : > { %v1518_v10 = vsel %vm7746_vm5, %v1516_v34, %v1517_v56  ;;  %v2348_v42 = vor.u32 %v2347_v43, %v2344_v35  ;;  %v2358_v2 = vor.u32 %v2357_v61, %v2353_v52  ;;  %v2361_v17 = vshll.u32 %v6363_v62, 16  ;;  %v6370_v34 = vld [vmem:[%s7309_s28 + $0x30] sm:$0xf]  ;;  %v8189_v35 = vld [vmem:[%s10713_s1 + $0x160] sm:$0xff]  ;;  %v3643_v61 = vld [vmem:[%s10713_s1 + $0x128] sm:$0xff] }
  0x9a   : > { %1021 = vmatmul.mubr.bf16.gmra.mrb[52].mxu0 %v6214_v63  ;;  %6994 = vmatmul.mubr.bf16.gmra.mrb[52].mxu1 %v6284_v12  ;;  %v6216_v58 = vcombine.low %v687_v41, %v697_v6  ;;  %v2368_v11 = vrot.slane %v2366_v9, 4  ;;  %v2371_v19 = vrot.slane %v2369_v18, 5  ;;  %v6288_v63 = vcombine.low %v1515_v22, %v1518_v10  ;;  %v7144_v10 = vld [vmem:[%s7309_s28 + $0x18] sm:$0xff]  }
  0x9b   : > { %1030 = vmatprep.mubr.bf16.mxu0 %v10760_v14  ;;  %6997 = vmatprep.mubr.bf16.mxu1 %v6285_v13  ;;  %v8145_v12 = vrot.slane %v2375_v33, 5  ;;  %v2381_v26 = vrot.slane %v2379_v48, 4  ;;  %v2349_v54 = vrot.slane %v2348_v42, 4  ;;  %v2359_v49 = vrot.slane %v2358_v2, 4  ;;  %v6368_v13 = vld [vmem:[%s7309_s28 + $0x28] sm:$0xf] }
  0x9c   : > { %v2363_v23 = vrot.slane %v2361_v17, 5  ;;  %v2372_v8 = vor.u32 %v2371_v19, %v2368_v11  ;;  %v2390_v59 = vshrl.u32 %v6367_v5, 16  ;;  %v2393_v44 = vshll.u32 %v6367_v5, 16  ;;  %v6373_v17 = vld [vmem:[%s7309_s28 + $0x3c] sm:$0xf]  ;;  %v3646_v11 = vld [vmem:[%s10713_s1 + $0x1e8] sm:$0xff] }
  0x9d   : > { %v2382_v40 = vor.u32 %v2381_v26, %v8145_v12  ;;  %v2385_v30 = vshll.u32 %v6366_v60, 16  ;;  %v2354_v21 = vsel %vm7386_vm2, %v2349_v54, %v2353_v52  ;;  %v2399_v28 = vshll.u32 %v6368_v13, 16  ;;  %v2738_v5 = vld [vmem:[%s10713_s1 + $0x1a0] sm:$0xff] }
  0x9e   : > { %v2364_v3 = vsel %vm7386_vm2, %v2359_v49, %v2363_v23  ;;  %v2403_v15 = vshrl.u32 %v6368_v13, 16  ;;  %v2373_v55 = vrot.slane %v2372_v8, 4  ;;  %v2392_v39 = vrot.slane %v2390_v59, 4  ;;  %v2740_v54 = vld [vmem:[%s10713_s1 + $0x1e0] sm:$0xff]  ;;  %v6372_v59 = vld [vmem:[%s7309_s28 + $0x38] sm:$0x1] }
  0x9f   : > { %v2395_v4 = vrot.slane %v2393_v44, 5  ;;  %v8165_v46 = vcombine.low %v2354_v21, %v2364_v3  ;;  %v6427_v27 = vcombine.low %v8039_v45, %v8044_v51  ;;  %v6505_v47 = vcombine.low %v8053_v29, %v8058_v24  ;;  %v6371_v45 = vld [vmem:[%s7309_s28 + $0x34] sm:$0xf]  ;;  %v8184_v51 = vld [vmem:[%s10713_s1 + $0x120] sm:$0xff] }
  0xa0   : > { %v8177_v57 = vrot.slane %v2399_v28, 5  ;;  %v2405_v37 = vrot.slane %v2403_v15, 4  ;;  %v2409_v56 = vshll.u32 %v6369_v50, 16  ;;  %v6508_v31 = vcombine.high %v3641_v25, %v3642_v20  ;;  %v6374_v13 = vld [vmem:[%s7309_s28 + $0x40] sm:$0xf]  ;;  %v8233_v28 = vld [vmem:[%s10713_s1 + $0x228] sm:$0xff] }
  0xa1   : > { %v2378_v29 = vsel %vm7386_vm2, %v2373_v55, %v8145_v12  ;;  %v2396_v24 = vor.u32 %v2395_v4, %v2392_v39  ;;  %v6507_v43 = vcombine.low %v3641_v25, %v3642_v20  ;;  %v2414_v9 = vshrl.u32 %v6370_v34, 16  ;;  %v3648_v15 = vld [vmem:[%s10713_s1 + $0x268] sm:$0xff]  ;;  %v2742_v39 = vld [vmem:[%s10713_s1 + $0x220] sm:$0xff] }
  0xa2   : > { %1031 = vmatmul.mubr.bf16.gmra.mrb[56].mxu0 %v6215_v53  ;;  %6998 = vmatmul.mubr.bf16.gmra.mrb[56].mxu1 %v6286_v32  ;;  %v2383_v32 = vrot.slane %v2382_v40, 4  ;;  %v2387_v53 = vrot.slane %v2385_v30, 5  ;;  %v2417_v18 = vshll.u32 %v6370_v34, 16  ;;  %v2406_v6 = vor.u32 %v2405_v37, %v8177_v57  ;;  %v2744_v4 = vld [vmem:[%s10713_s1 + $0x260] sm:$0xff] }
  0xa3   : > { %1040 = vmatprep.mubr.bf16.mxu0 %v10760_v14  ;;  %7001 = vmatprep.mubr.bf16.mxu1 %v6287_v7  ;;  %v2730_v7 = vld [vmem:[%s10713_s1 + $0xa0] sm:$0xff]  ;;  %v2423_v22 = vshll.u32 %v6371_v45, 16  ;;  %v2427_v33 = vshrl.u32 %v6371_v45, 16  ;;  %v6436_v48 = vcombine.high %v8184_v51, %v8189_v35  ;;  %v6510_v42 = vcombine.high %v3643_v61, %v3644_v38  ;;  %v3650_v45 = vld [vmem:[%s10713_s1 + $0x2e8] sm:$0xff] }
  0xa4   : > { %v6432_v52 = vcombine.high %v2730_v7, %v2732_v1  ;;  %v2388_v62 = vsel %vm7386_vm2, %v2383_v32, %v2387_v53  ;;  %v6431_v41 = vcombine.low %v2730_v7, %v2732_v1  ;;  %v2411_v2 = vrot.slane %v2409_v56, 5  ;;  %v7145_v7 = vld [vmem:[%s7309_s28 + $0x24] sm:$0xff]  }
  0xa5   : > { %v8216_v19 = vcombine.low %v2378_v29, %v2388_v62  ;;  %v2416_v12 = vrot.slane %v2414_v9, 4  ;;  %v2419_v26 = vrot.slane %v2417_v18, 5  ;;  %v2407_v49 = vrot.slane %v2406_v6, 4  ;;  %v6376_v62 = vld [vmem:[%s7309_s28 + $0x48] sm:$0xf] }
  0xa6   : > { %v8224_v23 = vrot.slane %v2423_v22, 5  ;;  %v2429_v60 = vrot.slane %v2427_v33, 4  ;;  %v6509_v8 = vcombine.low %v3643_v61, %v3644_v38  ;;  %v6435_v44 = vcombine.low %v8184_v51, %v8189_v35  ;;  %v8275_v9 = vld [vmem:[%s7309_s28 + $0x4c] sm:$0xf] }
  0xa7   : > { %v2438_v30 = vshrl.u32 %v6373_v17, 16  ;;  %v2441_v21 = vshll.u32 %v6373_v17, 16  ;;  %v6440_v3 = vcombine.high %v2738_v5, %v2740_v54  ;;  %v2420_v25 = vor.u32 %v2419_v26, %v2416_v12  ;;  %v2752_v12 = vld [vmem:[%s10713_s1 + $0x360] sm:$0xff] }
  0xa8   : > { %v2447_v55 = vshll.u32 %v6374_v13, 16  ;;  %v2451_v50 = vshrl.u32 %v6374_v13, 16  ;;  %v2412_v20 = vsel %vm7386_vm2, %v2407_v49, %v2411_v2  ;;  %v2433_v32 = vshll.u32 %v6372_v59, 16  ;;  %v7146_v13 = vld [vmem:[%s7309_s28 + $0x30] sm:$0xff]  }
  0xa9   : > { %v6439_v1 = vcombine.low %v2738_v5, %v2740_v54  ;;  %v2440_v37 = vrot.slane %v2438_v30, 4  ;;  %v2443_v34 = vrot.slane %v2441_v21, 5  ;;  %v6444_v56 = vcombine.high %v2742_v39, %v2744_v4 }
  0xaa   : > { %1041 = vmatmul.mubr.bf16.gmra.mrb[60].mxu0 %v6216_v58  ;;  %7002 = vmatmul.mubr.bf16.gmra.mrb[60].mxu1 %v6288_v63  ;;  %v3645_v58 = vld [vmem:[%s10713_s1 + $0x1a8] sm:$0xff]  ;;  %v2397_v63 = vrot.slane %v2396_v24, 4  ;;  %v2421_v35 = vrot.slane %v2420_v25, 4  ;;  %v8264_v29 = vrot.slane %v2447_v55, 5  ;;  %v2453_v24 = vrot.slane %v2451_v50, 4 }
  0xab   : > { %2100 = vmatprep.mubr.bf16.mxu0 %v10760_v14  ;;  %3013 = vmatprep.mubr.bf16.mxu1 %v10760_v14  ;;  %v6512_v40 = vcombine.high %v3645_v58, %v3646_v11  ;;  %v6511_v53 = vcombine.low %v3645_v58, %v3646_v11  ;;  %v2435_v38 = vrot.slane %v2433_v32, 5  ;;  %v6443_v18 = vcombine.low %v2742_v39, %v2744_v4  ;;  %v8310_v50 = vld [vmem:[%s7309_s28 + $0x50] sm:$0x1] }
  0xac   : > { %v2444_v22 = vor.u32 %v2443_v34, %v2440_v37  ;;  %v2426_v2 = vsel %vm7386_vm2, %v2421_v35, %v8224_v23  ;;  %v2454_v17 = vor.u32 %v2453_v24, %v8264_v29  ;;  %v2462_v58 = vshrl.u32 %v6376_v62, 16 }
  0xad   : > { %v2465_v11 = vshll.u32 %v6376_v62, 16  ;;  %v2471_v5 = vshll.u32 %v8275_v9, 16  ;;  %v2475_v54 = vshrl.u32 %v8275_v9, 16 }
  0xae   : > { %v2455_v21 = vrot.slane %v2454_v17, 4  ;;  %v8351_v17 = vld [vmem:[%s10713_s1 + $0x34] sm:$0xff] }
  0xaf   : > { %v2477_v25 = vrot.slane %v2475_v54, 4  ;;  %v4092_v54 = vld [vmem:[%s10713_s1 + $0x30] sm:$0xf] }
  0xb2   : > { %2101 = vmatmul.mubr.bf16.vlgmr.msra.gmra.mrb[64].mxu0 %v7143_v36  ;;  %3014 = vmatmul.mubr.bf16.vlgmr.msra.gmra.mrb[64].mxu1 %v8165_v46  ;;  %v2402_v36 = vsel %vm7386_vm2, %v2397_v63, %v8177_v57  ;;  %v6375_v57 = vld [vmem:[%s7309_s28 + $0x44] sm:$0x1] }
  0xb3   : > { %3175 = vmatpush1.bf16.msra.mxu0 %v6427_v27  ;;  %3800 = vmatpush1.bf16.msra.mxu1 %v6505_v47  ;;  %v2430_v27 = vor.u32 %v2429_v60, %v8224_v23  ;;  %v6514_v47 = vcombine.high %v8233_v28, %v3648_v15  ;;  %v8262_v51 = vcombine.low %v2402_v36, %v2412_v20  ;;  %v2457_v33 = vshll.u32 %v6375_v57, 16  ;;  %v2750_v63 = vld [vmem:[%s10713_s1 + $0x320] sm:$0xff]  ;;  %v3653_v20 = vld [vmem:[%s10713_s1 + $0x3a8] sm:$0xff] }
  0xb4   : > { %2110 = vmatprep.mubr.bf16.mxu0 %v10760_v14  ;;  %3023 = vmatprep.mubr.bf16.mxu1 %v10760_v14  ;;  %v8307_v36 = vrot.slane %v2471_v5, 5  ;;  %v6451_v4 = vcombine.low %v2750_v63, %v2752_v12 }
  0xb5   : > { %3801 = vmatprep.subr.bf16.mxu1 %v6508_v31  ;;  %3176 = vmatprep.subr.bf16.mxu0 %v6432_v52  ;;  %v3649_v31 = vld [vmem:[%s10713_s1 + $0x2a8] sm:$0xff]  ;;  %v2748_v52 = vld [vmem:[%s10713_s1 + $0x2e0] sm:$0xff]  ;;  %v2431_v61 = vrot.slane %v2430_v27, 4  ;;  %v2459_v59 = vrot.slane %v2457_v33, 5 }
  0xb6   : > { %v6516_v6 = vcombine.high %v3649_v31, %v3650_v45  ;;  %v6515_v49 = vcombine.low %v3649_v31, %v3650_v45  ;;  %v3654_v27 = vld [vmem:[%s10713_s1 + $0x3e8] sm:$0xff]  ;;  %v2481_v31 = vshll.u32 %v8310_v50, 16  ;;  %v8346_v33 = vld [vmem:[%s7309_s28 + $0x64] sm:$0xf] }
  0xb7   : > { %3177 = vmatpush1.bf16.msra.mxu0 %v6431_v41  ;;  %3802 = vmatpush1.bf16.msra.mxu1 %v6507_v43  ;;  %v2746_v43 = vld [vmem:[%s10713_s1 + $0x2a0] sm:$0xff]  ;;  %v6513_v41 = vcombine.low %v8233_v28, %v3648_v15  ;;  %v2436_v26 = vsel %vm7386_vm2, %v2431_v61, %v2435_v38  ;;  %v2467_v28 = vrot.slane %v2465_v11, 5  ;;  %v8305_v15 = vld [vmem:[%s7309_s28 + $0x58] sm:$0xf]  ;;  %v2460_v37 = vsel %vm7386_vm2, %v2455_v21, %v2459_v59 }
  0xb8   : > { %3178 = vmatprep.subr.bf16.mxu0 %v6436_v48  ;;  %3803 = vmatprep.subr.bf16.mxu1 %v6510_v42  ;;  %v6448_v48 = vcombine.high %v2746_v43, %v2748_v52  ;;  %v3652_v42 = vld [vmem:[%s10713_s1 + $0x368] sm:$0xff]  ;;  %v6447_v23 = vcombine.low %v2746_v43, %v2748_v52  ;;  %v8302_v30 = vcombine.low %v2426_v2, %v2436_v26  ;;  %v6382_v43 = vld [vmem:[%s7309_s28 + $0x60] sm:$0xf]  ;;  %v2519_v26 = vshll.u32 %v8346_v33, 16 }
  0xb9   : > { %v6519_v45 = vcombine.low %v3653_v20, %v3654_v27  ;;  %v6520_v35 = vcombine.high %v3653_v20, %v3654_v27  ;;  %v7147_v61 = vld [vmem:[%s7309_s28 + $0x3c] sm:$0xff]   ;;  %v2513_v2 = vshll.u32 %v6382_v43, 16  ;;  %v2523_v5 = vshrl.u32 %v8346_v33, 16  ;;  %v8390_v20 = vld [vmem:[%s7309_s28 + $0x70] sm:$0xf] }
  0xba   : > { %2111 = vmatmul.mubr.bf16.gmra.mrb[68].mxu0 %v7144_v10  ;;  %3024 = vmatmul.mubr.bf16.gmra.mrb[68].mxu1 %v8216_v19  ;;  %v3651_v10 = vld [vmem:[%s10713_s1 + $0x328] sm:$0xff] }
  0xbb   : > { %2120 = vmatprep.mubr.bf16.mxu0 %v10760_v14  ;;  %3033 = vmatprep.mubr.bf16.mxu1 %v10760_v14  ;;  %v6518_v60 = vcombine.high %v3651_v10, %v3652_v42  ;;  %v6517_v55 = vcombine.low %v3651_v10, %v3652_v42  ;;  %v2483_v10 = vrot.slane %v2481_v31, 5  ;;  %v2510_v42 = vshrl.u32 %v6382_v43, 16  ;;  %v6462_v31 = vld [vmem:[%s7309_s28 + $0x48] sm:$0xe] }
  0xbc   : > { %3804 = vmatpush1.bf16.msra.mxu1 %v6509_v8  ;;  %3179 = vmatpush1.bf16.msra.mxu0 %v6435_v44  ;;  %v2445_v8 = vrot.slane %v2444_v22, 4  ;;  %v6379_v44 = vld [vmem:[%s7309_s28 + $0x54] sm:$0xf]  ;;  %v2515_v59 = vrot.slane %v2513_v2, 5 }
  0xbd   : > { %3805 = vmatprep.subr.bf16.mxu1 %v6512_v40  ;;  %3180 = vmatprep.subr.bf16.mxu0 %v6440_v3  ;;  %v6452_v40 = vcombine.high %v2750_v63, %v2752_v12  ;;  %v2464_v3 = vrot.slane %v2462_v58, 4  ;;  %v2486_v39 = vshrl.u32 %v6379_v44, 16  ;;  %v2489_v32 = vshll.u32 %v6379_v44, 16  ;;  %v8356_v58 = vld [vmem:[%s10713_s1 + $0x74] sm:$0xff] }
  0xbe   : > { %v2450_v57 = vsel %vm7386_vm2, %v2445_v8, %v8264_v29  ;;  %v8339_v29 = vld [vmem:[%s7309_s28 + $0x5c] sm:$0x1]  ;;  %v2512_v8 = vrot.slane %v2510_v42, 4  ;;  %v6642_v44 = vcombine.high %v8351_v17, %v8356_v58  ;;  %v3564_v42 = vrot.slane %v8275_v9, 5 }
  0xbf   : > { %v2468_v34 = vor.u32 %v2467_v28, %v2464_v3  ;;  %v2488_v24 = vrot.slane %v2486_v39, 4  ;;  %v2491_v38 = vrot.slane %v2489_v32, 5  ;;  %v2505_v11 = vshll.u32 %v8339_v29, 16  ;;  %v8382_v3 = vld [vmem:[%s7309_s28 + $0x68] sm:$0x1] }
  0xc0   : > { %3806 = vmatpush1.bf16.msra.mxu1 %v6511_v53  ;;  %3181 = vmatpush1.bf16.msra.mxu0 %v6439_v1  ;;  %v2495_v53 = vshll.u32 %v8305_v15, 16  ;;  %v2754_v1 = vld [vmem:[%s10713_s1 + $0x3a0] sm:$0xff]  ;;  %v6385_v28 = vld [vmem:[%s7309_s28 + $0x6c] sm:$0xf]  ;;  %v8387_v39 = vrot.slane %v2519_v26, 5  ;;  %v2516_v32 = vor.u32 %v2515_v59, %v2512_v8 }
  0xc1   : > { %3807 = vmatprep.subr.bf16.mxu1 %v6514_v47  ;;  %3182 = vmatprep.subr.bf16.mxu0 %v6444_v56  ;;  %v2756_v47 = vld [vmem:[%s10713_s1 + $0x3e0] sm:$0xff]  ;;  %v2478_v56 = vor.u32 %v2477_v25, %v8307_v36  ;;  %v2469_v22 = vrot.slane %v2468_v34, 4  ;;  %v2492_v63 = vor.u32 %v2491_v38, %v2488_v24  ;;  %v2507_v21 = vrot.slane %v2505_v11, 5 }
  0xc2   : > { %2121 = vmatmul.mubr.bf16.gmra.mrb[72].mxu0 %v7145_v7  ;;  %3034 = vmatmul.mubr.bf16.gmra.mrb[72].mxu1 %v8262_v51  ;;  %v2499_v7 = vshrl.u32 %v8305_v15, 16  ;;  %v6455_v52 = vcombine.low %v2754_v1, %v2756_v47  ;;  %v8341_v62 = vrot.slane %v2495_v53, 5  ;;  %v2534_v53 = vshrl.u32 %v6385_v28, 16 }
  0xc3   : > { %2130 = vmatprep.mubr.bf16.mxu0 %v10760_v14  ;;  %3043 = vmatprep.mubr.bf16.mxu1 %v10760_v14  ;;  %v2493_v25 = vrot.slane %v2492_v63, 4  ;;  %v3567_v11 = vrot.slane %v8310_v50, 5 }
  0xc4   : > { %3808 = vmatpush1.bf16.msra.mxu1 %v6513_v41  ;;  %3183 = vmatpush1.bf16.msra.mxu0 %v6443_v18  ;;  %v2501_v41 = vrot.slane %v2499_v7, 4  ;;  %v6456_v18 = vcombine.high %v2754_v1, %v2756_v47  ;;  %v2537_v7 = vshll.u32 %v6385_v28, 16  ;;  %v2529_v1 = vshll.u32 %v8382_v3, 16 }
  0xc5   : > { %3809 = vmatprep.subr.bf16.mxu1 %v6516_v6  ;;  %3184 = vmatprep.subr.bf16.mxu0 %v6448_v48  ;;  %v8343_v6 = vcombine.low %v2450_v57, %v2460_v37  ;;  %v2479_v48 = vrot.slane %v2478_v56, 4  ;;  %v2543_v47 = vshll.u32 %v8390_v20, 16  ;;  %v2498_v57 = vsel %vm7386_vm2, %v2493_v25, %v8341_v62 }
  0xc6   : > { %v2502_v12 = vor.u32 %v2501_v41, %v8341_v62  ;;  %v2547_v56 = vshrl.u32 %v8390_v20, 16  ;;  %v2536_v24 = vrot.slane %v2534_v53, 4  ;;  %v2539_v43 = vrot.slane %v2537_v7, 5  ;;  %v6463_v41 = vld [vmem:[%s7309_s28 + $0x54] sm:$0xe] }
  0xc7   : > { %v2531_v38 = vrot.slane %v2529_v1, 5  ;;  %v8414_v62 = vrot.slane %v2543_v47, 5  ;;  %v6479_v63 = vrot.slane %v6463_v41, 9  ;;  %v6464_v1 = vld [vmem:[%s7309_s28 + $0x60] sm:$0xe] }
  0xc8   : > { %3810 = vmatpush1.bf16.msra.mxu1 %v6515_v49  ;;  %3185 = vmatpush1.bf16.msra.mxu0 %v6447_v23  ;;  %v4093_v49 = vld [vmem:[%s10713_s1 + $0x70] sm:$0xf]  ;;  %v2474_v23 = vsel %vm7386_vm2, %v2469_v22, %v8307_v36  ;;  %v2549_v22 = vrot.slane %v2547_v56, 4  ;;  %v6390_v47 = vld [vmem:[%s7309_s28 + $0x80] sm:$0x1]  ;;  %v3581_v56 = vrot.slane %v8382_v3, 5 }
  0xc9   : > { %3811 = vmatprep.subr.bf16.mxu1 %v6518_v60  ;;  %3186 = vmatprep.subr.bf16.mxu0 %v6452_v40  ;;  %v7148_v40 = vld [vmem:[%s7309_s28 + $0x48] sm:$0xff]   ;;  %v8385_v36 = vcombine.low %v4092_v54, %v4093_v49  ;;  %v6389_v54 = vld [vmem:[%s7309_s28 + $0x7c] sm:$0xf]  ;;  %v2577_v41 = vshll.u32 %v6390_v47, 16 }
  0xca   : > { %2131 = vmatmul.mubr.bf16.gmra.mrb[76].mxu0 %v7146_v13  ;;  %3044 = vmatmul.mubr.bf16.gmra.mrb[76].mxu1 %v8302_v30  ;;  %v2484_v13 = vsel %vm7386_vm2, %v2479_v48, %v2483_v10  ;;  %v6388_v48 = vld [vmem:[%s7309_s28 + $0x78] sm:$0xf]  ;;  %v6478_v10 = vrot.slane %v6462_v31, 9  ;;  %v2550_v59 = vor.u32 %v2549_v22, %v8414_v62  ;;  %v2571_v28 = vshrl.u32 %v6389_v54, 16 }
  0xcb   : > { %2140 = vmatprep.mubr.bf16.mxu0 %v10760_v14  ;;  %3053 = vmatprep.mubr.bf16.mxu1 %v10760_v14  ;;  %v8392_v27 = vcombine.low %v2474_v23, %v2484_v13  ;;  %v3566_v23 = vrot.slane %v3564_v42, 4  ;;  %v2558_v13 = vshrl.u32 %v6388_v48, 16 }
  0xcc   : > { %3812 = vmatpush1.bf16.msra.mxu1 %v6517_v55  ;;  %3187 = vmatpush1.bf16.msra.mxu0 %v6451_v4  ;;  %v2503_v55 = vrot.slane %v2502_v12, 4  ;;  %v2525_v4 = vrot.slane %v2523_v5, 4  ;;  %v3571_v12 = vrot.slane %v8305_v15, 5  ;;  %v2540_v5 = vor.u32 %v2539_v43, %v2536_v24 }
  0xcd   : > { %3813 = vmatprep.subr.bf16.mxu1 %v6520_v35  ;;  %3188 = vmatprep.subr.bf16.mxu0 %v6456_v18  ;;  %v8409_v35 = vld [vmem:[%s7309_s28 + $0x74] sm:$0x1]  ;;  %v8428_v49 = vsel %vm7746_vm5, %v6478_v10, %v3564_v42  ;;  %v3574_v15 = vrot.slane %v8339_v29, 5  ;;  %v2551_v31 = vrot.slane %v2550_v59, 4  ;;  %v2573_v43 = vrot.slane %v2571_v28, 4 }
  0xce   : > { %v2508_v37 = vsel %vm7386_vm2, %v2503_v55, %v2507_v21  ;;  %v2526_v34 = vor.u32 %v2525_v4, %v8387_v39  ;;  %v2553_v2 = vshll.u32 %v8409_v35, 16  ;;  %v8432_v9 = vsel %vm7746_vm5, %v6479_v63, %v3571_v12  ;;  %v7150_v4 = vld [vmem:[%s7309_s28 + $0x60] sm:$0xff]  }
  0xcf   : > { %v3573_v50 = vrot.slane %v3571_v12, 4  ;;  %v2567_v21 = vshll.u32 %v6389_v54, 16  ;;  %v2541_v53 = vrot.slane %v2540_v5, 4  ;;  %v6465_v5 = vld [vmem:[%s7309_s28 + $0x6c] sm:$0xe] }
  0xd0   : > { %3814 = vmatpush1.bf16.msra.mxu1 %v6519_v45  ;;  %3189 = vmatpush1.bf16.msra.mxu0 %v6455_v52  ;;  %v2517_v45 = vrot.slane %v2516_v32, 4  ;;  %v7149_v52 = vld [vmem:[%s7309_s28 + $0x54] sm:$0xff]   ;;  %v2527_v18 = vrot.slane %v2526_v34, 4  ;;  %v2555_v7 = vrot.slane %v2553_v2, 5  ;;  %v7151_v54 = vld [vmem:[%s7309_s28 + $0x6c] sm:$0xff]  }
  0xd1   : > { %5037 = vmatprep.subr.bf16.mxu1 %v6642_v44  ;;  %7005 = vmatprep.subr.bf16.mxu0 %v8385_v36  ;;  %v2561_v44 = vshll.u32 %v6388_v48, 16  ;;  %v8448_v25 = vsel %vm7746_vm5, %v3573_v50, %v3574_v15  ;;  %v2569_v24 = vrot.slane %v2567_v21, 5  ;;  %v2546_v3 = vsel %vm7386_vm2, %v2541_v53, %v8414_v62  ;;  %v6394_v53 = vld [vmem:[%s7309_s28 + $0x90] sm:$0xf] }
  0xd2   : > { %2141 = vmatmul.mubr.bf16.gmra.mrb[80].mxu0 %v7147_v61  ;;  %3054 = vmatmul.mubr.bf16.gmra.mrb[80].mxu1 %v8343_v6  ;;  %v8412_v61 = vcombine.low %v2498_v57, %v2508_v37  ;;  %v2522_v26 = vsel %vm7386_vm2, %v2517_v45, %v8387_v39  ;;  %v2532_v8 = vsel %vm7386_vm2, %v2527_v18, %v2531_v38  ;;  %v3578_v39 = vrot.slane %v8346_v33, 5  ;;  %v6392_v18 = vld [vmem:[%s7309_s28 + $0x88] sm:$0xf] }
  0xd3   : > { %2150 = vmatprep.mubr.bf16.mxu0 %v10760_v14  ;;  %3063 = vmatprep.mubr.bf16.mxu1 %v10760_v14  ;;  %v8455_v32 = vcombine.low %v2522_v26, %v2532_v8  ;;  %v2560_v57 = vrot.slane %v2558_v13, 4  ;;  %v6480_v37 = vrot.slane %v6464_v1, 9  ;;  %v2563_v45 = vrot.slane %v2561_v44, 5  ;;  %v8487_v44 = vld [vmem:[%s7309_s28 + $0x8c] sm:$0x1] }
  0xd4   : > { %v3580_v34 = vrot.slane %v3578_v39, 4  ;;  %v2556_v10 = vsel %vm7386_vm2, %v2551_v31, %v2555_v7  ;;  %v2574_v2 = vor.u32 %v2573_v43, %v2569_v24  ;;  %v2591_v63 = vshll.u32 %v6392_v18, 16  ;;  %10776 = vst [vmem:[#allocation6_spill] sm:$0xff] %v8487_v44  ;;  %v8499_v1 = vld [vmem:[%s7309_s28 + $0x94] sm:$0xf] }
  0xd5   : > { %v8463_v33 = vsel %vm7746_vm5, %v6480_v37, %v3578_v39  ;;  %v2564_v42 = vor.u32 %v2563_v45, %v2560_v57  ;;  %v2595_v12 = vshrl.u32 %v6392_v18, 16  ;;  %v3585_v26 = vrot.slane %v8390_v20, 5  ;;  %10779 = vst [vmem:[#allocation9_spill] sm:$0xff] %v8499_v1  ;;  %v6397_v18 = vld [vmem:[%s7309_s28 + $0x9c] sm:$0xf] }
  0xd6   : > { %10773 = vst [vmem:[#allocation3_spill] sm:$0xff] %v8463_v33  ;;  %v8467_v38 = vsel %vm7746_vm5, %v3580_v34, %v3581_v56  ;;  %v2579_v62 = vrot.slane %v2577_v41, 5  ;;  %v6481_v13 = vrot.slane %v6465_v5, 9  ;;  %v3588_v15 = vrot.slane %v8409_v35, 5  ;;  %v7152_v41 = vld [vmem:[%s7309_s28 + $0x78] sm:$0xff]  }
  0xd7   : > { %10774 = vst [vmem:[#allocation4_spill] sm:$0xff] %v8467_v38  ;;  %v3587_v50 = vrot.slane %v3585_v26, 4  ;;  %v2565_v8 = vrot.slane %v2564_v42, 4  ;;  %v2575_v59 = vrot.slane %v2574_v2, 4  ;;  %v2593_v39 = vrot.slane %v2591_v63, 5 }
  0xd8   : > { %v8492_v20 = vsel %vm7746_vm5, %v6481_v13, %v3585_v26  ;;  %v2601_v47 = vshll.u32 %v8487_v44, 16  ;;  %v2606_v56 = vshrl.u32 %v6394_v53, 16  ;;  %v2609_v45 = vshll.u32 %v6394_v53, 16  ;;  %v8518_v42 = vld [vmem:[%s7309_s28 + $0xa0] sm:$0xf] }
  0xd9   : > { %10777 = vst [vmem:[#allocation7_spill] sm:$0xff] %v8492_v20  ;;  %v8496_v7 = vsel %vm7746_vm5, %v3587_v50, %v3588_v15  ;;  %v2570_v57 = vsel %vm7386_vm2, %v2565_v8, %v2569_v24  ;;  %v2580_v37 = vsel %vm7386_vm2, %v2575_v59, %v2579_v62  ;;  %v2615_v43 = vshll.u32 %v8499_v1, 16  ;;  %10781 = vst [vmem:[#allocation11_spill] sm:$0xff] %v8518_v42  ;;  %v8521_v26 = vld [vmem:[%s7309_s28 + $0x98] sm:$0x1] }
  0xda   : > { %2151 = vmatmul.mubr.bf16.gmra.mrb[84].mxu0 %v7148_v40  ;;  %3064 = vmatmul.mubr.bf16.gmra.mrb[84].mxu1 %v8392_v27  ;;  %v8440_v40 = vsel %vm7746_vm5, %v3566_v23, %v3567_v11  ;;  %v8483_v23 = vcombine.low %v2546_v3, %v2556_v10  ;;  %10778 = vst [vmem:[#allocation8_spill] sm:$0xff] %v8496_v7  ;;  %v2603_v24 = vrot.slane %v2601_v47, 5  ;;  %v2608_v10 = vrot.slane %v2606_v56, 4  ;;  %v8569_v35 = vld [vmem:[%s7309_s28 + $0xb8] sm:$0xf] }
  0xdb   : > { %2160 = vmatprep.mubr.bf16.mxu0 %v10760_v14  ;;  %3073 = vmatprep.mubr.bf16.mxu1 %v10760_v14  ;;  %v8515_v3 = vcombine.low %v2570_v57, %v2580_v37  ;;  %v2617_v63 = vrot.slane %v2615_v43, 5  ;;  %10782 = vst [vmem:[#allocation12_spill] sm:$0xff] %v8521_v26  ;;  %v2630_v62 = vshrl.u32 %v6397_v18, 16  ;;  %v2633_v5 = vshll.u32 %v6397_v18, 16  ;;  %v8543_v43 = vld [vmem:[%s7309_s28 + $0xac] sm:$0xf] }
  0xdc   : > { %10775 = vst [vmem:[#allocation5_spill] sm:$0xff] %v8483_v23  ;;  %v2643_v13 = vshrl.u32 %v8518_v42, 16  ;;  %10785 = vst [vmem:[#allocation15_spill] sm:$0xff] %v8543_v43  ;;  %v10808_v44 = vcombine.low %v8351_v17, %v8356_v58  ;;  %v7184_v33 = vld [vmem:[%s7309_s28 + $0x44] sm:$0x1] }
  0xdd   : > { %10780 = vst [vmem:[#allocation10_spill] sm:$0xff] %v8515_v3  ;;  %v2635_v53 = vrot.slane %v2633_v5, 5  ;;  %10788 = vst [vmem:[#allocation18_spill] sm:$0xff] %v8569_v35 }
  0xde   : > { %v2645_v57 = vrot.slane %v2643_v13, 4  ;;  %v7154_v13 = vld [vmem:[%s7309_s28 + $0x90] sm:$0xff]  }
  0xe2   : > { %2161 = vmatmul.mubr.bf16.gmra.mrb[88].mxu0 %v7149_v52  ;;  %3074 = vmatmul.mubr.bf16.gmra.mrb[88].mxu1 %v8412_v61  ;;  %v6391_v52 = vld [vmem:[%s7309_s28 + $0x84] sm:$0xf] }
  0xe3   : > { %2170 = vmatprep.mubr.bf16.mxu0 %v10760_v14  ;;  %3083 = vmatprep.mubr.bf16.mxu1 %v10760_v14  ;;  %v2582_v48 = vshrl.u32 %v6391_v52, 16  ;;  %v2585_v11 = vshll.u32 %v6391_v52, 16  ;;  %v2619_v52 = vshrl.u32 %v8499_v1, 16 }
  0xe5   : > { %v2584_v21 = vrot.slane %v2582_v48, 4  ;;  %v2587_v28 = vrot.slane %v2585_v11, 5  ;;  %v2611_v11 = vrot.slane %v2609_v45, 5  ;;  %v6400_v45 = vld [vmem:[%s7309_s28 + $0xa8] sm:$0xf] }
  0xe7   : > { %v2588_v34 = vor.u32 %v2587_v28, %v2584_v21  ;;  %v2612_v8 = vor.u32 %v2611_v11, %v2608_v10  ;;  %v2625_v21 = vshll.u32 %v8521_v26, 16  ;;  %v7153_v28 = vld [vmem:[%s7309_s28 + $0x84] sm:$0xff]   ;;  %v2663_v11 = vshll.u32 %v8543_v43, 16 }
  0xe9   : > { %v2589_v48 = vrot.slane %v2588_v34, 4  ;;  %v2613_v34 = vrot.slane %v2612_v8, 4 }
  0xea   : > { %2171 = vmatmul.mubr.bf16.gmra.mrb[92].mxu0 %v7150_v4  ;;  %3084 = vmatmul.mubr.bf16.gmra.mrb[92].mxu1 %v8455_v32  ;;  %v2597_v4 = vrot.slane %v2595_v12, 4  ;;  %v2621_v12 = vrot.slane %v2619_v52, 4 }
  0xeb   : > { %2180 = vmatprep.mubr.bf16.mxu0 %v10760_v14  ;;  %3093 = vmatprep.mubr.bf16.mxu1 %v10760_v14  ;;  %v2594_v50 = vsel %vm7386_vm2, %v2589_v48, %v2593_v39  ;;  %v2654_v48 = vshrl.u32 %v6400_v45, 16  ;;  %v2618_v10 = vsel %vm7386_vm2, %v2613_v34, %v2617_v63 }
  0xec   : > { %v2598_v31 = vor.u32 %v2597_v4, %v2593_v39  ;;  %v2622_v59 = vor.u32 %v2621_v12, %v2617_v63  ;;  %v2632_v4 = vrot.slane %v2630_v62, 4  ;;  %v8539_v39 = vld [vmem:[%s7309_s28 + $0xa4] sm:$0x1]  ;;  %v2667_v12 = vshrl.u32 %v8543_v43, 16  ;;  %v6406_v43 = vld [vmem:[%s7309_s28 + $0xc0] sm:$0xf] }
  0xed   : > { %10784 = vst [vmem:[#allocation14_spill] sm:$0xff] %v8539_v39  ;;  %v2649_v18 = vshll.u32 %v8539_v39, 16 }
  0xee   : > { %v2599_v2 = vrot.slane %v2598_v31, 4  ;;  %v2623_v56 = vrot.slane %v2622_v59, 4  ;;  %v2627_v31 = vrot.slane %v2625_v21, 5  ;;  %v2636_v52 = vor.u32 %v2635_v53, %v2632_v4  ;;  %v6403_v53 = vld [vmem:[%s7309_s28 + $0xb4] sm:$0xf] }
  0xef   : > { %v2651_v8 = vrot.slane %v2649_v18, 5 }
  0xf0   : > { %v2604_v15 = vsel %vm7386_vm2, %v2599_v2, %v2603_v24  ;;  %v2657_v24 = vshll.u32 %v6400_v45, 16  ;;  %v2628_v2 = vsel %vm7386_vm2, %v2623_v56, %v2627_v31  ;;  %v8566_v31 = vrot.slane %v2663_v11, 5 }
  0xf1   : > { %v8536_v37 = vcombine.low %v2594_v50, %v2604_v15  ;;  %v2637_v50 = vrot.slane %v2636_v52, 4  ;;  %v8559_v21 = vcombine.low %v2618_v10, %v2628_v2  ;;  %v2669_v45 = vrot.slane %v2667_v12, 4 }
  0xf2   : > { %2181 = vmatmul.mubr.bf16.gmra.mrb[96].mxu0 %v7151_v54  ;;  %3094 = vmatmul.mubr.bf16.gmra.mrb[96].mxu1 %v8483_v23  ;;  %v2639_v54 = vshll.u32 %v8518_v42, 16  ;;  %v2659_v4 = vrot.slane %v2657_v24, 5  ;;  %v2678_v10 = vshrl.u32 %v6403_v53, 16  ;;  %v2681_v11 = vshll.u32 %v6403_v53, 16 }
  0xf3   : > { %2190 = vmatprep.mubr.bf16.mxu0 %v10760_v14  ;;  %3103 = vmatprep.mubr.bf16.mxu1 %v10760_v14  ;;  %10783 = vst [vmem:[#allocation13_spill] sm:$0xff] %v8536_v37  ;;  %10786 = vst [vmem:[#allocation16_spill] sm:$0xff] %v8559_v21  ;;  %v2687_v12 = vshll.u32 %v8569_v35, 16 }
  0xf4   : > { %v8534_v47 = vrot.slane %v2639_v54, 5  ;;  %v2680_v53 = vrot.slane %v2678_v10, 4  ;;  %v2683_v55 = vrot.slane %v2681_v11, 5  ;;  %v2702_v11 = vshrl.u32 %v6406_v43, 16 }
  0xf5   : > { %v2689_v29 = vrot.slane %v2687_v12, 5 }
  0xfa   : > { %2191 = vmatmul.mubr.bf16.gmra.mrb[100].mxu0 %v7152_v41  ;;  %3104 = vmatmul.mubr.bf16.gmra.mrb[100].mxu1 %v8515_v3  ;;  %v2646_v41 = vor.u32 %v2645_v57, %v8534_v47  ;;  %v6459_v3 = vld [vmem:[%s7309_s28 + $0x24] sm:$0xe] }
  0xfb   : > { %2200 = vmatprep.mubr.bf16.mxu0 %v10760_v14  ;;  %3113 = vmatprep.mubr.bf16.mxu1 %v10760_v14  ;;  %v6475_v58 = vrot.slane %v6459_v3, 9  ;;  %v4099_v3 = vld [vmem:[%s10713_s1 + $0x1f0] sm:$0xf] }
  0xfc   : > { %v2647_v15 = vrot.slane %v2646_v41, 4  ;;  %v8572_v41 = vld [vmem:[%s7309_s28 + $0xb0] sm:$0x1] }
  0xfd   : > { %10789 = vst [vmem:[#allocation19_spill] sm:$0xff] %v8572_v41 }
  0xfe   : > { %v2652_v24 = vsel %vm7386_vm2, %v2647_v15, %v2651_v8 }
 0x102   : > { %2201 = vmatmul.mubr.bf16.gmra.mrb[104].mxu0 %v7153_v28  ;;  %3114 = vmatmul.mubr.bf16.gmra.mrb[104].mxu1 %v8536_v37  ;;  %v2656_v28 = vrot.slane %v2654_v48, 4  ;;  %v2642_v48 = vsel %vm7386_vm2, %v2637_v50, %v8534_v47  ;;  %v2670_v47 = vor.u32 %v2669_v45, %v8566_v31  ;;  %v7178_v37 = vld [vmem:[%s7309_s28 + $0x20] sm:$0x1] }
 0x103   : > { %2210 = vmatprep.mubr.bf16.mxu0 %v10760_v14  ;;  %3123 = vmatprep.mubr.bf16.mxu1 %v10760_v14  ;;  %v3539_v26 = vrot.slane %v7178_v37, 5  ;;  %v4882_v37 = vld [vmem:[%s10713_s1 + $0x174] sm:$0xff] }
 0x104   : > { %v2660_v2 = vor.u32 %v2659_v4, %v2656_v28  ;;  %v8595_v28 = vcombine.low %v2642_v48, %v2652_v24  ;;  %v8598_v4 = vld [vmem:[%s7309_s28 + $0xbc] sm:$0x1]  ;;  %v8606_v24 = vld [vmem:[%s7309_s28 + $0xc4] sm:$0xf] }
 0x105   : > { %v892_v62 = vpop.f32.mrb[0].mxu0  ;;  %v6927_v5 = vpop.f32.mrb[0].mxu1  ;;  %10793 = vst [vmem:[#allocation23_spill] sm:$0xff] %v8598_v4  ;;  %10795 = vst [vmem:[#allocation25_spill] sm:$0xff] %v8606_v24  ;;  %v2697_v10 = vshll.u32 %v8598_v4, 16 }
 0x106   : > { %v8556_v54 = vpop.f32.mrb[1].mxu0  ;;  %v1229_v59 = vpop.f32.mrb[1].mxu1  ;;  %10792 = vst [vmem:[#allocation22_spill] sm:$0xff] %v8595_v28  ;;  %v2661_v45 = vrot.slane %v2660_v2, 4 }
 0x107   : > { %v896_v63 = vpop.f32.mrb[2].mxu0  ;;  %v8562_v57 = vadd.f32 %v1229_v59, %v892_v62  ;;  %v6928_v34 = vpop.f32.mrb[2].mxu1  ;;  %v2691_v62 = vshrl.u32 %v8569_v35, 16 }
 0x108   : > { %v8564_v56 = vpop.f32.mrb[3].mxu0  ;;  %v1232_v52 = vpop.f32.mrb[3].mxu1 }
 0x109   : > { %10787 = vst [vmem:[#allocation17_spill] sm:$0xff] %v8562_v57  ;;  %v8574_v18 = vadd.f32 %v1232_v52, %v896_v63  ;;  %v7155_v63 = vld [vmem:[%s7309_s28 + $0x9c] sm:$0xff]   ;;  %v2693_v60 = vrot.slane %v2691_v62, 4  ;;  %v2705_v62 = vshll.u32 %v6406_v43, 16 }
 0x10a   : > { %2211 = vmatmul.mubr.bf16.gmra.mrb[108].mxu0 %v7154_v13  ;;  %3124 = vmatmul.mubr.bf16.gmra.mrb[108].mxu1 %v8559_v21  ;;  %v2673_v13 = vshll.u32 %v8572_v41, 16  ;;  %v2671_v41 = vrot.slane %v2670_v47, 4  ;;  %v2711_v47 = vshll.u32 %v8606_v24, 16 }
 0x10b   : > { %10790 = vst [vmem:[#allocation20_spill] sm:$0xff] %v8574_v18  ;;  %2220 = vmatprep.mubr.bf16.mxu0 %v10760_v14  ;;  %3133 = vmatprep.mubr.bf16.mxu1 %v10760_v14  ;;  %v2694_v2 = vor.u32 %v2693_v60, %v2689_v29  ;;  %v2699_v60 = vrot.slane %v2697_v10, 5 }
 0x10d   : > { %v902_v50 = vpop.f32.mrb[4].mxu0  ;;  %v8590_v8 = vpop.f32.mrb[4].mxu1 }
 0x10e   : > { %v8588_v15 = vadd.f32 %v6927_v5, %v902_v50  ;;  %v8592_v59 = vpop.f32.mrb[5].mxu0  ;;  %v1245_v52 = vpop.f32.mrb[5].mxu1 }
 0x10f   : > { %v906_v22 = vpop.f32.mrb[6].mxu0  ;;  %v6932_v50 = vpop.f32.mrb[6].mxu1 }
 0x110   : > { %10791 = vst [vmem:[#allocation21_spill] sm:$0xff] %v8588_v15  ;;  %v8600_v5 = vadd.f32 %v6928_v34, %v906_v22  ;;  %v8602_v35 = vpop.f32.mrb[7].mxu0  ;;  %v2675_v15 = vrot.slane %v2673_v13, 5  ;;  %v1248_v48 = vpop.f32.mrb[7].mxu1  ;;  %v2666_v22 = vsel %vm7386_vm2, %v2661_v45, %v8566_v31  ;;  %v2684_v34 = vor.u32 %v2683_v55, %v2680_v53  ;;  %v7156_v55 = vld [vmem:[%s7309_s28 + $0xa8] sm:$0xff]  }
 0x111   : > { %v2715_v13 = vshrl.u32 %v8606_v24, 16  ;;  %v8627_v31 = vld [vmem:[%s7309_s28 + $0xc8] sm:$0x1] }
 0x112   : > { %10794 = vst [vmem:[#allocation24_spill] sm:$0xff] %v8600_v5  ;;  %2221 = vmatmul.mubr.bf16.gmra.mrb[112].mxu0 %v7155_v63  ;;  %3134 = vmatmul.mubr.bf16.gmra.mrb[112].mxu1 %v8595_v28  ;;  %v2676_v12 = vsel %vm7386_vm2, %v2671_v41, %v2675_v15  ;;  %10797 = vst [vmem:[#allocation27_spill] sm:$0xff] %v8627_v31  ;;  %v2685_v43 = vrot.slane %v2684_v34, 4  ;;  %v2695_v41 = vrot.slane %v2694_v2, 4  ;;  %v2704_v15 = vrot.slane %v2702_v11, 4 }
 0x113   : > { %2230 = vmatprep.mubr.bf16.mxu0 %v10760_v14  ;;  %3143 = vmatprep.mubr.bf16.mxu1 %v10760_v14  ;;  %v8629_v21 = vcombine.low %v2666_v22, %v2676_v12  ;;  %v2717_v18 = vrot.slane %v2715_v13, 4  ;;  %v2721_v22 = vshll.u32 %v8627_v31, 16 }
 0x114   : > { %v2700_v34 = vsel %vm7386_vm2, %v2695_v41, %v2699_v60 }
 0x115   : > { %v912_v63 = vpop.f32.mrb[8].mxu0  ;;  %v8621_v28 = vpop.f32.mrb[8].mxu1  ;;  %10798 = vst [vmem:[#allocation28_spill] sm:$0xff] %v8629_v21  ;;  %v2723_v41 = vrot.slane %v2721_v22, 5  ;;  %v6457_v22 = vld [vmem:[%s7309_s28 + $0xc] sm:$0xe] }
 0x116   : > { %v8619_v4 = vadd.f32 %v1245_v52, %v912_v63  ;;  %v8623_v5 = vpop.f32.mrb[9].mxu0  ;;  %v1261_v53 = vpop.f32.mrb[9].mxu1  ;;  %v2707_v63 = vrot.slane %v2705_v62, 5 }
 0x117   : > { %v916_v45 = vpop.f32.mrb[10].mxu0  ;;  %v8633_v24 = vpop.f32.mrb[10].mxu1 }
 0x118   : > { %10796 = vst [vmem:[#allocation26_spill] sm:$0xff] %v8619_v4  ;;  %v8631_v39 = vadd.f32 %v1248_v48, %v916_v45  ;;  %v8635_v52 = vpop.f32.mrb[11].mxu0  ;;  %v2713_v4 = vrot.slane %v2711_v47, 5  ;;  %v1264_v10 = vpop.f32.mrb[11].mxu1  ;;  %v2690_v48 = vsel %vm7386_vm2, %v2685_v43, %v2689_v29  ;;  %v2708_v2 = vor.u32 %v2707_v63, %v2704_v15  ;;  %v7175_v63 = vld [vmem:[%s7309_s28 + $0x10] sm:$0xf] }
 0x11a   : > { %10799 = vst [vmem:[#allocation29_spill] sm:$0xff] %v8631_v39  ;;  %2231 = vmatmul.mubr.bf16.gmra.mrb[116].mxu0 %v7156_v55  ;;  %3144 = vmatmul.mubr.bf16.gmra.mrb[116].mxu1 %v8629_v21  ;;  %v2718_v11 = vor.u32 %v2717_v18, %v2713_v4  ;;  %v7157_v55 = vld [vmem:[%s7309_s28 + $0xb4] sm:$0xff]   ;;  %v8655_v21 = vcombine.low %v2690_v48, %v2700_v34  ;;  %v3529_v48 = vrot.slane %v7175_v63, 5 }
 0x11b   : > { %2240 = vmatprep.mubr.bf16.mxu0 %v10760_v14  ;;  %3153 = vmatprep.mubr.bf16.mxu1 %v10760_v14 }
 0x11c   : > { %10801 = vst [vmem:[#allocation31_spill] sm:$0xff] %v8655_v21  ;;  %v2719_v43 = vrot.slane %v2718_v11, 4  ;;  %v3531_v63 = vrot.slane %v3529_v48, 4 }
 0x11d   : > { %v922_v12 = vpop.f32.mrb[12].mxu0  ;;  %v8648_v47 = vpop.f32.mrb[12].mxu1 }
 0x11e   : > { %v8646_v62 = vadd.f32 %v8590_v8, %v922_v12  ;;  %v8650_v13 = vpop.f32.mrb[13].mxu0  ;;  %v8653_v45 = vpop.f32.mrb[13].mxu1  ;;  %v2709_v8 = vrot.slane %v2708_v2, 4 }
 0x11f   : > { %v926_v31 = vpop.f32.mrb[14].mxu0  ;;  %v8659_v60 = vpop.f32.mrb[14].mxu1 }
 0x120   : > { %10800 = vst [vmem:[#allocation30_spill] sm:$0xff] %v8646_v62  ;;  %v8657_v29 = vadd.f32 %v6932_v50, %v926_v31  ;;  %v8661_v18 = vpop.f32.mrb[15].mxu0  ;;  %v8663_v15 = vpop.f32.mrb[15].mxu1  ;;  %v2714_v50 = vsel %vm7386_vm2, %v2709_v8, %v2713_v4  ;;  %v2724_v31 = vsel %vm7386_vm2, %v2719_v43, %v2723_v41  ;;  %v4879_v62 = vld [vmem:[%s10713_s1 + $0xb4] sm:$0xff] }
 0x121   : > { %v8683_v4 = vcombine.low %v2714_v50, %v2724_v31  ;;  %v6458_v50 = vld [vmem:[%s7309_s28 + $0x18] sm:$0xe]  ;;  %v7177_v31 = vld [vmem:[%s7309_s28 + $0x1c] sm:$0xf] }
 0x122   : > { %10802 = vst [vmem:[#allocation32_spill] sm:$0xff] %v8657_v29  ;;  %2241 = vmatmul.mubr.bf16.gmra.mrb[120].mxu0 %v7157_v55  ;;  %3154 = vmatmul.mubr.bf16.gmra.mrb[120].mxu1 %v8655_v21  ;;  %v7158_v55 = vld [vmem:[%s7309_s28 + $0xc0] sm:$0xff]  }
 0x123   : > { %2250 = vmatprep.mubr.bf16.mxu0 %v10760_v14  ;;  %3163 = vmatprep.mubr.bf16.mxu1 %v10760_v14  ;;  %10804 = vst [vmem:[#allocation34_spill] sm:$0xff] %v8683_v4 }
 0x125   : > { %v932_v34 = vpop.f32.mrb[16].mxu0  ;;  %v8676_v11 = vpop.f32.mrb[16].mxu1 }
 0x126   : > { %v8674_v2 = vadd.f32 %v1261_v53, %v932_v34  ;;  %v8678_v12 = vpop.f32.mrb[17].mxu0  ;;  %v8681_v21 = vpop.f32.mrb[17].mxu1  ;;  %v6473_v53 = vrot.slane %v6457_v22, 9  ;;  %v7176_v34 = vld [vmem:[%s7309_s28 + $0x14] sm:$0x1]  ;;  %v3536_v22 = vrot.slane %v7177_v31, 5 }
 0x127   : > { %v936_v29 = vpop.f32.mrb[18].mxu0  ;;  %v8687_v43 = vpop.f32.mrb[18].mxu1  ;;  %v3532_v16 = vrot.slane %v7176_v34, 5  ;;  %v4095_v31 = vld [vmem:[%s10713_s1 + $0xf0] sm:$0xf] }
 0x128   : > { %10803 = vst [vmem:[#allocation33_spill] sm:$0xff] %v8674_v2  ;;  %v8685_v8 = vadd.f32 %v1264_v10, %v936_v29  ;;  %v8689_v41 = vpop.f32.mrb[19].mxu0  ;;  %v8692_v2 = vpop.f32.mrb[19].mxu1  ;;  %v3530_v10 = vsel %vm7746_vm5, %v6473_v53, %v3529_v48  ;;  %v4094_v48 = vld [vmem:[%s10713_s1 + $0xb0] sm:$0xf]  ;;  %v3538_v42 = vrot.slane %v3536_v22, 4 }
 0x129   : > { %v3533_v29 = vsel %vm7746_vm5, %v3531_v63, %v3532_v16  ;;  %v4880_v16 = vld [vmem:[%s10713_s1 + $0xf4] sm:$0xff]  ;;  %v6474_v63 = vrot.slane %v6458_v50, 9  ;;  %v6570_v50 = vcombine.low %v4094_v48, %v4095_v31  ;;  %v7179_v48 = vld [vmem:[%s7309_s28 + $0x28] sm:$0xf] }
 0x12a   : > { %10805 = vst [vmem:[#allocation35_spill] sm:$0xff] %v8685_v8  ;;  %2251 = vmatmul.mubr.bf16.gmra.mrb[124].mxu0 %v7158_v55  ;;  %3164 = vmatmul.mubr.bf16.gmra.mrb[124].mxu1 %v8683_v4  ;;  %v3543_v31 = vrot.slane %v7179_v48, 5  ;;  %v6643_v7 = vcombine.low %v4879_v62, %v4880_v16 }
 0x12b   : > { %3206 = vmatprep.mubr.bf16.mxu0 %v10760_v14  ;;  %3831 = vmatprep.mubr.bf16.mxu1 %v10760_v14 }
 0x12c   : > { %v3545_v48 = vrot.slane %v3543_v31, 4 }
 0x12d   : > { %v942_v8 = vpop.f32.mrb[20].mxu0  ;;  %v8706_v55 = vpop.f32.mrb[20].mxu1 }
 0x12e   : > { %v8704_v34 = vadd.f32 %v8621_v28, %v942_v8  ;;  %v8708_v4 = vpop.f32.mrb[21].mxu0  ;;  %v8719_v53 = vpop.f32.mrb[21].mxu1  ;;  %v6489_v8 = vcombine.low %v3530_v10, %v3533_v29  ;;  %v6644_v10 = vcombine.high %v4879_v62, %v4880_v16  ;;  %v4096_v29 = vld [vmem:[%s10713_s1 + $0x130] sm:$0xf] }
 0x12f   : > { %v946_v28 = vpop.f32.mrb[22].mxu0  ;;  %v8727_v39 = vpop.f32.mrb[22].mxu1  ;;  %v4098_v16 = vld [vmem:[%s10713_s1 + $0x1b0] sm:$0xf] }
 0x130   : > { %10806 = vst [vmem:[#allocation36_spill] sm:$0xff] %v8704_v34  ;;  %v8725_v34 = vadd.f32 %v8633_v24, %v946_v28  ;;  %v8729_v57 = vpop.f32.mrb[23].mxu0  ;;  %v8732_v1 = vpop.f32.mrb[23].mxu1  ;;  %v4097_v24 = vld [vmem:[%s10713_s1 + $0x170] sm:$0xf]  ;;  %v4881_v28 = vld [vmem:[%s10713_s1 + $0x134] sm:$0xff] }
 0x131   : > { %v6571_v20 = vcombine.low %v4096_v29, %v4097_v24 }
 0x132   : > { %10807 = vst [vmem:[#allocation37_spill] sm:$0xff] %v8725_v34  ;;  %3207 = vmatmul.mubr.bf16.vlgmr.msra.gmra.mrb[128].mxu0 %v8165_v46  ;;  %3832 = vmatmul.mubr.bf16.vlgmr.msra.gmra.mrb[128].mxu1 %v6489_v8  ;;  %v3537_v34 = vsel %vm7746_vm5, %v6474_v63, %v3536_v22  ;;  %v3540_v46 = vsel %vm7746_vm5, %v3538_v42, %v3539_v26  ;;  %v4884_v42 = vld [vmem:[%s10713_s1 + $0x1f4] sm:$0xff] }
 0x133   : > { %7006 = vmatpush3.bf16.msra.mxu0 %v8385_v36  ;;  %5038 = vmatpush1.bf16.msra.mxu1 %v10808_v44  ;;  %v6646_v36 = vcombine.high %v4881_v28, %v4882_v37  ;;  %v4883_v44 = vld [vmem:[%s10713_s1 + $0x1b4] sm:$0xff] }
 0x134   : > { %3216 = vmatprep.mubr.bf16.mxu0 %v10760_v14  ;;  %3841 = vmatprep.mubr.bf16.mxu1 %v10760_v14 }
 0x135   : > { %v952_v8 = vpop.f32.mrb[24].mxu0  ;;  %5039 = vmatprep.subr.bf16.mxu1 %v6644_v10  ;;  %v8762_v63 = vpop.f32.mrb[24].mxu1  ;;  %7007 = vmatprep.subr.bf16.mxu0 %v6570_v50 }
 0x136   : > { %v8760_v22 = vadd.f32 %v8653_v45, %v952_v8  ;;  %10810 = vst [vmem:[#allocation39_spill] sm:$0xff] %v8762_v63  ;;  %v8764_v17 = vpop.f32.mrb[25].mxu0  ;;  %v8772_v26 = vpop.f32.mrb[25].mxu1  ;;  %v6490_v45 = vcombine.low %v3537_v34, %v3540_v46  ;;  %v7180_v8 = vld [vmem:[%s7309_s28 + $0x2c] sm:$0x1] }
 0x137   : > { %v956_v62 = vpop.f32.mrb[26].mxu0  ;;  %7008 = vmatpush3.bf16.msra.mxu0 %v6570_v50  ;;  %v8783_v29 = vpop.f32.mrb[26].mxu1  ;;  %v3546_v34 = vrot.slane %v7180_v8, 5  ;;  %5040 = vmatpush1.bf16.msra.mxu1 %v6643_v7  ;;  %v6645_v50 = vcombine.low %v4881_v28, %v4882_v37  ;;  %v6460_v7 = vld [vmem:[%s7309_s28 + $0x30] sm:$0xe]  ;;  %v3544_v37 = vsel %vm7746_vm5, %v6475_v58, %v3543_v31 }
 0x138   : > { %10809 = vst [vmem:[#allocation38_spill] sm:$0xff] %v8760_v22  ;;  %v8781_v10 = vadd.f32 %v8663_v15, %v956_v62  ;;  %10812 = vst [vmem:[#allocation41_spill] sm:$0xff] %v8783_v29  ;;  %v8785_v24 = vpop.f32.mrb[27].mxu0  ;;  %7009 = vmatprep.subr.bf16.mxu0 %v6571_v20  ;;  %v8788_v46 = vpop.f32.mrb[27].mxu1  ;;  %5041 = vmatprep.subr.bf16.mxu1 %v6646_v36  ;;  %v6648_v22 = vcombine.high %v4883_v44, %v4884_v42  ;;  %v4885_v62 = vld [vmem:[%s10713_s1 + $0x234] sm:$0xff]  ;;  %v6476_v31 = vrot.slane %v6460_v7, 9 }
 0x139   : > { %v6572_v15 = vcombine.low %v4098_v16, %v4099_v3  ;;  %v4100_v28 = vld [vmem:[%s10713_s1 + $0x230] sm:$0xf]  ;;  %v3547_v36 = vsel %vm7746_vm5, %v3545_v48, %v3546_v34  ;;  %v6647_v3 = vcombine.low %v4883_v44, %v4884_v42  ;;  %v4887_v48 = vld [vmem:[%s10713_s1 + $0x2b4] sm:$0xff] }
 0x13a   : > { %10811 = vst [vmem:[#allocation40_spill] sm:$0xff] %v8781_v10  ;;  %3217 = vmatmul.mubr.bf16.gmra.mrb[132].mxu0 %v8216_v19  ;;  %v4886_v10 = vld [vmem:[%s10713_s1 + $0x274] sm:$0xff]  ;;  %3842 = vmatmul.mubr.bf16.gmra.mrb[132].mxu1 %v6490_v45  ;;  %v4101_v19 = vld [vmem:[%s10713_s1 + $0x270] sm:$0xf]  ;;  %v6491_v44 = vcombine.low %v3544_v37, %v3547_v36 }
 0x13b   : > { %3226 = vmatprep.mubr.bf16.mxu0 %v10760_v14  ;;  %3851 = vmatprep.mubr.bf16.mxu1 %v10760_v14  ;;  %v7181_v45 = vld [vmem:[%s7309_s28 + $0x34] sm:$0xf]  ;;  %v6650_v23 = vcombine.high %v4885_v62, %v4886_v10  ;;  %v6573_v58 = vcombine.low %v4100_v28, %v4101_v19  ;;  %v4102_v42 = vld [vmem:[%s10713_s1 + $0x2b0] sm:$0xf]  ;;  %v6649_v37 = vcombine.low %v4885_v62, %v4886_v10  ;;  %v6461_v10 = vld [vmem:[%s7309_s28 + $0x3c] sm:$0xe] }
 0x13c   : > { %v3550_v16 = vrot.slane %v7181_v45, 5  ;;  %5042 = vmatpush1.bf16.msra.mxu1 %v6645_v50  ;;  %7010 = vmatpush3.bf16.msra.mxu0 %v6571_v20  ;;  %v4888_v20 = vld [vmem:[%s10713_s1 + $0x2f4] sm:$0xff]  ;;  %v4103_v34 = vld [vmem:[%s10713_s1 + $0x2f0] sm:$0xf] }
 0x13d   : > { %v962_v8 = vpop.f32.mrb[28].mxu0  ;;  %5043 = vmatprep.subr.bf16.mxu1 %v6648_v22  ;;  %v8814_v63 = vpop.f32.mrb[28].mxu1  ;;  %7011 = vmatprep.subr.bf16.mxu0 %v6572_v15  ;;  %v7182_v45 = vld [vmem:[%s7309_s28 + $0x38] sm:$0x1] }
 0x13e   : > { %v8812_v29 = vadd.f32 %v8648_v47, %v962_v8  ;;  %10814 = vst [vmem:[#allocation43_spill] sm:$0xff] %v8814_v63  ;;  %v8816_v38 = vpop.f32.mrb[29].mxu0  ;;  %v8824_v22 = vpop.f32.mrb[29].mxu1  ;;  %v3552_v19 = vrot.slane %v3550_v16, 4  ;;  %v3553_v8 = vrot.slane %v7182_v45, 5  ;;  %v4890_v45 = vld [vmem:[%s10713_s1 + $0x374] sm:$0xff] }
 0x13f   : > { %10815 = vst [vmem:[#allocation44_spill] sm:$0xff] %v8824_v22  ;;  %v966_v47 = vpop.f32.mrb[30].mxu0  ;;  %v8835_v7 = vpop.f32.mrb[30].mxu1  ;;  %v6477_v22 = vrot.slane %v6461_v10, 9 }
 0x140   : > { %10813 = vst [vmem:[#allocation42_spill] sm:$0xff] %v8812_v29  ;;  %v8833_v50 = vadd.f32 %v8659_v60, %v966_v47  ;;  %10817 = vst [vmem:[#allocation46_spill] sm:$0xff] %v8835_v7  ;;  %v8837_v28 = vpop.f32.mrb[31].mxu0  ;;  %5044 = vmatpush1.bf16.msra.mxu1 %v6647_v3  ;;  %v8840_v36 = vpop.f32.mrb[31].mxu1  ;;  %7012 = vmatpush3.bf16.msra.mxu0 %v6572_v15  ;;  %v6652_v29 = vcombine.high %v4887_v48, %v4888_v20  ;;  %v4889_v47 = vld [vmem:[%s10713_s1 + $0x334] sm:$0xff] }
 0x141   : > { %10818 = vst [vmem:[#allocation47_spill] sm:$0xff] %v8840_v36  ;;  %5045 = vmatprep.subr.bf16.mxu1 %v6650_v23  ;;  %7013 = vmatprep.subr.bf16.mxu0 %v6573_v58  ;;  %v6574_v60 = vcombine.low %v4102_v42, %v4103_v34  ;;  %v4104_v23 = vld [vmem:[%s10713_s1 + $0x330] sm:$0xf]  ;;  %v3551_v15 = vsel %vm7746_vm5, %v6476_v31, %v3550_v16  ;;  %v7183_v3 = vld [vmem:[%s7309_s28 + $0x40] sm:$0xf]  ;;  %v3560_v16 = vrot.slane %v7184_v33, 5 }
 0x142   : > { %10816 = vst [vmem:[#allocation45_spill] sm:$0xff] %v8833_v50  ;;  %3227 = vmatmul.mubr.bf16.gmra.mrb[136].mxu0 %v8262_v51  ;;  %3852 = vmatmul.mubr.bf16.gmra.mrb[136].mxu1 %v6491_v44  ;;  %v4105_v51 = vld [vmem:[%s10713_s1 + $0x370] sm:$0xf]  ;;  %v3554_v62 = vsel %vm7746_vm5, %v3552_v19, %v3553_v8  ;;  %v3557_v44 = vrot.slane %v7183_v3, 5  ;;  %v6651_v42 = vcombine.low %v4887_v48, %v4888_v20  ;;  %v4891_v19 = vld [vmem:[%s10713_s1 + $0x3b4] sm:$0xff] }
 0x143   : > { %3236 = vmatprep.mubr.bf16.mxu0 %v10760_v14  ;;  %3861 = vmatprep.mubr.bf16.mxu1 %v10760_v14  ;;  %v6654_v50 = vcombine.high %v4889_v47, %v4890_v45  ;;  %v6575_v31 = vcombine.low %v4104_v23, %v4105_v51  ;;  %v6492_v20 = vcombine.low %v3551_v15, %v3554_v62  ;;  %v4106_v33 = vld [vmem:[%s10713_s1 + $0x3b0] sm:$0xf] }
 0x144   : > { %5046 = vmatpush1.bf16.msra.mxu1 %v6649_v37  ;;  %7014 = vmatpush3.bf16.msra.mxu0 %v6573_v58  ;;  %v4107_v8 = vld [vmem:[%s10713_s1 + $0x3f0] sm:$0xf]  ;;  %v6653_v51 = vcombine.low %v4889_v47, %v4890_v45 }
 0x145   : > { %v972_v34 = vpop.f32.mrb[32].mxu0  ;;  %5047 = vmatprep.subr.bf16.mxu1 %v6652_v29  ;;  %v6975_v63 = vpop.f32.mrb[32].mxu1  ;;  %7015 = vmatprep.subr.bf16.mxu0 %v6574_v60  ;;  %v4892_v29 = vld [vmem:[%s10713_s1 + $0x3f4] sm:$0xff] }
 0x146   : > { %v8864_v7 = vadd.f32 %v8681_v21, %v972_v34  ;;  %v8866_v36 = vpop.f32.mrb[33].mxu0  ;;  %v8876_v58 = vadd.f32 %v6975_v63, %v8592_v59  ;;  %v1681_v21 = vpop.f32.mrb[33].mxu1  ;;  %v3559_v63 = vrot.slane %v3557_v44, 4  ;;  %v6656_v3 = vcombine.high %v4891_v19, %v4892_v29 }
 0x147   : > { %v976_v48 = vpop.f32.mrb[34].mxu0  ;;  %v8885_v37 = vadd.f32 %v1681_v21, %v8556_v54  ;;  %v6976_v23 = vpop.f32.mrb[34].mxu1  ;;  %v6576_v54 = vcombine.low %v4106_v33, %v4107_v8 }
 0x148   : > { %v8888_v10 = vadd.f32 %v8692_v2, %v976_v48  ;;  %v8890_v59 = vpop.f32.mrb[35].mxu0  ;;  %5048 = vmatpush1.bf16.msra.mxu1 %v6651_v42  ;;  %v8893_v15 = vadd.f32 %v6976_v23, %v8602_v35  ;;  %v1684_v62 = vpop.f32.mrb[35].mxu1  ;;  %7016 = vmatpush3.bf16.msra.mxu0 %v6574_v60  ;;  %v5470_v2 = vld [vmem:[%s10713_s1 + $0x3c] sm:$0xf] }
 0x149   : > { %5049 = vmatprep.subr.bf16.mxu1 %v6654_v50  ;;  %v8896_v34 = vadd.f32 %v1684_v62, %v8564_v56  ;;  %7017 = vmatprep.subr.bf16.mxu0 %v6575_v31  ;;  %v5471_v35 = vld [vmem:[%s10713_s1 + $0x7c] sm:$0xf]  ;;  %v3558_v56 = vsel %vm7746_vm5, %v6477_v22, %v3557_v44  ;;  %v6655_v50 = vcombine.low %v4891_v19, %v4892_v29 }
 0x14a   : > { %3237 = vmatmul.mubr.bf16.gmra.mrb[140].mxu0 %v8302_v30  ;;  %3862 = vmatmul.mubr.bf16.gmra.mrb[140].mxu1 %v6492_v20  ;;  %v3561_v30 = vsel %vm7746_vm5, %v3559_v63, %v3560_v16  ;;  %v8914_v21 = vcombine.low %v5470_v2, %v5471_v35 }
 0x14b   : > { %3246 = vmatprep.mubr.bf16.mxu0 %v10760_v14  ;;  %3871 = vmatprep.mubr.bf16.mxu1 %v10760_v14  ;;  %v6493_v20 = vcombine.low %v3558_v56, %v3561_v30 }
 0x14c   : > { %5050 = vmatpush1.bf16.msra.mxu1 %v6653_v51  ;;  %7018 = vmatpush3.bf16.msra.mxu0 %v6575_v31 }
 0x14d   : > { %v982_v60 = vpop.f32.mrb[36].mxu0  ;;  %5051 = vmatprep.subr.bf16.mxu1 %v6656_v3  ;;  %v6979_v45 = vpop.f32.mrb[36].mxu1  ;;  %7019 = vmatprep.subr.bf16.mxu0 %v6576_v54 }
 0x14e   : > { %v8912_v47 = vadd.f32 %v8676_v11, %v982_v60  ;;  %v984_v42 = vpop.f32.mrb[37].mxu0  ;;  %v8917_v48 = vadd.f32 %v6979_v45, %v8650_v13  ;;  %v1697_v22 = vpop.f32.mrb[37].mxu1 }
 0x14f   : > { %v986_v44 = vpop.f32.mrb[38].mxu0  ;;  %v8920_v16 = vadd.f32 %v1697_v22, %v8623_v5  ;;  %v6980_v19 = vpop.f32.mrb[38].mxu1 }
 0x150   : > { %v8923_v31 = vadd.f32 %v8687_v43, %v986_v44  ;;  %v988_v11 = vpop.f32.mrb[39].mxu0  ;;  %5052 = vmatpush1.bf16.msra.mxu1 %v6655_v50  ;;  %v8926_v29 = vadd.f32 %v6980_v19, %v8661_v18  ;;  %v1700_v33 = vpop.f32.mrb[39].mxu1  ;;  %7020 = vmatpush3.bf16.msra.mxu0 %v6576_v54 }
 0x151   : > { %v8929_v13 = vadd.f32 %v1700_v33, %v8635_v52  ;;  %7053 = vmatprep.subr.bf16.mxu0 %v8914_v21 }
 0x152   : > { %3247 = vmatmul.mubr.bf16.gmra.mrb[144].mxu0 %v8343_v6  ;;  %3872 = vmatmul.mubr.bf16.gmra.mrb[144].mxu1 %v6493_v20 }
 0x153   : > { %3256 = vmatprep.mubr.bf16.mxu0 %v10760_v14  ;;  %3881 = vmatprep.mubr.bf16.mxu1 %v10760_v14 }
 0x155   : > { %v992_v5 = vpop.f32.mrb[40].mxu0  ;;  %v6983_v18 = vpop.f32.mrb[40].mxu1 }
 0x156   : > { %v8936_v43 = vadd.f32 %v8719_v53, %v992_v5  ;;  %v994_v8 = vpop.f32.mrb[41].mxu0  ;;  %v8939_v23 = vadd.f32 %v6983_v18, %v8708_v4  ;;  %v1713_v52 = vpop.f32.mrb[41].mxu1  ;;  %v10819_v4 = vcombine.low %v8428_v49, %v8440_v40  ;;  %v10826_v18 = vld [vmem:[#allocation4_spill] sm:$0xff] }
 0x157   : > { %v996_v63 = vpop.f32.mrb[42].mxu0  ;;  %v8942_v6 = vadd.f32 %v1713_v52, %v8678_v12  ;;  %v6984_v62 = vpop.f32.mrb[42].mxu1 }
 0x158   : > { %v8945_v51 = vadd.f32 %v8732_v1, %v996_v63  ;;  %v8947_v3 = vpop.f32.mrb[43].mxu0  ;;  %v8950_v54 = vadd.f32 %v6984_v62, %v8729_v57  ;;  %v1716_v53 = vpop.f32.mrb[43].mxu1  ;;  %v10828_v62 = vld [vmem:[#allocation39_spill] sm:$0xff] }
 0x159   : > { %v8953_v2 = vadd.f32 %v1716_v53, %v8689_v41 }
 0x15a   : > { %3257 = vmatmul.mubr.bf16.gmra.mrb[148].mxu0 %v8392_v27  ;;  %3882 = vmatmul.mubr.bf16.gmra.mrb[148].mxu1 %v10819_v4 }
 0x15b   : > { %3266 = vmatprep.mubr.bf16.mxu0 %v10760_v14  ;;  %3891 = vmatprep.mubr.bf16.mxu1 %v10760_v14 }
 0x15d   : > { %v1002_v1 = vpop.f32.mrb[44].mxu0  ;;  %v6987_v57 = vpop.f32.mrb[44].mxu1 }
 0x15e   : > { %v8962_v12 = vadd.f32 %v8706_v55, %v1002_v1  ;;  %v1004_v35 = vpop.f32.mrb[45].mxu0  ;;  %v8965_v56 = vadd.f32 %v6987_v57, %v8816_v38  ;;  %v1729_v41 = vpop.f32.mrb[45].mxu1  ;;  %v10822_v38 = vcombine.low %v8432_v9, %v8448_v25 }
 0x15f   : > { %v1006_v30 = vpop.f32.mrb[46].mxu0  ;;  %v8968_v27 = vadd.f32 %v1729_v41, %v8764_v17  ;;  %v6988_v40 = vpop.f32.mrb[46].mxu1 }
 0x160   : > { %10820 = vst [vmem:[#allocation48_spill] sm:$0xff] %v8962_v12  ;;  %v8971_v49 = vadd.f32 %v8727_v39, %v1006_v30  ;;  %v1008_v50 = vpop.f32.mrb[47].mxu0  ;;  %v8974_v60 = vadd.f32 %v6988_v40, %v8837_v28  ;;  %v1732_v55 = vpop.f32.mrb[47].mxu1  ;;  %v10831_v40 = vld [vmem:[#allocation41_spill] sm:$0xff] }
 0x161   : > { %v8977_v45 = vadd.f32 %v1732_v55, %v8785_v24 }
 0x162   : > { %10821 = vst [vmem:[#allocation49_spill] sm:$0xff] %v8971_v49  ;;  %3267 = vmatmul.mubr.bf16.gmra.mrb[152].mxu0 %v8412_v61  ;;  %3892 = vmatmul.mubr.bf16.gmra.mrb[152].mxu1 %v10822_v38 }
 0x163   : > { %3276 = vmatprep.mubr.bf16.mxu0 %v10760_v14  ;;  %3901 = vmatprep.mubr.bf16.mxu1 %v10760_v14 }
 0x165   : > { %v1012_v39 = vpop.f32.mrb[48].mxu0  ;;  %v6991_v28 = vpop.f32.mrb[48].mxu1 }
 0x166   : > { %v8986_v17 = vadd.f32 %v8772_v26, %v1012_v39  ;;  %v1014_v22 = vpop.f32.mrb[49].mxu0  ;;  %v8988_v24 = vadd.f32 %v6991_v28, %v984_v42  ;;  %v1745_v44 = vpop.f32.mrb[49].mxu1  ;;  %v10825_v42 = vld [vmem:[#allocation3_spill] sm:$0xff] }
 0x167   : > { %v1016_v61 = vpop.f32.mrb[50].mxu0  ;;  %v8991_v20 = vadd.f32 %v1745_v44, %v8866_v36  ;;  %v6992_v25 = vpop.f32.mrb[50].mxu1  ;;  %v10827_v52 = vcombine.low %v10825_v42, %v10826_v18  ;;  %v7185_v36 = vld [vmem:[%s7309_s28 + $0x7c] sm:$0xf]  ;;  %v7186_v44 = vld [vmem:[%s7309_s28 + $0x80] sm:$0x1] }
 0x168   : > { %10823 = vst [vmem:[#allocation50_spill] sm:$0xff] %v8986_v17  ;;  %v8994_v9 = vadd.f32 %v8788_v46, %v1016_v61  ;;  %v1018_v19 = vpop.f32.mrb[51].mxu0  ;;  %v8996_v33 = vadd.f32 %v6992_v25, %v988_v11  ;;  %v1748_v26 = vpop.f32.mrb[51].mxu1  ;;  %v6466_v46 = vld [vmem:[%s7309_s28 + $0x78] sm:$0xe]  ;;  %v3592_v63 = vrot.slane %v7185_v36, 5 }
 0x169   : > { %v8999_v5 = vadd.f32 %v1748_v26, %v8890_v59  ;;  %v6482_v41 = vrot.slane %v6466_v46, 9  ;;  %v3595_v61 = vrot.slane %v7186_v44, 5  ;;  %v10835_v42 = vld [vmem:[#allocation5_spill] sm:$0xff]  ;;  %v10837_v18 = vld [vmem:[#allocation8_spill] sm:$0xff]  ;;  %v6467_v36 = vld [vmem:[%s7309_s28 + $0x84] sm:$0xe] }
 0x16a   : > { %10824 = vst [vmem:[#allocation51_spill] sm:$0xff] %v8994_v9  ;;  %3277 = vmatmul.mubr.bf16.gmra.mrb[156].mxu0 %v8455_v32  ;;  %3902 = vmatmul.mubr.bf16.gmra.mrb[156].mxu1 %v10827_v52  ;;  %v3594_v28 = vrot.slane %v3592_v63, 4 }
 0x16b   : > { %3286 = vmatprep.mubr.bf16.mxu0 %v10760_v14  ;;  %3911 = vmatprep.mubr.bf16.mxu1 %v10760_v14  ;;  %v3593_v46 = vsel %vm7746_vm5, %v6482_v41, %v3592_v63  ;;  %v10843_v41 = vld [vmem:[#allocation47_spill] sm:$0xff] }
 0x16d   : > { %v1022_v11 = vpop.f32.mrb[52].mxu0  ;;  %v6995_v59 = vpop.f32.mrb[52].mxu1 }
 0x16e   : > { %v9010_v53 = vadd.f32 %v10828_v62, %v1022_v11  ;;  %v1024_v4 = vpop.f32.mrb[53].mxu0  ;;  %v9012_v1 = vadd.f32 %v6995_v59, %v1004_v35  ;;  %v1761_v32 = vpop.f32.mrb[53].mxu1  ;;  %v7187_v11 = vld [vmem:[%s7309_s28 + $0x88] sm:$0xf]  ;;  %v10839_v59 = vld [vmem:[#allocation44_spill] sm:$0xff] }
 0x16f   : > { %v1026_v57 = vpop.f32.mrb[54].mxu0  ;;  %v9014_v30 = vadd.f32 %v1761_v32, %v994_v8  ;;  %v6996_v38 = vpop.f32.mrb[54].mxu1  ;;  %v10836_v8 = vld [vmem:[#allocation7_spill] sm:$0xff] }
 0x170   : > { %10829 = vst [vmem:[#allocation3_spill] sm:$0xff] %v9010_v53  ;;  %10830 = vst [vmem:[#allocation4_spill] sm:$0xff] %v9012_v1  ;;  %v9017_v55 = vadd.f32 %v10831_v40, %v1026_v57  ;;  %v1028_v39 = vpop.f32.mrb[55].mxu0  ;;  %v9020_v25 = vadd.f32 %v6996_v38, %v1008_v50  ;;  %v1764_v26 = vpop.f32.mrb[55].mxu1  ;;  %v10838_v52 = vcombine.low %v10836_v8, %v10837_v18  ;;  %v6483_v8 = vrot.slane %v6467_v36, 9  ;;  %v10849_v36 = vld [vmem:[#allocation9_spill] sm:$0xff] }
 0x171   : > { %v9023_v35 = vadd.f32 %v1764_v26, %v8947_v3  ;;  %v3596_v50 = vsel %vm7746_vm5, %v3594_v28, %v3595_v61  ;;  %v3599_v3 = vrot.slane %v7187_v11, 5  ;;  %v10845_v11 = vld [vmem:[#allocation6_spill] sm:$0xff] }
 0x172   : > { %10832 = vst [vmem:[#allocation39_spill] sm:$0xff] %v9017_v55  ;;  %10833 = vst [vmem:[#allocation41_spill] sm:$0xff] %v9020_v25  ;;  %3287 = vmatmul.mubr.bf16.gmra.mrb[160].mxu0 %v10835_v42  ;;  %3912 = vmatmul.mubr.bf16.gmra.mrb[160].mxu1 %v10838_v52  ;;  %v6498_v42 = vcombine.low %v3593_v46, %v3596_v50  ;;  %v6468_v50 = vld [vmem:[%s7309_s28 + $0x90] sm:$0xe] }
 0x173   : > { %10834 = vst [vmem:[#allocation52_spill] sm:$0xff] %v9023_v35  ;;  %3296 = vmatprep.mubr.bf16.mxu0 %v10760_v14  ;;  %3921 = vmatprep.mubr.bf16.mxu1 %v10760_v14  ;;  %v3601_v52 = vrot.slane %v3599_v3, 4 }
 0x175   : > { %v1032_v62 = vpop.f32.mrb[56].mxu0  ;;  %v6999_v57 = vpop.f32.mrb[56].mxu1 }
 0x176   : > { %v9038_v32 = vadd.f32 %v10839_v59, %v1032_v62  ;;  %v1034_v40 = vpop.f32.mrb[57].mxu0  ;;  %v9040_v38 = vadd.f32 %v6999_v57, %v1024_v4  ;;  %v1777_v44 = vpop.f32.mrb[57].mxu1  ;;  %v3602_v62 = vrot.slane %v10845_v11, 5  ;;  %v10848_v57 = vld [vmem:[#allocation10_spill] sm:$0xff] }
 0x177   : > { %v1036_v26 = vpop.f32.mrb[58].mxu0  ;;  %v9042_v63 = vadd.f32 %v1777_v44, %v1014_v22  ;;  %v7000_v61 = vpop.f32.mrb[58].mxu1  ;;  %v3600_v22 = vsel %vm7746_vm5, %v6483_v8, %v3599_v3  ;;  %v10854_v3 = vld [vmem:[#allocation46_spill] sm:$0xff] }
 0x178   : > { %10840 = vst [vmem:[#allocation5_spill] sm:$0xff] %v9038_v32  ;;  %10841 = vst [vmem:[#allocation7_spill] sm:$0xff] %v9040_v38  ;;  %v9045_v28 = vadd.f32 %v10843_v41, %v1036_v26  ;;  %v1038_v18 = vpop.f32.mrb[59].mxu0  ;;  %v9048_v59 = vadd.f32 %v7000_v61, %v1028_v39  ;;  %v1780_v32 = vpop.f32.mrb[59].mxu1  ;;  %v3603_v46 = vsel %vm7746_vm5, %v3601_v52, %v3602_v62  ;;  %v3606_v39 = vrot.slane %v10849_v36, 5  ;;  %v10850_v26 = vld [vmem:[#allocation43_spill] sm:$0xff] }
 0x179   : > { %10842 = vst [vmem:[#allocation8_spill] sm:$0xff] %v9042_v63  ;;  %v9050_v4 = vadd.f32 %v1780_v32, %v1018_v19 }
 0x17a   : > { %10844 = vst [vmem:[#allocation44_spill] sm:$0xff] %v9045_v28  ;;  %10846 = vst [vmem:[#allocation47_spill] sm:$0xff] %v9048_v59  ;;  %3297 = vmatmul.mubr.bf16.gmra.mrb[164].mxu0 %v10848_v57  ;;  %3922 = vmatmul.mubr.bf16.gmra.mrb[164].mxu1 %v6498_v42  ;;  %v6499_v57 = vcombine.low %v3600_v22, %v3603_v46  ;;  %v6484_v28 = vrot.slane %v6468_v50, 9  ;;  %v3608_v36 = vrot.slane %v3606_v39, 4 }
 0x17b   : > { %10847 = vst [vmem:[#allocation6_spill] sm:$0xff] %v9050_v4  ;;  %3306 = vmatprep.mubr.bf16.mxu0 %v10760_v14  ;;  %3931 = vmatprep.mubr.bf16.mxu1 %v10760_v14 }
 0x17c   : > { %v3607_v46 = vsel %vm7746_vm5, %v6484_v28, %v3606_v39 }
 0x17d   : > { %v1042_v44 = vpop.f32.mrb[60].mxu0  ;;  %v7003_v32 = vpop.f32.mrb[60].mxu1 }
 0x17e   : > { %v9062_v19 = vadd.f32 %v10850_v26, %v1042_v44  ;;  %v1044_v41 = vpop.f32.mrb[61].mxu0  ;;  %v1793_v61 = vpop.f32.mrb[61].mxu1  ;;  %v10856_v44 = vld [vmem:[#allocation12_spill] sm:$0xff] }
 0x17f   : > { %v9064_v42 = vadd.f32 %v7003_v32, %v1044_v41  ;;  %v1046_v11 = vpop.f32.mrb[62].mxu0  ;;  %v9066_v59 = vadd.f32 %v1793_v61, %v1034_v40  ;;  %v7004_v52 = vpop.f32.mrb[62].mxu1  ;;  %v3609_v26 = vrot.slane %v10856_v44, 5  ;;  %v10860_v40 = vld [vmem:[#allocation11_spill] sm:$0xff]  ;;  %v6469_v61 = vld [vmem:[%s7309_s28 + $0x9c] sm:$0xe] }
 0x180   : > { %10851 = vst [vmem:[#allocation10_spill] sm:$0xff] %v9062_v19  ;;  %v9069_v8 = vadd.f32 %v10854_v3, %v1046_v11  ;;  %v1048_v62 = vpop.f32.mrb[63].mxu0  ;;  %v1796_v32 = vpop.f32.mrb[63].mxu1  ;;  %v3613_v22 = vrot.slane %v10860_v40, 5  ;;  %v10861_v3 = vld [vmem:[#allocation17_spill] sm:$0xff]  ;;  %v6485_v28 = vrot.slane %v6469_v61, 9 }
 0x181   : > { %10852 = vst [vmem:[#allocation9_spill] sm:$0xff] %v9064_v42  ;;  %10853 = vst [vmem:[#allocation43_spill] sm:$0xff] %v9066_v59  ;;  %v9072_v19 = vadd.f32 %v7004_v52, %v1048_v62  ;;  %v9074_v41 = vadd.f32 %v1796_v32, %v1038_v18  ;;  %v10859_v42 = vld [vmem:[#allocation13_spill] sm:$0xff]  ;;  %v3610_v50 = vsel %vm7746_vm5, %v3608_v36, %v3609_v26  ;;  %v10864_v26 = vld [vmem:[#allocation20_spill] sm:$0xff] }
 0x182   : > { %10855 = vst [vmem:[#allocation46_spill] sm:$0xff] %v9069_v8  ;;  %3307 = vmatmul.mubr.bf16.gmra.mrb[168].mxu0 %v10859_v42  ;;  %3932 = vmatmul.mubr.bf16.gmra.mrb[168].mxu1 %v6499_v57  ;;  %v9092_v57 = vld [vmem:[%s10714_s2] ss:$0 sm:$0xff]  ;;  %v6500_v32 = vcombine.low %v3607_v46, %v3610_v50  ;;  %v3615_v39 = vrot.slane %v3613_v22, 4 }
 0x183   : > { %10857 = vst [vmem:[#allocation12_spill] sm:$0xff] %v9072_v19  ;;  %10858 = vst [vmem:[#allocation53_spill] sm:$0xff] %v9074_v41  ;;  %3316 = vmatprep.mubr.bf16.mxu0 %v10760_v14  ;;  %3941 = vmatprep.mubr.bf16.mxu1 %v10760_v14 }
 0x185   : > { %v2102_v11 = vpop.f32.mrb[64].mxu0  ;;  %v3015_v52 = vpop.f32.mrb[64].mxu1 }
 0x186   : > { %v2261_v18 = vadd.f32 %v2102_v11, %v10861_v3  ;;  %v9087_v42 = vpop.f32.mrb[65].mxu0  ;;  %v3017_v62 = vpop.f32.mrb[65].mxu1 }
 0x187   : > { %10862 = vst [vmem:[#allocation13_spill] sm:$0xff] %v9087_v42  ;;  %v2106_v44 = vpop.f32.mrb[66].mxu0  ;;  %v9095_v36 = vadd.f32 %v3017_v62, %v8885_v37  ;;  %v3019_v3 = vpop.f32.mrb[66].mxu1  ;;  %v10866_v42 = vld [vmem:[#allocation14_spill] sm:$0xff] }
 0x188   : > { %v3367_v40 = vadd.f32 %v3015_v52, %v2261_v18  ;;  %v2262_v11 = vadd.f32 %v2106_v44, %v10864_v26  ;;  %v9098_v19 = vpop.f32.mrb[67].mxu0  ;;  %v3616_v8 = vrot.slane %v10866_v42, 5  ;;  %v3021_v46 = vpop.f32.mrb[67].mxu1  ;;  %v10868_v18 = vld [vmem:[#allocation16_spill] sm:$0xff]  ;;  %v10869_v52 = vld [vmem:[#allocation15_spill] sm:$0xff]  ;;  %v3614_v44 = vsel %vm7746_vm5, %v6485_v28, %v3613_v22 }
 0x189   : > { %10863 = vst [vmem:[#allocation11_spill] sm:$0xff] %v9095_v36  ;;  %10865 = vst [vmem:[#allocation17_spill] sm:$0xff] %v9098_v19  ;;  %v9108_v61 = vadd.f32 %v3021_v46, %v8896_v34  ;;  %v3620_v42 = vrot.slane %v10869_v52, 5  ;;  %v6470_v34 = vld [vmem:[%s7309_s28 + $0xa8] sm:$0xe] }
 0x18a   : > { %v5798_v50 = vadd.f32 %v9092_v57, %v3367_v40  ;;  %v3368_v37 = vadd.f32 %v3019_v3, %v2262_v11  ;;  %3317 = vmatmul.mubr.bf16.gmra.mrb[172].mxu0 %v10868_v18  ;;  %3942 = vmatmul.mubr.bf16.gmra.mrb[172].mxu1 %v6500_v32  ;;  %v3617_v40 = vsel %vm7746_vm5, %v3615_v39, %v3616_v8  ;;  %v10870_v11 = vld [vmem:[#allocation21_spill] sm:$0xff]  ;;  %v6486_v52 = vrot.slane %v6470_v34, 9  ;;  %v10872_v19 = vld [vmem:[#allocation19_spill] sm:$0xff]  ;;  %v10874_v39 = vld [vmem:[#allocation24_spill] sm:$0xff] }
 0x18b   : > { %10867 = vst [vmem:[#allocation20_spill] sm:$0xff] %v9108_v61  ;;  %3326 = vmatprep.mubr.bf16.mxu0 %v10760_v14  ;;  %3951 = vmatprep.mubr.bf16.mxu1 %v10760_v14  ;;  %v3622_v61 = vrot.slane %v3620_v42, 4  ;;  %v3623_v22 = vrot.slane %v10872_v19, 5  ;;  %v6471_v19 = vld [vmem:[%s7309_s28 + $0xb4] sm:$0xe] }
 0x18c   : > { %5830 = vst [vmem:[%s9104_s29] sm:$0xff] %v5798_v50  ;;  %v5799_v62 = vadd.f32 %v9092_v57, %v3368_v37  ;;  %v6501_v37 = vcombine.low %v3614_v44, %v3617_v40  ;;  %v10877_v40 = vld [vmem:[#allocation22_spill] sm:$0xff]  ;;  %v3621_v34 = vsel %vm7746_vm5, %v6486_v52, %v3620_v42 }
 0x18d   : > { %v2112_v26 = vpop.f32.mrb[68].mxu0  ;;  %v3025_v3 = vpop.f32.mrb[68].mxu1 }
 0x18e   : > { %5831 = vst [vmem:[%s9104_s29 + $0x8] sm:$0xff] %v5799_v62  ;;  %v2263_v32 = vadd.f32 %v2112_v26, %v10870_v11  ;;  %v9123_v46 = vpop.f32.mrb[69].mxu0  ;;  %v3027_v18 = vpop.f32.mrb[69].mxu1 }
 0x18f   : > { %10871 = vst [vmem:[#allocation14_spill] sm:$0xff] %v9123_v46  ;;  %v2116_v50 = vpop.f32.mrb[70].mxu0  ;;  %v9127_v8 = vadd.f32 %v3027_v18, %v8876_v58  ;;  %v3029_v26 = vpop.f32.mrb[70].mxu1  ;;  %v6577_v58 = vld [vmem:[%s7309_s28 + $0x18] sm:$0xf] }
 0x190   : > { %v3369_v28 = vadd.f32 %v3025_v3, %v2263_v32  ;;  %v2264_v62 = vadd.f32 %v2116_v50, %v10874_v39  ;;  %v9130_v11 = vpop.f32.mrb[71].mxu0  ;;  %v3031_v46 = vpop.f32.mrb[71].mxu1  ;;  %v3624_v32 = vsel %vm7746_vm5, %v3622_v61, %v3623_v22  ;;  %v10878_v3 = vld [vmem:[#allocation18_spill] sm:$0xff]  ;;  %v4497_v22 = vshll.u32 %v6577_v58, 16 }
 0x191   : > { %10873 = vst [vmem:[#allocation16_spill] sm:$0xff] %v9127_v8  ;;  %10875 = vst [vmem:[#allocation15_spill] sm:$0xff] %v9130_v11  ;;  %v9134_v44 = vadd.f32 %v3031_v46, %v8893_v15  ;;  %v3627_v18 = vrot.slane %v10878_v3, 5  ;;  %v9149_v46 = vld [vmem:[%s7309_s28 + $0x1c] sm:$0xf]  ;;  %v10879_v39 = vld [vmem:[#allocation26_spill] sm:$0xff]  ;;  %v6502_v61 = vcombine.low %v3621_v34, %v3624_v32 }
 0x192   : > { %v5800_v36 = vadd.f32 %v9092_v57, %v3369_v28  ;;  %v3370_v41 = vadd.f32 %v3029_v26, %v2264_v62  ;;  %3327 = vmatmul.mubr.bf16.gmra.mrb[176].mxu0 %v10877_v40  ;;  %3952 = vmatmul.mubr.bf16.gmra.mrb[176].mxu1 %v6501_v37  ;;  %v6487_v28 = vrot.slane %v6471_v19, 9  ;;  %v4494_v37 = vshrl.u32 %v6577_v58, 16  ;;  %v6580_v58 = vld [vmem:[%s7309_s28 + $0x24] sm:$0xf] }
 0x193   : > { %10876 = vst [vmem:[#allocation21_spill] sm:$0xff] %v9134_v44  ;;  %3336 = vmatprep.mubr.bf16.mxu0 %v10760_v14  ;;  %3961 = vmatprep.mubr.bf16.mxu1 %v10760_v14  ;;  %v3629_v40 = vrot.slane %v3627_v18, 4  ;;  %v4503_v44 = vshll.u32 %v9149_v46, 16  ;;  %v4507_v19 = vshrl.u32 %v9149_v46, 16 }
 0x194   : > { %5832 = vst [vmem:[%s9104_s29 + $0x10] sm:$0xff] %v5800_v36  ;;  %v5801_v15 = vadd.f32 %v9092_v57, %v3370_v41  ;;  %v10881_v41 = vld [vmem:[#allocation23_spill] sm:$0xff]  ;;  %v4496_v55 = vrot.slane %v4494_v37, 4 }
 0x195   : > { %v2122_v50 = vpop.f32.mrb[72].mxu0  ;;  %v3035_v42 = vpop.f32.mrb[72].mxu1  ;;  %v3630_v3 = vrot.slane %v10881_v41, 5  ;;  %v3628_v41 = vsel %vm7746_vm5, %v6487_v28, %v3627_v18  ;;  %v9178_v28 = vld [vmem:[%s7309_s28 + $0x20] sm:$0x1]  ;;  %v9180_v37 = vrot.slane %v4503_v44, 5 }
 0x196   : > { %5833 = vst [vmem:[%s9104_s29 + $0x18] sm:$0xff] %v5801_v15  ;;  %v2265_v62 = vadd.f32 %v2122_v50, %v10879_v39  ;;  %v9153_v52 = vpop.f32.mrb[73].mxu0  ;;  %v3037_v26 = vpop.f32.mrb[73].mxu1  ;;  %v10883_v50 = vld [vmem:[#allocation29_spill] sm:$0xff] }
 0x197   : > { %10880 = vst [vmem:[#allocation19_spill] sm:$0xff] %v9153_v52  ;;  %v2126_v36 = vpop.f32.mrb[74].mxu0  ;;  %v9159_v15 = vadd.f32 %v3037_v26, %v8920_v16  ;;  %v3039_v8 = vpop.f32.mrb[74].mxu1  ;;  %v10885_v52 = vld [vmem:[#allocation25_spill] sm:$0xff]  ;;  %v10887_v26 = vld [vmem:[#allocation28_spill] sm:$0xff]  ;;  %v3631_v18 = vsel %vm7746_vm5, %v3629_v40, %v3630_v3  ;;  %v10889_v3 = vld [vmem:[#allocation30_spill] sm:$0xff] }
 0x198   : > { %v3371_v11 = vadd.f32 %v3035_v42, %v2265_v62  ;;  %v2266_v39 = vadd.f32 %v2126_v36, %v10883_v50  ;;  %v9162_v34 = vpop.f32.mrb[75].mxu0  ;;  %v3041_v32 = vpop.f32.mrb[75].mxu1  ;;  %v3634_v59 = vrot.slane %v10885_v52, 5  ;;  %v6472_v36 = vld [vmem:[%s7309_s28 + $0xc0] sm:$0xe]  ;;  %v4499_v50 = vrot.slane %v4497_v22, 5 }
 0x199   : > { %10882 = vst [vmem:[#allocation24_spill] sm:$0xff] %v9159_v15  ;;  %10884 = vst [vmem:[#allocation22_spill] sm:$0xff] %v9162_v34  ;;  %v9170_v42 = vadd.f32 %v3041_v32, %v8929_v13  ;;  %v9186_v52 = vld [vmem:[%s7309_s28 + $0x28] sm:$0xf]  ;;  %v6583_v15 = vld [vmem:[%s7309_s28 + $0x30] sm:$0xf] }
 0x19a   : > { %v5802_v62 = vadd.f32 %v9092_v57, %v3371_v11  ;;  %v3372_v16 = vadd.f32 %v3039_v8, %v2266_v39  ;;  %3337 = vmatmul.mubr.bf16.gmra.mrb[180].mxu0 %v10887_v26  ;;  %3962 = vmatmul.mubr.bf16.gmra.mrb[180].mxu1 %v6502_v61  ;;  %v4509_v11 = vrot.slane %v4507_v19, 4  ;;  %v4518_v8 = vshrl.u32 %v6580_v58, 16  ;;  %v10888_v26 = vld [vmem:[#allocation27_spill] sm:$0xff] }
 0x19b   : > { %10886 = vst [vmem:[#allocation18_spill] sm:$0xff] %v9170_v42  ;;  %3346 = vmatprep.mubr.bf16.mxu0 %v10760_v14  ;;  %3971 = vmatprep.mubr.bf16.mxu1 %v10760_v14  ;;  %v4521_v61 = vshll.u32 %v6580_v58, 16  ;;  %v6488_v39 = vrot.slane %v6472_v36, 9  ;;  %v3636_v32 = vrot.slane %v3634_v59, 4  ;;  %v3637_v40 = vrot.slane %v10888_v26, 5 }
 0x19c   : > { %5834 = vst [vmem:[%s9104_s29 + $0x20] sm:$0xff] %v5802_v62  ;;  %v5803_v13 = vadd.f32 %v9092_v57, %v3372_v16  ;;  %v6503_v62 = vcombine.low %v3628_v41, %v3631_v18  ;;  %v4500_v34 = vor.u32 %v4499_v50, %v4496_v55  ;;  %v4513_v16 = vshll.u32 %v9178_v28, 16 }
 0x19d   : > { %v2132_v22 = vpop.f32.mrb[76].mxu0  ;;  %v3045_v42 = vpop.f32.mrb[76].mxu1  ;;  %v4510_v58 = vor.u32 %v4509_v11, %v9180_v37  ;;  %v4520_v4 = vrot.slane %v4518_v8, 4  ;;  %v4527_v36 = vshll.u32 %v9186_v52, 16  ;;  %v4531_v26 = vshrl.u32 %v9186_v52, 16 }
 0x19e   : > { %5835 = vst [vmem:[%s9104_s29 + $0x28] sm:$0xff] %v5803_v13  ;;  %v2267_v44 = vadd.f32 %v2132_v22, %v10889_v3  ;;  %v9191_v19 = vpop.f32.mrb[77].mxu0  ;;  %v3047_v38 = vpop.f32.mrb[77].mxu1  ;;  %v10892_v3 = vld [vmem:[#allocation32_spill] sm:$0xff]  ;;  %v4523_v18 = vrot.slane %v4521_v61, 5  ;;  %v3635_v11 = vsel %vm7746_vm5, %v6488_v39, %v3634_v59  ;;  %v3638_v8 = vsel %vm7746_vm5, %v3636_v32, %v3637_v40 }
 0x19f   : > { %10890 = vst [vmem:[#allocation26_spill] sm:$0xff] %v9191_v19  ;;  %v2136_v53 = vpop.f32.mrb[78].mxu0  ;;  %v9199_v22 = vadd.f32 %v3047_v38, %v8917_v48  ;;  %v3049_v55 = vpop.f32.mrb[78].mxu1  ;;  %v4542_v9 = vshrl.u32 %v6583_v15, 16  ;;  %v4515_v61 = vrot.slane %v4513_v16, 5  ;;  %v4501_v59 = vrot.slane %v4500_v34, 4 }
 0x1a0   : > { %v3373_v13 = vadd.f32 %v3045_v42, %v2267_v44  ;;  %v2268_v41 = vadd.f32 %v2136_v53, %v10892_v3  ;;  %v9202_v50 = vpop.f32.mrb[79].mxu0  ;;  %v3051_v19 = vpop.f32.mrb[79].mxu1  ;;  %v4545_v42 = vshll.u32 %v6583_v15, 16  ;;  %v10895_v44 = vld [vmem:[#allocation31_spill] sm:$0xff]  ;;  %v9214_v3 = vld [vmem:[%s7309_s28 + $0x34] sm:$0xf] }
 0x1a1   : > { %10891 = vst [vmem:[#allocation23_spill] sm:$0xff] %v9199_v22  ;;  %10893 = vst [vmem:[#allocation29_spill] sm:$0xff] %v9202_v50  ;;  %v9210_v53 = vadd.f32 %v3051_v19, %v8926_v29  ;;  %v4511_v39 = vrot.slane %v4510_v58, 4  ;;  %v9217_v32 = vrot.slane %v4527_v36, 5  ;;  %v4533_v15 = vrot.slane %v4531_v26, 4  ;;  %v10896_v36 = vld [vmem:[#allocation33_spill] sm:$0xff] }
 0x1a2   : > { %v5804_v48 = vadd.f32 %v9092_v57, %v3373_v13  ;;  %v3374_v38 = vadd.f32 %v3049_v55, %v2268_v41  ;;  %3347 = vmatmul.mubr.bf16.gmra.mrb[184].mxu0 %v10895_v44  ;;  %3972 = vmatmul.mubr.bf16.gmra.mrb[184].mxu1 %v6503_v62  ;;  %v9223_v29 = vld [vmem:[%s7309_s28 + $0x2c] sm:$0x1]  ;;  %v4524_v19 = vor.u32 %v4523_v18, %v4520_v4  ;;  %v4544_v62 = vrot.slane %v4542_v9, 4  ;;  %v7159_v18 = vld [vmem:[%s7309_s28 + $0x18] sm:$0xff]  }
 0x1a3   : > { %10894 = vst [vmem:[#allocation25_spill] sm:$0xff] %v9210_v53  ;;  %3356 = vmatprep.mubr.bf16.mxu0 %v10760_v14  ;;  %3981 = vmatprep.mubr.bf16.mxu1 %v10760_v14  ;;  %v4547_v13 = vrot.slane %v4545_v42, 5  ;;  %v4551_v34 = vshll.u32 %v9214_v3, 16  ;;  %v4555_v58 = vshrl.u32 %v9214_v3, 16  ;;  %v4506_v42 = vsel %vm7386_vm2, %v4501_v59, %v9180_v37  ;;  %v9252_v37 = vld [vmem:[%s7309_s28 + $0x40] sm:$0xf] }
 0x1a4   : > { %5836 = vst [vmem:[%s9104_s29 + $0x30] sm:$0xff] %v5804_v48  ;;  %v5805_v40 = vadd.f32 %v9092_v57, %v3374_v38  ;;  %v6504_v48 = vcombine.low %v3635_v11, %v3638_v8  ;;  %v9232_v38 = vld [vmem:[%s7309_s28 + $0x38] sm:$0x1]  ;;  %v4516_v53 = vsel %vm7386_vm2, %v4511_v39, %v4515_v61  ;;  %v10901_v8 = vld [vmem:[#allocation35_spill] sm:$0xff]  ;;  %v9249_v17 = vrot.slane %v4524_v19, 4  ;;  %10903 = vst [vmem:[#allocation31_spill] sm:$0xff] %v9252_v37 }
 0x1a5   : > { %v2142_v16 = vpop.f32.mrb[80].mxu0  ;;  %v3055_v41 = vpop.f32.mrb[80].mxu1  ;;  %10898 = vst [vmem:[#allocation27_spill] sm:$0xff] %v9232_v38  ;;  %v4548_v59 = vor.u32 %v4547_v13, %v4544_v62  ;;  %v9254_v39 = vrot.slane %v4551_v34, 5 }
 0x1a6   : > { %5837 = vst [vmem:[%s9104_s29 + $0x38] sm:$0xff] %v5805_v40  ;;  %v2269_v26 = vadd.f32 %v2142_v16, %v10896_v36  ;;  %v9229_v55 = vpop.f32.mrb[81].mxu0  ;;  %v3057_v44 = vpop.f32.mrb[81].mxu1  ;;  %v4534_v40 = vor.u32 %v4533_v15, %v9217_v32  ;;  %v4537_v16 = vshll.u32 %v9223_v29, 16  ;;  %v6586_v36 = vld [vmem:[%s7309_s28 + $0x3c] sm:$0xf] }
 0x1a7   : > { %10897 = vst [vmem:[#allocation28_spill] sm:$0xff] %v9229_v55  ;;  %v2146_v4 = vpop.f32.mrb[82].mxu0  ;;  %v9244_v11 = vadd.f32 %v3057_v44, %v8942_v6  ;;  %v3059_v22 = vpop.f32.mrb[82].mxu1  ;;  %v4557_v15 = vrot.slane %v4555_v58, 4  ;;  %v4566_v19 = vshrl.u32 %v6586_v36, 16  ;;  %v4569_v34 = vshll.u32 %v6586_v36, 16 }
 0x1a8   : > { %v3375_v55 = vadd.f32 %v3055_v41, %v2269_v26  ;;  %v2270_v50 = vadd.f32 %v2146_v4, %v10901_v8  ;;  %v9247_v63 = vpop.f32.mrb[83].mxu0  ;;  %v3061_v61 = vpop.f32.mrb[83].mxu1  ;;  %v4561_v26 = vshll.u32 %v9232_v38, 16  ;;  %v10905_v4 = vld [vmem:[#allocation34_spill] sm:$0xff]  ;;  %v6589_v8 = vld [vmem:[%s7309_s28 + $0x48] sm:$0xf] }
 0x1a9   : > { %10900 = vst [vmem:[#allocation30_spill] sm:$0xff] %v9244_v11  ;;  %10902 = vst [vmem:[#allocation32_spill] sm:$0xff] %v9247_v63  ;;  %v9259_v44 = vadd.f32 %v3061_v61, %v8953_v2  ;;  %v9263_v62 = vrot.slane %v4534_v40, 4  ;;  %v9265_v13 = vrot.slane %v4537_v16, 5  ;;  %v4575_v58 = vshll.u32 %v9252_v37, 16 }
 0x1aa   : > { %v5806_v6 = vadd.f32 %v9092_v57, %v3375_v55  ;;  %v3376_v41 = vadd.f32 %v3059_v22, %v2270_v50  ;;  %3357 = vmatmul.mubr.bf16.gmra.mrb[188].mxu0 %v10905_v4  ;;  %3982 = vmatmul.mubr.bf16.gmra.mrb[188].mxu1 %v6504_v48  ;;  %v6625_v22 = vcombine.low %v4506_v42, %v4516_v53  ;;  %v5472_v55 = vld [vmem:[%s10713_s1 + $0xbc] sm:$0xf]  ;;  %v9286_v36 = vld [vmem:[%s7309_s28 + $0x44] sm:$0x1]  ;;  %v4579_v53 = vshrl.u32 %v9252_v37, 16  ;;  %v7161_v37 = vld [vmem:[%s7309_s28 + $0x30] sm:$0xff]  }
 0x1ab   : > { %10904 = vst [vmem:[#allocation33_spill] sm:$0xff] %v9259_v44  ;;  %7021 = vmatprep.mubr.bf16.mxu0 %v7159_v18  ;;  %5069 = vmatprep.mubr.bf16.mxu1 %v10760_v14  ;;  %v5473_v48 = vld [vmem:[%s10713_s1 + $0xfc] sm:$0xf]  ;;  %v9282_v18 = vld [vmem:[%s7309_s28 + $0x4c] sm:$0xf]  ;;  %v4558_v16 = vor.u32 %v4557_v15, %v9254_v39  ;;  %v4590_v42 = vshrl.u32 %v6589_v8, 16 }
 0x1ac   : > { %5838 = vst [vmem:[%s9104_s29 + $0x40] sm:$0xff] %v5806_v6  ;;  %v5807_v2 = vadd.f32 %v9092_v57, %v3376_v41  ;;  %v4593_v61 = vshll.u32 %v6589_v8, 16  ;;  %v10906_v6 = vld [vmem:[#allocation36_spill] sm:$0xff]  ;;  %v7160_v44 = vld [vmem:[%s7309_s28 + $0x24] sm:$0xff]   ;;  %v9294_v63 = vrot.slane %v4548_v59, 4  ;;  %v9296_v11 = vrot.slane %v4561_v26, 5 }
 0x1ad   : > { %v2152_v40 = vpop.f32.mrb[84].mxu0  ;;  %v3065_v4 = vpop.f32.mrb[84].mxu1  ;;  %v9298_v25 = vrot.slane %v4566_v19, 4  ;;  %v9300_v1 = vrot.slane %v4569_v34, 5  ;;  %v9302_v12 = vrot.slane %v4575_v58, 5  ;;  %v4599_v8 = vshll.u32 %v9282_v18, 16 }
 0x1ae   : > { %5839 = vst [vmem:[%s9104_s29 + $0x48] sm:$0xff] %v5807_v2  ;;  %v2271_v41 = vadd.f32 %v2152_v40, %v10906_v6  ;;  %v9291_v50 = vpop.f32.mrb[85].mxu0  ;;  %v3067_v15 = vpop.f32.mrb[85].mxu1  ;;  %v4603_v2 = vshrl.u32 %v9282_v18, 16  ;;  %v10909_v59 = vld [vmem:[#allocation37_spill] sm:$0xff]  ;;  %v4585_v58 = vshll.u32 %v9286_v36, 16  ;;  %v6706_v35 = vcombine.low %v5472_v55, %v5473_v48 }
 0x1af   : > { %10907 = vst [vmem:[#allocation2_spill] sm:$0xff] %v9291_v50  ;;  %v2156_v49 = vpop.f32.mrb[86].mxu0  ;;  %v9307_v6 = vadd.f32 %v3067_v15, %v8939_v23  ;;  %v3069_v26 = vpop.f32.mrb[86].mxu1  ;;  %v5474_v34 = vld [vmem:[%s10713_s1 + $0x13c] sm:$0xf]  ;;  %v4540_v48 = vsel %vm7386_vm2, %v9263_v62, %v9265_v13 }
 0x1b0   : > { %v3377_v40 = vadd.f32 %v3065_v4, %v2271_v41  ;;  %v2272_v50 = vadd.f32 %v2156_v49, %v10909_v59  ;;  %v9310_v19 = vpop.f32.mrb[87].mxu0  ;;  %v3071_v38 = vpop.f32.mrb[87].mxu1  ;;  %v5475_v23 = vld [vmem:[%s10713_s1 + $0x17c] sm:$0xf]  ;;  %v4581_v41 = vrot.slane %v4579_v53, 4  ;;  %v4592_v49 = vrot.slane %v4590_v42, 4 }
 0x1b1   : > { %10908 = vst [vmem:[#allocation35_spill] sm:$0xff] %v9307_v6  ;;  %10910 = vst [vmem:[#allocation34_spill] sm:$0xff] %v9310_v19  ;;  %v4595_v4 = vrot.slane %v4593_v61, 5  ;;  %v9322_v19 = vadd.f32 %v3071_v38, %v8950_v54  ;;  %v9324_v6 = vrot.slane %v4558_v16, 4  ;;  %v9327_v55 = vld [vmem:[%s7309_s28 + $0x50] sm:$0x1]  ;;  %v4572_v16 = vor.u32 %v9300_v1, %v9298_v25 }
 0x1b2   : > { %v5808_v15 = vadd.f32 %v9092_v57, %v3377_v40  ;;  %v3378_v59 = vadd.f32 %v3069_v26, %v2272_v50  ;;  %7022 = vmatmul.mubr.bf16.vlgmr.msra.gmra.mrb[192].mxu0 %v7160_v44  ;;  %5070 = vmatmul.mubr.bf16.vlgmr.msra.gmra.mrb[192].mxu1 %v6625_v22  ;;  %v9335_v54 = vrot.slane %v4599_v8, 5  ;;  %v4605_v38 = vrot.slane %v4603_v2, 4  ;;  %v6592_v53 = vld [vmem:[%s7309_s28 + $0x54] sm:$0xf]  ;;  %v9345_v62 = vld [vmem:[%s7309_s28 + $0x58] sm:$0xf] }
 0x1b3   : > { %10911 = vst [vmem:[#allocation36_spill] sm:$0xff] %v9322_v19  ;;  %7054 = vmatpush3.bf16.msra.mxu0 %v8914_v21  ;;  %7025 = vmatprep.mubr.bf16.mxu0 %v7161_v37  ;;  %v6707_v21 = vcombine.low %v5474_v34, %v5475_v23  ;;  %10912 = vst [vmem:[#allocation37_spill] sm:$0xff] %v9345_v62  ;;  %v7162_v42 = vld [vmem:[%s7309_s28 + $0x3c] sm:$0xff]   ;;  %v4582_v61 = vor.u32 %v4581_v41, %v9302_v12  ;;  %v9349_v8 = vrot.slane %v4585_v58, 5 }
 0x1b4   : > { %5840 = vst [vmem:[%s9104_s29 + $0x50] sm:$0xff] %v5808_v15  ;;  %v5809_v44 = vadd.f32 %v9092_v57, %v3378_v59  ;;  %5079 = vmatprep.mubr.bf16.mxu1 %v10760_v14  ;;  %7055 = vmatprep.subr.bf16.mxu0 %v6706_v35  ;;  %v4596_v37 = vor.u32 %v4595_v4, %v4592_v49  ;;  %v4609_v2 = vshll.u32 %v9327_v55, 16  ;;  %v10913_v40 = vld [vmem:[#allocation38_spill] sm:$0xff]  ;;  %v5476_v49 = vld [vmem:[%s10713_s1 + $0x1bc] sm:$0xf]  ;;  %v7163_v15 = vld [vmem:[%s7309_s28 + $0x48] sm:$0xff]  }
 0x1b5   : > { %v2162_v13 = vpop.f32.mrb[88].mxu0  ;;  %v3075_v34 = vpop.f32.mrb[88].mxu1  ;;  %v10915_v1 = vsel %vm7386_vm2, %v9249_v17, %v9217_v32  ;;  %v4554_v58 = vsel %vm7386_vm2, %v9294_v63, %v9254_v39  ;;  %v4564_v41 = vsel %vm7386_vm2, %v9324_v6, %v9296_v11  ;;  %v5477_v4 = vld [vmem:[%s10713_s1 + $0x1fc] sm:$0xf]  ;;  %v4606_v63 = vor.u32 %v4605_v38, %v9335_v54  ;;  %v9386_v22 = vld [vmem:[%s7309_s28 + $0x60] sm:$0xf] }
 0x1b6   : > { %5841 = vst [vmem:[%s9104_s29 + $0x58] sm:$0xff] %v5809_v44  ;;  %v2273_v26 = vadd.f32 %v2162_v13, %v10913_v40  ;;  %v9354_v23 = vpop.f32.mrb[89].mxu0  ;;  %v6626_v25 = vcombine.low %v10915_v1, %v4540_v48  ;;  %v3077_v17 = vpop.f32.mrb[89].mxu1  ;;  %v4614_v39 = vshrl.u32 %v6592_v53, 16  ;;  %v4617_v59 = vshll.u32 %v6592_v53, 16  ;;  %v10917_v44 = vld [vmem:[#allocation40_spill] sm:$0xff] }
 0x1b7   : > { %10914 = vst [vmem:[#allocation38_spill] sm:$0xff] %v9354_v23  ;;  %v2166_v32 = vpop.f32.mrb[90].mxu0  ;;  %7056 = vmatpush3.bf16.msra.mxu0 %v6706_v35  ;;  %v4623_v11 = vshll.u32 %v9345_v62, 16  ;;  %v9379_v48 = vadd.f32 %v3077_v17, %v8968_v27  ;;  %v3079_v40 = vpop.f32.mrb[90].mxu1  ;;  %v4627_v35 = vshrl.u32 %v9345_v62, 16  ;;  %v9388_v50 = vrot.slane %v4572_v16, 4 }
 0x1b8   : > { %v3379_v6 = vadd.f32 %v3075_v34, %v2273_v26  ;;  %v2274_v13 = vadd.f32 %v2166_v32, %v10917_v44  ;;  %v9382_v1 = vpop.f32.mrb[91].mxu0  ;;  %7057 = vmatprep.subr.bf16.mxu0 %v6707_v21  ;;  %v3081_v38 = vpop.f32.mrb[91].mxu1  ;;  %v9390_v53 = vrot.slane %v4582_v61, 4  ;;  %v6708_v23 = vcombine.low %v5476_v49, %v5477_v4  ;;  %v9395_v27 = vld [vmem:[%s7309_s28 + $0x5c] sm:$0x1]  ;;  %v11001_v0 = vld [vmem:[#allocation30_spill] sm:$0xff] }
 0x1b9   : > { %10916 = vst [vmem:[#allocation54_spill] sm:$0xff] %v9379_v48  ;;  %10918 = vst [vmem:[#allocation40_spill] sm:$0xff] %v9382_v1  ;;  %v9392_v26 = vrot.slane %v4596_v37, 4  ;;  %v9399_v32 = vadd.f32 %v3081_v38, %v8977_v45  ;;  %v9401_v44 = vrot.slane %v4609_v2, 5  ;;  %v5478_v16 = vld [vmem:[%s10713_s1 + $0x23c] sm:$0xf] }
 0x1ba   : > { %10919 = vst [vmem:[#allocation55_spill] sm:$0xff] %v9395_v27  ;;  %v5810_v34 = vadd.f32 %v9092_v57, %v3379_v6  ;;  %v3380_v17 = vadd.f32 %v3079_v40, %v2274_v13  ;;  %7026 = vmatmul.mubr.bf16.gmra.mrb[196].mxu0 %v7162_v42  ;;  %v5479_v61 = vld [vmem:[%s10713_s1 + $0x27c] sm:$0xf]  ;;  %5080 = vmatmul.mubr.bf16.gmra.mrb[196].mxu1 %v6626_v25  ;;  %v9409_v37 = vrot.slane %v4606_v63, 4  ;;  %v4616_v49 = vrot.slane %v4614_v39, 4  ;;  %v7164_v2 = vld [vmem:[%s7309_s28 + $0x54] sm:$0xff]  }
 0x1bb   : > { %10920 = vst [vmem:[#allocation56_spill] sm:$0xff] %v9399_v32  ;;  %7029 = vmatprep.mubr.bf16.mxu0 %v7163_v15  ;;  %v4619_v4 = vrot.slane %v4617_v59, 5  ;;  %v4638_v45 = vshrl.u32 %v9386_v22, 16  ;;  %5089 = vmatprep.mubr.bf16.mxu1 %v10760_v14  ;;  %v9416_v6 = vrot.slane %v4623_v11, 5  ;;  %v9418_v13 = vrot.slane %v4627_v35, 4  ;;  %v10921_v11 = vld [vmem:[#allocation42_spill] sm:$0xff] }
 0x1bc   : > { %5842 = vst [vmem:[%s9104_s29 + $0x60] sm:$0xff] %v5810_v34  ;;  %v5811_v42 = vadd.f32 %v9092_v57, %v3380_v17  ;;  %7058 = vmatpush3.bf16.msra.mxu0 %v6707_v21  ;;  %v4633_v25 = vshll.u32 %v9395_v27, 16  ;;  %v9422_v15 = vld [vmem:[%s7309_s28 + $0x64] sm:$0xf]  ;;  %v6709_v39 = vcombine.low %v5478_v16, %v5479_v61  ;;  %v5480_v59 = vld [vmem:[%s10713_s1 + $0x2bc] sm:$0xf]  ;;  %v6627_v17 = vcombine.low %v4554_v58, %v4564_v41 }
 0x1bd   : > { %v2172_v63 = vpop.f32.mrb[92].mxu0  ;;  %7059 = vmatprep.subr.bf16.mxu0 %v6708_v23  ;;  %v4641_v40 = vshll.u32 %v9386_v22, 16  ;;  %v6598_v21 = vld [vmem:[%s7309_s28 + $0x6c] sm:$0xf]  ;;  %v3085_v38 = vpop.f32.mrb[92].mxu1  ;;  %v4578_v32 = vsel %vm7386_vm2, %v9388_v50, %v9302_v12  ;;  %v4588_v16 = vsel %vm7386_vm2, %v9390_v53, %v9349_v8  ;;  %v4620_v58 = vor.u32 %v4619_v4, %v4616_v49  ;;  %v10923_v8 = vld [vmem:[#allocation45_spill] sm:$0xff] }
 0x1be   : > { %5843 = vst [vmem:[%s9104_s29 + $0x68] sm:$0xff] %v5811_v42  ;;  %v2275_v35 = vadd.f32 %v2172_v63, %v10921_v11  ;;  %v9431_v34 = vpop.f32.mrb[93].mxu0  ;;  %v5481_v22 = vld [vmem:[%s10713_s1 + $0x2fc] sm:$0xf]  ;;  %v9445_v61 = vld [vmem:[%s7309_s28 + $0x70] sm:$0xf] }
 0x1bf   : > { %10922 = vst [vmem:[#allocation42_spill] sm:$0xff] %v9431_v34  ;;  %v3087_v42 = vpop.f32.mrb[93].mxu1  ;;  %v2176_v63 = vpop.f32.mrb[94].mxu0  ;;  %v7165_v11 = vld [vmem:[%s7309_s28 + $0x60] sm:$0xff]   ;;  %v9448_v41 = vrot.slane %v4638_v45, 4  ;;  %v4647_v34 = vshll.u32 %v9422_v15, 16  ;;  %v6710_v49 = vcombine.low %v5480_v59, %v5481_v22  ;;  %v6628_v22 = vcombine.low %v4578_v32, %v4588_v16 }
 0x1c0   : > { %v4651_v12 = vshrl.u32 %v9422_v15, 16  ;;  %v3381_v50 = vadd.f32 %v3085_v38, %v2275_v35  ;;  %v9453_v1 = vadd.f32 %v3087_v42, %v8965_v56  ;;  %v2276_v53 = vadd.f32 %v2176_v63, %v10923_v8  ;;  %v3089_v48 = vpop.f32.mrb[94].mxu1  ;;  %v9456_v19 = vpop.f32.mrb[95].mxu0  ;;  %7060 = vmatpush3.bf16.msra.mxu0 %v6708_v23  ;;  %v5482_v59 = vld [vmem:[%s10713_s1 + $0x33c] sm:$0xf] }
 0x1c1   : > { %10924 = vst [vmem:[#allocation45_spill] sm:$0xff] %v9456_v19  ;;  %v4662_v27 = vshrl.u32 %v6598_v21, 16  ;;  %v3091_v62 = vpop.f32.mrb[95].mxu1  ;;  %7061 = vmatprep.subr.bf16.mxu0 %v6709_v39  ;;  %v4665_v4 = vshll.u32 %v6598_v21, 16  ;;  %v4671_v45 = vshll.u32 %v9445_v61, 16  ;;  %v4675_v35 = vshrl.u32 %v9445_v61, 16 }
 0x1c2   : > { %v5812_v56 = vadd.f32 %v9092_v57, %v3381_v50  ;;  %v3382_v38 = vadd.f32 %v3089_v48, %v2276_v53  ;;  %v9462_v42 = vadd.f32 %v3091_v62, %v8974_v60  ;;  %7030 = vmatmul.mubr.bf16.gmra.mrb[200].mxu0 %v7164_v2  ;;  %v4643_v23 = vrot.slane %v4641_v40, 5  ;;  %v5483_v21 = vld [vmem:[%s10713_s1 + $0x37c] sm:$0xf]  ;;  %5090 = vmatmul.mubr.bf16.gmra.mrb[200].mxu1 %v6627_v17  ;;  %v9477_v2 = vld [vmem:[%s7309_s28 + $0x68] sm:$0x1]  ;;  %v7166_v17 = vld [vmem:[%s7309_s28 + $0x6c] sm:$0xff]  }
 0x1c3   : > { %7033 = vmatprep.mubr.bf16.mxu0 %v7165_v11  ;;  %v9470_v48 = vrot.slane %v4620_v58, 4  ;;  %v4630_v60 = vor.u32 %v9418_v13, %v9416_v6  ;;  %v9474_v62 = vrot.slane %v4633_v25, 5  ;;  %5099 = vmatprep.mubr.bf16.mxu1 %v10760_v14  ;;  %v9483_v63 = vrot.slane %v4647_v34, 5  ;;  %v6601_v11 = vld [vmem:[%s7309_s28 + $0x78] sm:$0xf] }
 0x1c4   : > { %10925 = vst [vmem:[#allocation57_spill] sm:$0xff] %v9462_v42  ;;  %5844 = vst [vmem:[%s9104_s29 + $0x70] sm:$0xff] %v5812_v56  ;;  %v5813_v40 = vadd.f32 %v9092_v57, %v3382_v38  ;;  %7062 = vmatpush3.bf16.msra.mxu0 %v6709_v39  ;;  %v4653_v32 = vrot.slane %v4651_v12, 4  ;;  %v4664_v16 = vrot.slane %v4662_v27, 4  ;;  %v7167_v13 = vld [vmem:[%s7309_s28 + $0x78] sm:$0xff]   ;;  %v6711_v25 = vcombine.low %v5482_v59, %v5483_v21 }
 0x1c5   : > { %v2182_v58 = vpop.f32.mrb[96].mxu0  ;;  %7063 = vmatprep.subr.bf16.mxu0 %v6710_v49  ;;  %v9488_v50 = vld [vmem:[%s7309_s28 + $0x74] sm:$0x1]  ;;  %v4667_v8 = vrot.slane %v4665_v4, 5  ;;  %v9490_v53 = vrot.slane %v4671_v45, 5  ;;  %v4677_v56 = vrot.slane %v4675_v35, 4  ;;  %v4602_v27 = vsel %vm7386_vm2, %v9392_v26, %v9335_v54 }
 0x1c6   : > { %5845 = vst [vmem:[%s9104_s29 + $0x78] sm:$0xff] %v5813_v40  ;;  %v2277_v38 = vadd.f32 %v2182_v58, %v8864_v7  ;;  %v3095_v42 = vpop.f32.mrb[96].mxu1  ;;  %v9494_v39 = vpop.f32.mrb[97].mxu0  ;;  %v4612_v34 = vsel %vm7386_vm2, %v9409_v37, %v9401_v44  ;;  %v4644_v12 = vor.u32 %v4643_v23, %v9448_v41  ;;  %v5484_v4 = vld [vmem:[%s10713_s1 + $0x3bc] sm:$0xf]  ;;  %v9511_v59 = vrot.slane %v4630_v60, 4 }
 0x1c7   : > { %10926 = vst [vmem:[#allocation58_spill] sm:$0xff] %v9494_v39  ;;  %v5485_v7 = vld [vmem:[%s10713_s1 + $0x3fc] sm:$0xf]  ;;  %v3097_v45 = vpop.f32.mrb[97].mxu1  ;;  %v2186_v35 = vpop.f32.mrb[98].mxu0  ;;  %v4657_v54 = vshll.u32 %v9477_v2, 16  ;;  %v4654_v58 = vor.u32 %v4653_v32, %v9483_v63  ;;  %v4668_v60 = vor.u32 %v4667_v8, %v4664_v16  ;;  %v4678_v19 = vor.u32 %v4677_v56, %v9490_v53 }
 0x1c8   : > { %v4686_v26 = vshrl.u32 %v6601_v11, 16  ;;  %v4689_v21 = vshll.u32 %v6601_v11, 16  ;;  %v3383_v44 = vadd.f32 %v3095_v42, %v2277_v38  ;;  %v9515_v37 = vadd.f32 %v3097_v45, %v8991_v20  ;;  %v3099_v23 = vpop.f32.mrb[98].mxu1  ;;  %v9518_v40 = vpop.f32.mrb[99].mxu0  ;;  %7064 = vmatpush3.bf16.msra.mxu0 %v6710_v49  ;;  %v9524_v38 = vld [vmem:[%s7309_s28 + $0x7c] sm:$0xf] }
 0x1c9   : > { %v2278_v41 = vadd.f32 %v2186_v35, %v8888_v10  ;;  %v3101_v39 = vpop.f32.mrb[99].mxu1  ;;  %7065 = vmatprep.subr.bf16.mxu0 %v6711_v25  ;;  %v4681_v11 = vshll.u32 %v9488_v50, 16  ;;  %v6712_v42 = vcombine.low %v5484_v4, %v5485_v7  ;;  %v9530_v49 = vrot.slane %v4644_v12, 4 }
 0x1ca   : > { %v5814_v20 = vadd.f32 %v9092_v57, %v3383_v44  ;;  %v9528_v45 = vadd.f32 %v3101_v39, %v8999_v5  ;;  %7034 = vmatmul.mubr.bf16.gmra.mrb[204].mxu0 %v7166_v17  ;;  %5100 = vmatmul.mubr.bf16.gmra.mrb[204].mxu1 %v6628_v22  ;;  %v6629_v32 = vcombine.low %v4602_v27, %v4612_v34  ;;  %v5360_v16 = vrot.slane %v9149_v46, 5  ;;  %v6657_v22 = vld [vmem:[%s7309_s28 + $0x18] sm:$0xe]  ;;  %v7168_v39 = vld [vmem:[%s7309_s28 + $0x84] sm:$0xff]  }
 0x1cb   : > { %v3384_v10 = vadd.f32 %v3099_v23, %v2278_v41  ;;  %7037 = vmatprep.mubr.bf16.mxu0 %v7167_v13  ;;  %v9533_v8 = vrot.slane %v4686_v26, 4  ;;  %v9535_v56 = vrot.slane %v4689_v21, 5  ;;  %5109 = vmatprep.mubr.bf16.mxu1 %v10760_v14  ;;  %v9540_v5 = vrot.slane %v4654_v58, 4  ;;  %v9572_v44 = vld [vmem:[%s7309_s28 + $0x88] sm:$0xf]  ;;  %v7169_v58 = vld [vmem:[%s7309_s28 + $0x90] sm:$0xff]  }
 0x1cc   : > { %5846 = vst [vmem:[%s9104_s29 + $0x80] sm:$0xff] %v5814_v20  ;;  %v9542_v17 = vrot.slane %v4657_v54, 5  ;;  %7066 = vmatpush3.bf16.msra.mxu0 %v6711_v25  ;;  %v4695_v13 = vshll.u32 %v9524_v38, 16  ;;  %v9547_v27 = vrot.slane %v4668_v60, 4  ;;  %v9549_v34 = vrot.slane %v4678_v19, 4 }
 0x1cd   : > { %v5815_v4 = vadd.f32 %v9092_v57, %v3384_v10  ;;  %v2192_v46 = vpop.f32.mrb[100].mxu0  ;;  %v9551_v12 = vrot.slane %v4681_v11, 5  ;;  %7067 = vmatprep.subr.bf16.mxu0 %v6712_v42  ;;  %v4699_v7 = vshrl.u32 %v9524_v38, 16  ;;  %v3105_v35 = vpop.f32.mrb[100].mxu1  ;;  %v4626_v26 = vsel %vm7386_vm2, %v9470_v48, %v9416_v6 }
 0x1ce   : > { %v2279_v25 = vadd.f32 %v2192_v46, %v8912_v47  ;;  %v9556_v54 = vpop.f32.mrb[101].mxu0  ;;  %v4636_v19 = vsel %vm7386_vm2, %v9511_v59, %v9474_v62  ;;  %v4650_v21 = vsel %vm7386_vm2, %v9530_v49, %v9483_v63  ;;  %v6604_v47 = vld [vmem:[%s7309_s28 + $0x84] sm:$0xf]  ;;  %v3107_v41 = vpop.f32.mrb[101].mxu1  ;;  %v6673_v60 = vrot.slane %v6657_v22, 9 }
 0x1cf   : > { %5847 = vst [vmem:[%s9104_s29 + $0x88] sm:$0xff] %v5815_v4  ;;  %10927 = vst [vmem:[#allocation59_spill] sm:$0xff] %v9556_v54  ;;  %v2196_v23 = vpop.f32.mrb[102].mxu0  ;;  %v5362_v11 = vrot.slane %v5360_v16, 4  ;;  %v5363_v6 = vrot.slane %v9178_v28, 5  ;;  %v4692_v48 = vor.u32 %v9535_v56, %v9533_v8  ;;  %v9579_v59 = vadd.f32 %v3107_v41, %v8988_v24  ;;  %v3109_v20 = vpop.f32.mrb[102].mxu1 }
 0x1d0   : > { %v3385_v62 = vadd.f32 %v3105_v35, %v2279_v25  ;;  %v2280_v63 = vadd.f32 %v2196_v23, %v8923_v31  ;;  %v9582_v10 = vpop.f32.mrb[103].mxu0  ;;  %7068 = vmatpush3.bf16.msra.mxu0 %v6712_v42  ;;  %v9585_v49 = vld [vmem:[%s7309_s28 + $0x80] sm:$0x1]  ;;  %v9587_v4 = vrot.slane %v4695_v13, 5  ;;  %v3111_v22 = vpop.f32.mrb[103].mxu1  ;;  %v4701_v28 = vrot.slane %v4699_v7, 4 }
 0x1d1   : > { %v4710_v46 = vshrl.u32 %v6604_v47, 16  ;;  %v4713_v54 = vshll.u32 %v6604_v47, 16  ;;  %v4719_v8 = vshll.u32 %v9572_v44, 16  ;;  %v9592_v31 = vadd.f32 %v3111_v22, %v8996_v33 }
 0x1d2   : > { %v5816_v24 = vadd.f32 %v9092_v57, %v3385_v62  ;;  %v3386_v56 = vadd.f32 %v3109_v20, %v2280_v63  ;;  %7038 = vmatmul.mubr.bf16.gmra.mrb[208].mxu0 %v7168_v39  ;;  %v4723_v42 = vshrl.u32 %v9572_v44, 16  ;;  %v10928_v13 = vrot.slane %v9186_v52, 5  ;;  %5110 = vmatmul.mubr.bf16.gmra.mrb[208].mxu1 %v6629_v32  ;;  %v7171_v63 = vld [vmem:[%s7309_s28 + $0xa8] sm:$0xff]  }
 0x1d3   : > { %7041 = vmatprep.mubr.bf16.mxu0 %v7169_v58  ;;  %v4660_v7 = vsel %vm7386_vm2, %v9540_v5, %v9542_v17  ;;  %v4674_v33 = vsel %vm7386_vm2, %v9547_v27, %v9490_v53  ;;  %v4684_v39 = vsel %vm7386_vm2, %v9549_v34, %v9551_v12  ;;  %5119 = vmatprep.mubr.bf16.mxu1 %v10760_v14  ;;  %v4705_v53 = vshll.u32 %v9585_v49, 16  ;;  %v6658_v17 = vld [vmem:[%s7309_s28 + $0x24] sm:$0xe]  ;;  %v7170_v58 = vld [vmem:[%s7309_s28 + $0x9c] sm:$0xff]  }
 0x1d4   : > { %v9597_v25 = vrot.slane %v10928_v13, 4  ;;  %5848 = vst [vmem:[%s9104_s29 + $0x90] sm:$0xff] %v5816_v24  ;;  %v5817_v32 = vadd.f32 %v9092_v57, %v3386_v56  ;;  %v9616_v35 = vsel %vm7746_vm5, %v6673_v60, %v5360_v16  ;;  %v9620_v5 = vsel %vm7746_vm5, %v5362_v11, %v5363_v6  ;;  %v6659_v24 = vld [vmem:[%s7309_s28 + $0x30] sm:$0xe]  ;;  %v9650_v56 = vld [vmem:[%s7309_s28 + $0x8c] sm:$0x1] }
 0x1d5   : > { %v2202_v27 = vpop.f32.mrb[104].mxu0  ;;  %v9624_v34 = vrot.slane %v4692_v48, 4  ;;  %v4702_v12 = vor.u32 %v4701_v28, %v9587_v4  ;;  %v4712_v57 = vrot.slane %v4710_v46, 4  ;;  %v4715_v47 = vrot.slane %v4713_v54, 5  ;;  %v3115_v16 = vpop.f32.mrb[104].mxu1 }
 0x1d6   : > { %5849 = vst [vmem:[%s9104_s29 + $0x98] sm:$0xff] %v5817_v32  ;;  %v2281_v41 = vadd.f32 %v2202_v27, %v8936_v43  ;;  %v9629_v23 = vpop.f32.mrb[105].mxu0  ;;  %v6630_v60 = vcombine.low %v4626_v26, %v4636_v19  ;;  %v9632_v11 = vrot.slane %v4719_v8, 5  ;;  %v4725_v6 = vrot.slane %v4723_v42, 4  ;;  %v3117_v62 = vpop.f32.mrb[105].mxu1  ;;  %v10931_v32 = vld [vmem:[#allocation52_spill] sm:$0xff] }
 0x1d7   : > { %v2206_v48 = vpop.f32.mrb[106].mxu0  ;;  %v9635_v20 = vcombine.low %v4650_v21, %v4660_v7  ;;  %v9637_v22 = vcombine.low %v4674_v33, %v4684_v39  ;;  %v6674_v54 = vrot.slane %v6658_v17, 9  ;;  %v5374_v43 = vrot.slane %v9214_v3, 5  ;;  %v3119_v19 = vpop.f32.mrb[106].mxu1  ;;  %v9663_v7 = vld [vmem:[%s10714_s2] ss:$0 sm:$0xff] }
 0x1d8   : > { %v3387_v28 = vadd.f32 %v3115_v16, %v2281_v41  ;;  %v9641_v46 = vadd.f32 %v3117_v62, %v9014_v30  ;;  %v2282_v26 = vadd.f32 %v2206_v48, %v8945_v51  ;;  %v9644_v8 = vpop.f32.mrb[107].mxu0  ;;  %v3121_v42 = vpop.f32.mrb[107].mxu1  ;;  %v9656_v3 = vrot.slane %v4702_v12, 4  ;;  %v9671_v12 = vld [vmem:[%s7309_s28 + $0x3c] sm:$0xe]  ;;  %v10933_v41 = vld [vmem:[#allocation27_spill] sm:$0xff] }
 0x1d9   : > { %10930 = vst [vmem:[#allocation61_spill] sm:$0xff] %v9644_v8  ;;  %v9658_v51 = vrot.slane %v4705_v53, 5  ;;  %v4716_v13 = vor.u32 %v4715_v47, %v4712_v57  ;;  %v9667_v17 = vadd.f32 %v3121_v42, %v10931_v32  ;;  %v4726_v27 = vor.u32 %v4725_v6, %v9632_v11  ;;  %v6607_v53 = vld [vmem:[%s7309_s28 + $0x90] sm:$0xf] }
 0x1da   : > { %10929 = vst [vmem:[#allocation60_spill] sm:$0xff] %v9641_v46  ;;  %v5818_v33 = vadd.f32 %v9663_v7, %v3387_v28  ;;  %v3388_v39 = vadd.f32 %v3119_v19, %v2282_v26  ;;  %7042 = vmatmul.mubr.bf16.gmra.mrb[212].mxu0 %v7170_v58  ;;  %5120 = vmatmul.mubr.bf16.gmra.mrb[212].mxu1 %v6630_v60  ;;  %v6675_v57 = vrot.slane %v6659_v24, 9  ;;  %v5376_v47 = vrot.slane %v5374_v43, 4  ;;  %v7172_v58 = vld [vmem:[%s7309_s28 + $0xb4] sm:$0xff]   ;;  %v10936_v26 = vld [vmem:[#allocation31_spill] sm:$0xff] }
 0x1db   : > { %10932 = vst [vmem:[#allocation52_spill] sm:$0xff] %v9667_v17  ;;  %7045 = vmatprep.mubr.bf16.mxu0 %v7171_v63  ;;  %v5377_v16 = vrot.slane %v10933_v41, 5  ;;  %v4729_v62 = vshll.u32 %v9650_v56, 16  ;;  %5129 = vmatprep.mubr.bf16.mxu1 %v10760_v14  ;;  %v10934_v6 = vrot.slane %v9186_v52, 5  ;;  %v10935_v63 = vrot.slane %v9223_v29, 5 }
 0x1dc   : > { %5850 = vst [vmem:[%s9104_s29 + $0xa0] sm:$0xff] %v5818_v33  ;;  %v5819_v48 = vadd.f32 %v9663_v7, %v3388_v39  ;;  %v5381_v19 = vrot.slane %v10936_v26, 5  ;;  %v4708_v42 = vsel %vm7386_vm2, %v9656_v3, %v9658_v51  ;;  %v6676_v52 = vrot.slane %v9671_v12, 9  ;;  %v9700_v33 = vld [vmem:[%s7309_s28 + $0x94] sm:$0xf] }
 0x1dd   : > { %v9684_v60 = vsel %vm7746_vm5, %v6674_v54, %v10934_v6  ;;  %v9691_v28 = vsel %vm7746_vm5, %v9597_v25, %v10935_v63  ;;  %v2212_v24 = vpop.f32.mrb[108].mxu0  ;;  %v4734_v54 = vshrl.u32 %v6607_v53, 16  ;;  %v4737_v29 = vshll.u32 %v6607_v53, 16  ;;  %v10937_v39 = vld [vmem:[#allocation48_spill] sm:$0xff]  ;;  %v3125_v25 = vpop.f32.mrb[108].mxu1  ;;  %v7173_v6 = vld [vmem:[%s7309_s28 + $0xc0] sm:$0xff]  }
 0x1de   : > { %5851 = vst [vmem:[%s9104_s29 + $0xa8] sm:$0xff] %v5819_v48  ;;  %v2283_v32 = vadd.f32 %v2212_v24, %v10937_v39  ;;  %v9704_v41 = vpop.f32.mrb[109].mxu0  ;;  %v9707_v63 = vrot.slane %v4716_v13, 4  ;;  %v9709_v26 = vrot.slane %v4726_v27, 4  ;;  %v5384_v3 = vrot.slane %v9286_v36, 5  ;;  %v3127_v51 = vpop.f32.mrb[109].mxu1 }
 0x1df   : > { %10938 = vst [vmem:[#allocation27_spill] sm:$0xff] %v9704_v41  ;;  %v2216_v12 = vpop.f32.mrb[110].mxu0  ;;  %v9714_v21 = vsel %vm7746_vm5, %v6675_v57, %v5374_v43  ;;  %v9718_v53 = vsel %vm7746_vm5, %v5376_v47, %v5377_v16  ;;  %v9720_v48 = vrot.slane %v4729_v62, 5  ;;  %v6661_v24 = vld [vmem:[%s7309_s28 + $0x48] sm:$0xe]  ;;  %v5388_v13 = vrot.slane %v9282_v18, 5 }
 0x1e0   : > { %v3389_v39 = vadd.f32 %v3125_v25, %v2283_v32  ;;  %v10939_v27 = vld [vmem:[#allocation4_spill] sm:$0xff]  ;;  %v10940_v36 = vld [vmem:[#allocation49_spill] sm:$0xff]  ;;  %v3129_v17 = vpop.f32.mrb[110].mxu1  ;;  %v9728_v8 = vpop.f32.mrb[111].mxu0  ;;  %v5383_v43 = vrot.slane %v5381_v19, 4  ;;  %v4736_v46 = vrot.slane %v4734_v54, 4  ;;  %v10944_v54 = vsel %vm7386_vm2, %v9624_v34, %v9587_v4 }
 0x1e1   : > { %v9725_v30 = vadd.f32 %v3127_v51, %v10939_v27  ;;  %v2284_v41 = vadd.f32 %v2216_v12, %v10940_v36  ;;  %10941 = vst [vmem:[#allocation31_spill] sm:$0xff] %v9728_v8  ;;  %v3131_v57 = vpop.f32.mrb[111].mxu1  ;;  %v4739_v47 = vrot.slane %v4737_v29, 5  ;;  %v4743_v16 = vshll.u32 %v9700_v33, 16  ;;  %v10942_v25 = vld [vmem:[#allocation41_spill] sm:$0xff] }
 0x1e2   : > { %v4747_v62 = vshrl.u32 %v9700_v33, 16  ;;  %v5820_v18 = vadd.f32 %v9663_v7, %v3389_v39  ;;  %v9734_v51 = vadd.f32 %v3131_v57, %v10942_v25  ;;  %7046 = vmatmul.mubr.bf16.gmra.mrb[216].mxu0 %v7172_v58  ;;  %v6677_v12 = vrot.slane %v6661_v24, 9  ;;  %5130 = vmatmul.mubr.bf16.gmra.mrb[216].mxu1 %v9635_v20  ;;  %v7174_v24 = vld [vmem:[%s7309_s28 + $0xcc] sm:$0xff]   ;;  %v10946_v25 = vld [vmem:[#allocation50_spill] sm:$0xff] }
 0x1e3   : > { %v3390_v32 = vadd.f32 %v3129_v17, %v2284_v41  ;;  %7049 = vmatprep.mubr.bf16.mxu0 %v7173_v6  ;;  %v9742_v29 = vcombine.low %v10944_v54, %v4708_v42  ;;  %v5390_v41 = vrot.slane %v5388_v13, 4  ;;  %v5391_v39 = vrot.slane %v9327_v55, 5  ;;  %5139 = vmatprep.mubr.bf16.mxu1 %v10760_v14  ;;  %v9761_v42 = vld [vmem:[%s7309_s28 + $0x98] sm:$0x1]  ;;  %v6662_v55 = vld [vmem:[%s7309_s28 + $0x54] sm:$0xe] }
 0x1e4   : > { %10943 = vst [vmem:[#allocation48_spill] sm:$0xff] %v9734_v51  ;;  %5852 = vst [vmem:[%s9104_s29 + $0xb0] sm:$0xff] %v5820_v18  ;;  %v4722_v4 = vsel %vm7386_vm2, %v9707_v63, %v9632_v11  ;;  %v9758_v34 = vsel %vm7746_vm5, %v6676_v52, %v5381_v19  ;;  %v4740_v27 = vor.u32 %v4739_v47, %v4736_v46  ;;  %v9765_v36 = vrot.slane %v4743_v16, 5  ;;  %v10945_v18 = vld [vmem:[#allocation37_spill] sm:$0xff]  ;;  %v6663_v47 = vld [vmem:[%s7309_s28 + $0x60] sm:$0xe] }
 0x1e5   : > { %v5821_v58 = vadd.f32 %v9663_v7, %v3390_v32  ;;  %v2222_v6 = vpop.f32.mrb[112].mxu0  ;;  %v4749_v57 = vrot.slane %v4747_v62, 4  ;;  %v5395_v32 = vrot.slane %v10945_v18, 5  ;;  %v3135_v63 = vpop.f32.mrb[112].mxu1  ;;  %v4732_v19 = vsel %vm7386_vm2, %v9709_v26, %v9720_v48  ;;  %v6610_v16 = vld [vmem:[%s7309_s28 + $0x9c] sm:$0xf] }
 0x1e6   : > { %v2285_v11 = vadd.f32 %v2222_v6, %v10946_v25  ;;  %v9770_v54 = vpop.f32.mrb[113].mxu0  ;;  %v9778_v52 = vsel %vm7746_vm5, %v5383_v43, %v5384_v3  ;;  %v9782_v46 = vsel %vm7746_vm5, %v6677_v12, %v5388_v13  ;;  %v3137_v62 = vpop.f32.mrb[113].mxu1  ;;  %v9788_v6 = vsel %vm7746_vm5, %v5390_v41, %v5391_v39  ;;  %v10948_v43 = vld [vmem:[#allocation8_spill] sm:$0xff]  ;;  %v10950_v20 = vld [vmem:[#allocation51_spill] sm:$0xff]  ;;  %v9800_v8 = vld [vmem:[%s7309_s28 + $0xa0] sm:$0xf] }
 0x1e7   : > { %5853 = vst [vmem:[%s9104_s29 + $0xb8] sm:$0xff] %v5821_v58  ;;  %10947 = vst [vmem:[#allocation4_spill] sm:$0xff] %v9770_v54  ;;  %v2226_v58 = vpop.f32.mrb[114].mxu0  ;;  %v4753_v18 = vshll.u32 %v9761_v42, 16  ;;  %v6678_v26 = vrot.slane %v6662_v55, 9  ;;  %v5402_v48 = vrot.slane %v9422_v15, 5  ;;  %v9793_v25 = vadd.f32 %v3137_v62, %v10948_v43 }
 0x1e8   : > { %v3391_v3 = vadd.f32 %v3135_v63, %v2285_v11  ;;  %v2286_v13 = vadd.f32 %v2226_v58, %v10950_v20  ;;  %v3139_v12 = vpop.f32.mrb[114].mxu1  ;;  %v9796_v17 = vpop.f32.mrb[115].mxu0  ;;  %v10952_v54 = vld [vmem:[#allocation55_spill] sm:$0xff]  ;;  %v9802_v39 = vrot.slane %v4740_v27, 4  ;;  %v4750_v55 = vor.u32 %v4749_v57, %v9765_v36  ;;  %v10953_v43 = vld [vmem:[#allocation6_spill] sm:$0xff] }
 0x1e9   : > { %10949 = vst [vmem:[#allocation49_spill] sm:$0xff] %v9793_v25  ;;  %10951 = vst [vmem:[#allocation41_spill] sm:$0xff] %v9796_v17  ;;  %v5398_v51 = vrot.slane %v10952_v54, 5  ;;  %v3141_v41 = vpop.f32.mrb[115].mxu1  ;;  %v5397_v15 = vrot.slane %v5395_v32, 4  ;;  %v6679_v11 = vrot.slane %v6663_v47, 9  ;;  %v10955_v54 = vcombine.low %v9616_v35, %v9620_v5 }
 0x1ea   : > { %v5822_v63 = vadd.f32 %v9663_v7, %v3391_v3  ;;  %v3392_v62 = vadd.f32 %v3139_v12, %v2286_v13  ;;  %v9807_v20 = vadd.f32 %v3141_v41, %v10953_v43  ;;  %7050 = vmatmul.mubr.bf16.gmra.mrb[220].mxu0 %v7174_v24  ;;  %v5405_v58 = vrot.slane %v9477_v2, 5  ;;  %5140 = vmatmul.mubr.bf16.gmra.mrb[220].mxu1 %v9637_v22  ;;  %v10956_v41 = vld [vmem:[#allocation3_spill] sm:$0xff] }
 0x1eb   : > { %7069 = vmatprep.mubr.bf16.mxu0 %v10955_v54  ;;  %v5404_v27 = vrot.slane %v5402_v48, 4  ;;  %v4758_v57 = vshrl.u32 %v6610_v16, 16  ;;  %v4761_v17 = vshll.u32 %v6610_v16, 16  ;;  %v4767_v47 = vshll.u32 %v9800_v8, 16  ;;  %5149 = vmatprep.mubr.bf16.mxu1 %v10760_v14  ;;  %v10960_v22 = vld [vmem:[#allocation39_spill] sm:$0xff] }
 0x1ec   : > { %10954 = vst [vmem:[#allocation37_spill] sm:$0xff] %v9807_v20  ;;  %5854 = vst [vmem:[%s9104_s29 + $0xc0] sm:$0xff] %v5822_v63  ;;  %v5823_v3 = vadd.f32 %v9663_v7, %v3392_v62  ;;  %v9818_v24 = vcombine.low %v4722_v4, %v4732_v19  ;;  %v4771_v35 = vshrl.u32 %v9800_v8, 16  ;;  %v4751_v16 = vrot.slane %v4750_v55, 4  ;;  %v6613_v20 = vld [vmem:[%s7309_s28 + $0xa8] sm:$0xf] }
 0x1ed   : > { %v2232_v5 = vpop.f32.mrb[116].mxu0  ;;  %v4755_v13 = vrot.slane %v4753_v18, 5  ;;  %v9827_v12 = vsel %vm7746_vm5, %v6678_v26, %v5395_v32  ;;  %v3145_v19 = vpop.f32.mrb[116].mxu1  ;;  %v4746_v62 = vsel %vm7386_vm2, %v9802_v39, %v9765_v36  ;;  %v9839_v43 = vsel %vm7746_vm5, %v5397_v15, %v5398_v51  ;;  %v9846_v18 = vld [vmem:[%s7309_s28 + $0xa4] sm:$0x1]  ;;  %v10958_v15 = vld [vmem:[#allocation7_spill] sm:$0xff] }
 0x1ee   : > { %5855 = vst [vmem:[%s9104_s29 + $0xc8] sm:$0xff] %v5823_v3  ;;  %v2287_v4 = vadd.f32 %v2232_v5, %v10956_v41  ;;  %v9831_v63 = vpop.f32.mrb[117].mxu0  ;;  %v9843_v32 = vsel %vm7746_vm5, %v6679_v11, %v5402_v48  ;;  %v6664_v26 = vld [vmem:[%s7309_s28 + $0x6c] sm:$0xe]  ;;  %v3147_v55 = vpop.f32.mrb[117].mxu1  ;;  %v9851_v3 = vsel %vm7746_vm5, %v5404_v27, %v5405_v58  ;;  %v4760_v5 = vrot.slane %v4758_v57, 4 }
 0x1ef   : > { %10957 = vst [vmem:[#allocation50_spill] sm:$0xff] %v9831_v63  ;;  %v2236_v54 = vpop.f32.mrb[118].mxu0  ;;  %v4763_v36 = vrot.slane %v4761_v17, 5  ;;  %v9853_v39 = vrot.slane %v4767_v47, 5  ;;  %v9856_v41 = vadd.f32 %v3147_v55, %v10958_v15  ;;  %v3149_v11 = vpop.f32.mrb[118].mxu1  ;;  %v4773_v63 = vrot.slane %v4771_v35, 4 }
 0x1f0   : > { %v3393_v51 = vadd.f32 %v3145_v19, %v2287_v4  ;;  %v2288_v48 = vadd.f32 %v2236_v54, %v10960_v22  ;;  %v9859_v2 = vpop.f32.mrb[119].mxu0  ;;  %v3151_v25 = vpop.f32.mrb[119].mxu1  ;;  %v4756_v58 = vsel %vm7386_vm2, %v4751_v16, %v4755_v13  ;;  %v4777_v27 = vshll.u32 %v9846_v18, 16  ;;  %v10962_v4 = vld [vmem:[#allocation47_spill] sm:$0xff]  ;;  %v6665_v54 = vld [vmem:[%s7309_s28 + $0x78] sm:$0xe] }
 0x1f1   : > { %10959 = vst [vmem:[#allocation8_spill] sm:$0xff] %v9856_v41  ;;  %10961 = vst [vmem:[#allocation51_spill] sm:$0xff] %v9859_v2  ;;  %v6680_v57 = vrot.slane %v6664_v26, 9  ;;  %v9869_v19 = vadd.f32 %v3151_v25, %v10962_v4  ;;  %v10964_v35 = vcombine.low %v9684_v60, %v9691_v28  ;;  %v5409_v55 = vrot.slane %v9445_v61, 5  ;;  %v9876_v16 = vld [vmem:[%s7309_s28 + $0xac] sm:$0xf] }
 0x1f2   : > { %v5824_v47 = vadd.f32 %v9663_v7, %v3393_v51  ;;  %v3394_v22 = vadd.f32 %v3149_v11, %v2288_v48  ;;  %5150 = vmatmul.mubr.bf16.gmra.mrb[224].mxu1 %v9742_v29  ;;  %v10965_v13 = vcombine.low %v9714_v21, %v9718_v53  ;;  %v4764_v25 = vor.u32 %v4763_v36, %v4760_v5  ;;  %v10966_v48 = vld [vmem:[#allocation5_spill] sm:$0xff]  ;;  %v10969_v17 = vld [vmem:[#allocation44_spill] sm:$0xff] }
 0x1f3   : > { %10963 = vst [vmem:[#allocation55_spill] sm:$0xff] %v9869_v19  ;;  %7070 = vmatmul.mubr.bf16.vlgmr.msra.gmra.mrb[224].mxu0 %v10964_v35  ;;  %v4782_v51 = vshrl.u32 %v6613_v20, 16  ;;  %v4785_v15 = vshll.u32 %v6613_v20, 16  ;;  %5159 = vmatprep.mubr.bf16.mxu1 %v10760_v14  ;;  %v9888_v61 = vcombine.low %v4746_v62, %v4756_v58  ;;  %v4774_v28 = vor.u32 %v4773_v63, %v9853_v39  ;;  %v9906_v58 = vld [vmem:[%s7309_s28 + $0xb0] sm:$0x1] }
 0x1f4   : > { %7073 = vmatprep.mubr.bf16.mxu0 %v10965_v13  ;;  %5856 = vst [vmem:[%s9104_s29 + $0xd0] sm:$0xff] %v5824_v47  ;;  %v5825_v60 = vadd.f32 %v9663_v7, %v3394_v22  ;;  %v5412_v21 = vrot.slane %v9488_v50, 5  ;;  %v9892_v29 = vrot.slane %v4777_v27, 5  ;;  %v5416_v5 = vrot.slane %v9524_v38, 5  ;;  %v6666_v19 = vld [vmem:[%s7309_s28 + $0x84] sm:$0xe] }
 0x1f5   : > { %v2242_v53 = vpop.f32.mrb[120].mxu0  ;;  %v4791_v36 = vshll.u32 %v9876_v16, 16  ;;  %v4795_v20 = vshrl.u32 %v9876_v16, 16  ;;  %v3155_v47 = vpop.f32.mrb[120].mxu1  ;;  %v9903_v63 = vsel %vm7746_vm5, %v6680_v57, %v5409_v55  ;;  %v5411_v50 = vrot.slane %v5409_v55, 4 }
 0x1f6   : > { %5857 = vst [vmem:[%s9104_s29 + $0xd8] sm:$0xff] %v5825_v60  ;;  %v2289_v11 = vadd.f32 %v2242_v53, %v10966_v48  ;;  %v9899_v22 = vpop.f32.mrb[121].mxu0  ;;  %v6681_v62 = vrot.slane %v6665_v54, 9  ;;  %v3157_v38 = vpop.f32.mrb[121].mxu1  ;;  %v9908_v4 = vrot.slane %v4764_v25, 4  ;;  %v5419_v35 = vrot.slane %v9585_v49, 5 }
 0x1f7   : > { %10967 = vst [vmem:[#allocation6_spill] sm:$0xff] %v9899_v22  ;;  %v2246_v27 = vpop.f32.mrb[122].mxu0  ;;  %v4784_v13 = vrot.slane %v4782_v51, 4  ;;  %v4787_v60 = vrot.slane %v4785_v15, 5  ;;  %v10968_v48 = vld [vmem:[#allocation43_spill] sm:$0xff]  ;;  %v3159_v22 = vpop.f32.mrb[122].mxu1 }
 0x1f8   : > { %v3395_v53 = vadd.f32 %v3155_v47, %v2289_v11  ;;  %v9912_v26 = vadd.f32 %v3157_v38, %v10968_v48  ;;  %v2290_v57 = vadd.f32 %v2246_v27, %v10969_v17  ;;  %v9915_v55 = vpop.f32.mrb[123].mxu0  ;;  %v9917_v54 = vrot.slane %v4774_v28, 4  ;;  %v3161_v2 = vpop.f32.mrb[123].mxu1  ;;  %v10970_v47 = vld [vmem:[#allocation53_spill] sm:$0xff]  ;;  %v6616_v27 = vld [vmem:[%s7309_s28 + $0xb4] sm:$0xf] }
 0x1f9   : > { %v5418_v25 = vrot.slane %v5416_v5, 4  ;;  %v9920_v41 = vrot.slane %v4791_v36, 5  ;;  %v4797_v49 = vrot.slane %v4795_v20, 4  ;;  %v5423_v51 = vrot.slane %v9572_v44, 5  ;;  %v9957_v20 = vld [vmem:[%s7309_s28 + $0xb8] sm:$0xf] }
 0x1fa   : > { %v5826_v15 = vadd.f32 %v9663_v7, %v3395_v53  ;;  %v3396_v11 = vadd.f32 %v3159_v22, %v2290_v57  ;;  %v9925_v17 = vadd.f32 %v3161_v2, %v10970_v47  ;;  %v10971_v28 = vcombine.low %v9758_v34, %v9778_v52  ;;  %5160 = vmatmul.mubr.bf16.gmra.mrb[228].mxu1 %v9818_v24 }
 0x1fb   : > { %v4801_v38 = vshll.u32 %v9906_v58, 16  ;;  %v10972_v44 = vcombine.low %v9782_v46, %v9788_v6  ;;  %v4770_v2 = vsel %vm7386_vm2, %v9908_v4, %v9853_v39  ;;  %v9942_v34 = vsel %vm7746_vm5, %v5411_v50, %v5412_v21  ;;  %5169 = vmatprep.mubr.bf16.mxu1 %v10760_v14  ;;  %v6667_v39 = vld [vmem:[%s7309_s28 + $0x90] sm:$0xe] }
 0x1fc   : > { %7074 = vmatmul.mubr.bf16.gmra.mrb[228].mxu0 %v10971_v28  ;;  %v4788_v52 = vor.u32 %v4787_v60, %v4784_v13  ;;  %5858 = vst [vmem:[%s9104_s29 + $0xe0] sm:$0xff] %v5826_v15  ;;  %v5827_v36 = vadd.f32 %v9663_v7, %v3396_v11  ;;  %v4780_v46 = vsel %vm7386_vm2, %v9917_v54, %v9892_v29  ;;  %v6682_v24 = vrot.slane %v6666_v19, 9  ;;  %v10973_v60 = vld [vmem:[#allocation10_spill] sm:$0xff]  ;;  %v10974_v28 = vld [vmem:[#allocation9_spill] sm:$0xff] }
 0x1fd   : > { %7077 = vmatprep.mubr.bf16.mxu0 %v10972_v44  ;;  %v9953_v6 = vsel %vm7746_vm5, %v6681_v62, %v5416_v5  ;;  %v2252_v21 = vpop.f32.mrb[124].mxu0  ;;  %v4798_v22 = vor.u32 %v4797_v49, %v9920_v41  ;;  %v5425_v50 = vrot.slane %v5423_v51, 4  ;;  %v5426_v4 = vrot.slane %v9650_v56, 5  ;;  %v3165_v48 = vpop.f32.mrb[124].mxu1 }
 0x1fe   : > { %v4806_v13 = vshrl.u32 %v6616_v27, 16  ;;  %5859 = vst [vmem:[%s9104_s29 + $0xe8] sm:$0xff] %v5827_v36  ;;  %v2291_v53 = vadd.f32 %v2252_v21, %v10973_v60  ;;  %v9963_v29 = vpop.f32.mrb[125].mxu0  ;;  %v9967_v5 = vsel %vm7746_vm5, %v5418_v25, %v5419_v35  ;;  %v9969_v19 = vrot.slane %v4801_v38, 5  ;;  %v3167_v57 = vpop.f32.mrb[125].mxu1  ;;  %v10975_v36 = vld [vmem:[#allocation46_spill] sm:$0xff] }
 0x1ff   : > { %v4809_v62 = vshll.u32 %v6616_v27, 16  ;;  %v2256_v54 = vpop.f32.mrb[126].mxu0  ;;  %v9971_v49 = vrot.slane %v4788_v52, 4  ;;  %v6683_v15 = vrot.slane %v6667_v39, 9  ;;  %v4815_v56 = vshll.u32 %v9957_v20, 16  ;;  %v3169_v35 = vpop.f32.mrb[126].mxu1 }
 0x200   : > { %v4819_v11 = vshrl.u32 %v9957_v20, 16  ;;  %v3397_v47 = vadd.f32 %v3165_v48, %v2291_v53  ;;  %v9976_v44 = vadd.f32 %v3167_v57, %v10974_v28  ;;  %v2292_v21 = vadd.f32 %v2256_v54, %v10975_v36  ;;  %v9979_v25 = vpop.f32.mrb[127].mxu0  ;;  %v3171_v27 = vpop.f32.mrb[127].mxu1  ;;  %v10976_v54 = vld [vmem:[#allocation12_spill] sm:$0xff]  ;;  %v10980_v36 = vld [vmem:[#allocation11_spill] sm:$0xff] }
 0x201   : > { %v9983_v38 = vsel %vm7746_vm5, %v6682_v24, %v5423_v51  ;;  %v9985_v52 = vrot.slane %v4798_v22, 4  ;;  %v9989_v39 = vsel %vm7746_vm5, %v5425_v50, %v5426_v4  ;;  %v5430_v60 = vrot.slane %v9700_v33, 5  ;;  %v10006_v50 = vld [vmem:[%s7309_s28 + $0xbc] sm:$0x1] }
 0x202   : > { %v4808_v53 = vrot.slane %v4806_v13, 4  ;;  %v5828_v48 = vadd.f32 %v9663_v7, %v3397_v47  ;;  %v3398_v57 = vadd.f32 %v3169_v35, %v2292_v21  ;;  %v9994_v28 = vadd.f32 %v3171_v27, %v10976_v54  ;;  %5170 = vmatmul.mubr.bf16.gmra.mrb[232].mxu1 %v9888_v61  ;;  %v6619_v47 = vld [vmem:[%s7309_s28 + $0xc0] sm:$0xf]  ;;  %v10981_v54 = vld [vmem:[#allocation17_spill] sm:$0xff] }
 0x203   : > { %v10977_v51 = vcombine.low %v9827_v12, %v9839_v43  ;;  %v4811_v24 = vrot.slane %v4809_v62, 5  ;;  %v10978_v22 = vcombine.low %v9843_v32, %v9851_v3  ;;  %v6696_v33 = vcombine.low %v9903_v63, %v9942_v34  ;;  %5179 = vmatprep.mubr.bf16.mxu1 %v10760_v14  ;;  %v6668_v63 = vld [vmem:[%s7309_s28 + $0x9c] sm:$0xe] }
 0x204   : > { %v10008_v4 = vrot.slane %v4815_v56, 5  ;;  %v4821_v13 = vrot.slane %v4819_v11, 4  ;;  %v5437_v12 = vrot.slane %v9800_v8, 5  ;;  %5860 = vst [vmem:[%s9104_s29 + $0xf0] sm:$0xff] %v5828_v48  ;;  %v5829_v43 = vadd.f32 %v9663_v7, %v3398_v57  ;;  %v10041_v48 = vld [vmem:[%s7309_s28 + $0xc4] sm:$0xf] }
 0x205   : > { %7078 = vmatmul.mubr.bf16.gmra.mrb[232].mxu0 %v10977_v51  ;;  %v6636_v61 = vcombine.low %v4770_v2, %v4780_v46  ;;  %v6697_v32 = vcombine.low %v9953_v6, %v9967_v5  ;;  %v4794_v3 = vsel %vm7386_vm2, %v9971_v49, %v9920_v41  ;;  %v3208_v34 = vpop.f32.mrb[128].mxu0  ;;  %v4804_v8 = vsel %vm7386_vm2, %v9985_v52, %v9969_v19  ;;  %v10979_v6 = vld [vmem:[#allocation13_spill] sm:$0xff]  ;;  %v3833_v41 = vpop.f32.mrb[128].mxu1 }
 0x206   : > { %7081 = vmatprep.mubr.bf16.mxu0 %v10978_v22  ;;  %v6698_v62 = vcombine.low %v9983_v38, %v9989_v39  ;;  %v10029_v2 = vsel %vm7746_vm5, %v6683_v15, %v5430_v60  ;;  %v5432_v46 = vrot.slane %v5430_v60, 4  ;;  %5861 = vst [vmem:[%s9104_s29 + $0xf8] sm:$0xff] %v5829_v43  ;;  %v10033_v5 = vadd.f32 %v3208_v34, %v10979_v6  ;;  %v3210_v49 = vpop.f32.mrb[129].mxu0  ;;  %v3835_v35 = vpop.f32.mrb[129].mxu1  ;;  %v10982_v34 = vld [vmem:[#allocation20_spill] sm:$0xff] }
 0x207   : > { %v5433_v56 = vrot.slane %v9761_v42, 5  ;;  %v4812_v11 = vor.u32 %v4811_v24, %v4808_v53  ;;  %v4825_v19 = vshll.u32 %v10006_v50, 16  ;;  %v3992_v21 = vadd.f32 %v3833_v41, %v10980_v36  ;;  %v3212_v15 = vpop.f32.mrb[130].mxu0  ;;  %v3837_v42 = vpop.f32.mrb[130].mxu1  ;;  %v6669_v6 = vld [vmem:[%s7309_s28 + $0xa8] sm:$0xe] }
 0x208   : > { %v4822_v27 = vor.u32 %v4821_v13, %v10008_v4  ;;  %v6684_v52 = vrot.slane %v6668_v63, 9  ;;  %v5439_v60 = vrot.slane %v5437_v12, 4  ;;  %v10043_v57 = vadd.f32 %v3835_v35, %v3210_v49  ;;  %v3214_v53 = vpop.f32.mrb[131].mxu0  ;;  %v3839_v63 = vpop.f32.mrb[131].mxu1 }
 0x209   : > { %v10046_v51 = vadd.f32 %v3212_v15, %v10981_v54  ;;  %v5440_v24 = vrot.slane %v9846_v18, 5  ;;  %v5444_v22 = vrot.slane %v9876_v16, 5  ;;  %v5862_v43 = vadd.f32 %v9663_v7, %v3992_v21 }
 0x20a   : > { %v3993_v13 = vadd.f32 %v3837_v42, %v10982_v34  ;;  %v4830_v41 = vshrl.u32 %v6619_v47, 16  ;;  %v4833_v36 = vshll.u32 %v6619_v47, 16  ;;  %v10053_v49 = vadd.f32 %v3839_v63, %v3214_v53  ;;  %5180 = vmatmul.mubr.bf16.gmra.mrb[236].mxu1 %v6636_v61  ;;  %v10071_v53 = vld [vmem:[%s7309_s28 + $0xc8] sm:$0x1]  ;;  %v10985_v34 = vld [vmem:[#allocation16_spill] sm:$0xff] }
 0x20b   : > { %v5434_v35 = vsel %vm7746_vm5, %v5432_v46, %v5433_v56  ;;  %v4839_v18 = vshll.u32 %v10041_v48, 16  ;;  %v4843_v16 = vshrl.u32 %v10041_v48, 16  ;;  %6714 = vst [vmem:[%s9104_s29 + $0x100] sm:$0xff] %v5862_v43  ;;  %v4813_v15 = vrot.slane %v4812_v11, 4  ;;  %5189 = vmatprep.mubr.bf16.mxu1 %v10760_v14  ;;  %v10984_v43 = vld [vmem:[#allocation14_spill] sm:$0xff] }
 0x20c   : > { %10983 = vst [vmem:[#allocation3_spill] sm:$0xff] %v10053_v49  ;;  %v5863_v21 = vadd.f32 %v9663_v7, %v3993_v13  ;;  %v4823_v54 = vrot.slane %v4822_v27, 4  ;;  %v4827_v47 = vrot.slane %v4825_v19, 5  ;;  %v10064_v42 = vsel %vm7746_vm5, %v6684_v52, %v5437_v12 }
 0x20d   : > { %7082 = vmatmul.mubr.bf16.gmra.mrb[236].mxu0 %v6696_v33  ;;  %v6637_v33 = vcombine.low %v4794_v3, %v4804_v8  ;;  %v10068_v46 = vsel %vm7746_vm5, %v5439_v60, %v5440_v24  ;;  %v6685_v56 = vrot.slane %v6669_v6, 9  ;;  %v3218_v61 = vpop.f32.mrb[132].mxu0  ;;  %v5447_v11 = vrot.slane %v9906_v58, 5  ;;  %v3843_v8 = vpop.f32.mrb[132].mxu1 }
 0x20e   : > { %7085 = vmatprep.mubr.bf16.mxu0 %v6697_v32  ;;  %6715 = vst [vmem:[%s9104_s29 + $0x108] sm:$0xff] %v5863_v21  ;;  %v5446_v32 = vrot.slane %v5444_v22, 4  ;;  %v4832_v19 = vrot.slane %v4830_v41, 4  ;;  %v4835_v27 = vrot.slane %v4833_v36, 5  ;;  %v10076_v3 = vadd.f32 %v3218_v61, %v10984_v43  ;;  %v3220_v12 = vpop.f32.mrb[133].mxu0  ;;  %v3845_v63 = vpop.f32.mrb[133].mxu1 }
 0x20f   : > { %v6699_v52 = vcombine.low %v10029_v2, %v5434_v35  ;;  %v10079_v60 = vrot.slane %v4839_v18, 5  ;;  %v4845_v24 = vrot.slane %v4843_v16, 4  ;;  %v3994_v13 = vadd.f32 %v3843_v8, %v10985_v34  ;;  %v3222_v6 = vpop.f32.mrb[134].mxu0  ;;  %v10987_v2 = vld [vmem:[#allocation15_spill] sm:$0xff]  ;;  %v3847_v18 = vpop.f32.mrb[134].mxu1 }
 0x210   : > { %v4818_v58 = vsel %vm7386_vm2, %v4813_v15, %v10008_v4  ;;  %v4828_v41 = vsel %vm7386_vm2, %v4823_v54, %v4827_v47  ;;  %v10089_v21 = vadd.f32 %v3845_v63, %v3220_v12  ;;  %v10092_v35 = vadd.f32 %v3222_v6, %v10987_v2  ;;  %v3224_v16 = vpop.f32.mrb[135].mxu0  ;;  %v6622_v15 = vld [vmem:[%s7309_s28 + $0xcc] sm:$0xf]  ;;  %v10988_v47 = vld [vmem:[#allocation21_spill] sm:$0xff]  ;;  %v3849_v8 = vpop.f32.mrb[135].mxu1 }
 0x211   : > { %v10096_v61 = vsel %vm7746_vm5, %v6685_v56, %v5444_v22  ;;  %v4849_v4 = vshll.u32 %v10071_v53, 16  ;;  %v5864_v54 = vadd.f32 %v9663_v7, %v3994_v13  ;;  %v3995_v43 = vadd.f32 %v3847_v18, %v10988_v47  ;;  %v10105_v63 = vld [vmem:[%s7309_s28 + $0xd0] sm:$0xf]  ;;  %v6670_v13 = vld [vmem:[%s7309_s28 + $0xb4] sm:$0xe] }
 0x212   : > { %10986 = vst [vmem:[#allocation7_spill] sm:$0xff] %v10089_v21  ;;  %v5448_v12 = vsel %vm7746_vm5, %v5446_v32, %v5447_v11  ;;  %v4836_v34 = vor.u32 %v4835_v27, %v4832_v19  ;;  %v10107_v6 = vadd.f32 %v3849_v8, %v3224_v16  ;;  %v6638_v22 = vcombine.low %v4818_v58, %v4828_v41  ;;  %v6671_v18 = vld [vmem:[%s7309_s28 + $0xc0] sm:$0xe]  ;;  %v10990_v16 = vld [vmem:[#allocation19_spill] sm:$0xff]  ;;  %v6624_v21 = vld [vmem:[%s7309_s28 + $0xd4] sm:$0x1] }
 0x213   : > { %v4846_v56 = vor.u32 %v4845_v24, %v10079_v60  ;;  %v5451_v2 = vrot.slane %v9957_v20, 5  ;;  %6716 = vst [vmem:[%s9104_s29 + $0x110] sm:$0xff] %v5864_v54  ;;  %v5865_v32 = vadd.f32 %v9663_v7, %v3995_v43  ;;  %5190 = vmatmul.mubr.bf16.gmra.mrb[240].mxu1 %v6637_v33  ;;  %v5458_v11 = vrot.slane %v10041_v48, 5  ;;  %v10992_v43 = vld [vmem:[#allocation24_spill] sm:$0xff] }
 0x214   : > { %10989 = vst [vmem:[#allocation39_spill] sm:$0xff] %v10107_v6  ;;  %v4854_v19 = vshrl.u32 %v6622_v15, 16  ;;  %v4857_v27 = vshll.u32 %v6622_v15, 16  ;;  %5199 = vmatprep.mubr.bf16.mxu1 %v10760_v14  ;;  %v6701_v38 = vcombine.low %v10096_v61, %v5448_v12  ;;  %v4851_v39 = vrot.slane %v4849_v4, 5 }
 0x215   : > { %7086 = vmatmul.mubr.bf16.gmra.mrb[240].mxu0 %v6698_v62  ;;  %v4863_v62 = vshll.u32 %v10105_v63, 16  ;;  %v4867_v24 = vshrl.u32 %v10105_v63, 16  ;;  %6717 = vst [vmem:[%s9104_s29 + $0x118] sm:$0xff] %v5865_v32  ;;  %v3228_v20 = vpop.f32.mrb[136].mxu0  ;;  %v4837_v58 = vrot.slane %v4836_v34, 4  ;;  %v6686_v41 = vrot.slane %v6670_v13, 9 }
 0x216   : > { %7089 = vmatprep.mubr.bf16.mxu0 %v6699_v52  ;;  %v5454_v33 = vrot.slane %v10006_v50, 5  ;;  %v6687_v52 = vrot.slane %v6671_v18, 9  ;;  %v10126_v48 = vadd.f32 %v3228_v20, %v10990_v16  ;;  %v3853_v15 = vpop.f32.mrb[136].mxu1  ;;  %v3230_v54 = vpop.f32.mrb[137].mxu0  ;;  %v4847_v47 = vrot.slane %v4846_v56, 4  ;;  %v10993_v50 = vld [vmem:[#allocation22_spill] sm:$0xff] }
 0x217   : > { %v5453_v61 = vrot.slane %v5451_v2, 4  ;;  %v5461_v4 = vrot.slane %v10071_v53, 5  ;;  %v3996_v8 = vadd.f32 %v3853_v15, %v10992_v43  ;;  %v3855_v12 = vpop.f32.mrb[137].mxu1  ;;  %v3232_v32 = vpop.f32.mrb[138].mxu0  ;;  %v5460_v36 = vrot.slane %v5458_v11, 4  ;;  %v10994_v15 = vld [vmem:[#allocation18_spill] sm:$0xff] }
 0x218   : > { %10991 = vst [vmem:[#allocation47_spill] sm:$0xff] %v10126_v48  ;;  %v4856_v34 = vrot.slane %v4854_v19, 4  ;;  %v4859_v13 = vrot.slane %v4857_v27, 5  ;;  %v10130_v6 = vadd.f32 %v3855_v12, %v3230_v54  ;;  %v10133_v18 = vadd.f32 %v3232_v32, %v10993_v50  ;;  %v3857_v20 = vpop.f32.mrb[138].mxu1  ;;  %v3234_v16 = vpop.f32.mrb[139].mxu0 }
 0x219   : > { %v10136_v56 = vrot.slane %v4863_v62, 5  ;;  %v4869_v48 = vrot.slane %v4867_v24, 4  ;;  %v5866_v53 = vadd.f32 %v9663_v7, %v3996_v8  ;;  %v3997_v43 = vadd.f32 %v3857_v20, %v10994_v15  ;;  %v3859_v49 = vpop.f32.mrb[139].mxu1 }
 0x21a   : > { %v4842_v19 = vsel %vm7386_vm2, %v4837_v58, %v10079_v60  ;;  %v5452_v27 = vsel %vm7746_vm5, %v6686_v41, %v5451_v2  ;;  %v10145_v54 = vadd.f32 %v3859_v49, %v3234_v16  ;;  %v10995_v62 = vcombine.low %v10064_v42, %v10068_v46  ;;  %v6672_v46 = vld [vmem:[%s7309_s28 + $0xcc] sm:$0xe]  ;;  %v10998_v16 = vld [vmem:[#allocation29_spill] sm:$0xff] }
 0x21b   : > { %v4852_v24 = vsel %vm7386_vm2, %v4847_v47, %v4851_v39  ;;  %v5455_v8 = vsel %vm7746_vm5, %v5453_v61, %v5454_v33  ;;  %v5459_v12 = vsel %vm7746_vm5, %v6687_v52, %v5458_v11  ;;  %6718 = vst [vmem:[%s9104_s29 + $0x120] sm:$0xff] %v5866_v53  ;;  %v5867_v60 = vadd.f32 %v9663_v7, %v3997_v43  ;;  %v10996_v33 = vld [vmem:[#allocation26_spill] sm:$0xff] }
 0x21c   : > { %5200 = vmatmul.mubr.bf16.gmra.mrb[244].mxu1 %v6638_v22  ;;  %v5462_v49 = vsel %vm7746_vm5, %v5460_v36, %v5461_v4  ;;  %v4873_v42 = vshll.u32 %v6624_v21, 16  ;;  %v5465_v2 = vrot.slane %v10105_v63, 5  ;;  %v4860_v39 = vor.u32 %v4859_v13, %v4856_v34  ;;  %v10997_v4 = vld [vmem:[#allocation23_spill] sm:$0xff] }
 0x21d   : > { %7090 = vmatmul.mubr.bf16.gmra.mrb[244].mxu0 %v10995_v62  ;;  %5209 = vmatprep.mubr.bf16.mxu1 %v10760_v14  ;;  %v4870_v58 = vor.u32 %v4869_v48, %v10136_v56  ;;  %6719 = vst [vmem:[%s9104_s29 + $0x128] sm:$0xff] %v5867_v60  ;;  %v3238_v41 = vpop.f32.mrb[140].mxu0  ;;  %v6702_v11 = vcombine.low %v5452_v27, %v5455_v8  ;;  %v3863_v22 = vpop.f32.mrb[140].mxu1  ;;  %v6688_v36 = vrot.slane %v6672_v46, 9  ;;  %v5468_v13 = vrot.slane %v6624_v21, 5 }
 0x21e   : > { %7093 = vmatprep.mubr.bf16.mxu0 %v6701_v38  ;;  %v10166_v52 = vadd.f32 %v3238_v41, %v10996_v33  ;;  %v3240_v38 = vpop.f32.mrb[141].mxu0  ;;  %v6639_v47 = vcombine.low %v4842_v19, %v4852_v24  ;;  %v6703_v61 = vcombine.low %v5459_v12, %v5462_v49  ;;  %v3998_v32 = vadd.f32 %v3863_v22, %v10997_v4  ;;  %v3865_v50 = vpop.f32.mrb[141].mxu1  ;;  %v10999_v24 = vld [vmem:[#allocation25_spill] sm:$0xff]  ;;  %v11000_v41 = vld [vmem:[#allocation28_spill] sm:$0xff] }
 0x21f   : > { %v3242_v63 = vpop.f32.mrb[142].mxu0  ;;  %v4875_v20 = vrot.slane %v4873_v42, 5  ;;  %v5467_v34 = vrot.slane %v5465_v2, 4  ;;  %v10169_v48 = vadd.f32 %v3865_v50, %v3240_v38  ;;  %v3867_v15 = vpop.f32.mrb[142].mxu1  ;;  %v4861_v27 = vrot.slane %v4860_v39, 4 }
 0x220   : > { %v10172_v53 = vadd.f32 %v3242_v63, %v10998_v16  ;;  %v3244_v43 = vpop.f32.mrb[143].mxu0  ;;  %v4871_v19 = vrot.slane %v4870_v58, 4  ;;  %v5868_v62 = vadd.f32 %v9663_v7, %v3998_v32  ;;  %v3999_v8 = vadd.f32 %v3867_v15, %v10999_v24  ;;  %v3869_v12 = vpop.f32.mrb[143].mxu1  ;;  %v11003_v63 = vld [vmem:[#allocation33_spill] sm:$0xff]  ;;  %v11005_v24 = vld [vmem:[#allocation35_spill] sm:$0xff] }
 0x221   : > { %v10176_v60 = vadd.f32 %v3869_v12, %v3244_v43  ;;  %v5466_v49 = vsel %vm7746_vm5, %v6688_v36, %v5465_v2  ;;  %v5469_v42 = vsel %vm7746_vm5, %v5467_v34, %v5468_v13  ;;  %v4866_v46 = vsel %vm7386_vm2, %v4861_v27, %v10136_v56  ;;  %v11002_v56 = vld [vmem:[#allocation32_spill] sm:$0xff]  ;;  %v11004_v43 = vld [vmem:[#allocation2_spill] sm:$0xff] }
 0x222   : > { %6720 = vst [vmem:[%s9104_s29 + $0x130] sm:$0xff] %v5868_v62  ;;  %v5869_v21 = vadd.f32 %v9663_v7, %v3999_v8  ;;  %v4876_v39 = vsel %vm7386_vm2, %v4871_v19, %v4875_v20  ;;  %v6704_v22 = vcombine.low %v5466_v49, %v5469_v42  ;;  %v11006_v42 = vld [vmem:[#allocation34_spill] sm:$0xff] }
 0x224   : > { %5210 = vmatmul.mubr.bf16.gmra.mrb[248].mxu1 %v6639_v47  ;;  %6721 = vst [vmem:[%s9104_s29 + $0x138] sm:$0xff] %v5869_v21 }
 0x225   : > { %7094 = vmatmul.mubr.bf16.gmra.mrb[248].mxu0 %v6702_v11  ;;  %5219 = vmatprep.mubr.bf16.mxu1 %v10760_v14  ;;  %v3248_v58 = vpop.f32.mrb[144].mxu0  ;;  %v3873_v33 = vpop.f32.mrb[144].mxu1 }
 0x226   : > { %7097 = vmatprep.mubr.bf16.mxu0 %v6703_v61  ;;  %v10192_v11 = vadd.f32 %v3248_v58, %v11000_v41  ;;  %v3250_v2 = vpop.f32.mrb[145].mxu0  ;;  %v4000_v38 = vadd.f32 %v3873_v33, %v11001_v0  ;;  %v3875_v14 = vpop.f32.mrb[145].mxu1  ;;  %v6640_v61 = vcombine.low %v4866_v46, %v4876_v39  ;;  %v11007_v33 = vld [vmem:[#allocation36_spill] sm:$0xff] }
 0x227   : > { %v3252_v47 = vpop.f32.mrb[146].mxu0  ;;  %v10195_v36 = vadd.f32 %v3875_v14, %v3250_v2  ;;  %v3877_v4 = vpop.f32.mrb[146].mxu1 }
 0x228   : > { %v10198_v9 = vadd.f32 %v3252_v47, %v11002_v56  ;;  %v3254_v32 = vpop.f32.mrb[147].mxu0  ;;  %v5870_v50 = vadd.f32 %v9663_v7, %v4000_v38  ;;  %v4001_v20 = vadd.f32 %v3877_v4, %v11003_v63  ;;  %v3879_v34 = vpop.f32.mrb[147].mxu1  ;;  %v11008_v47 = vld [vmem:[#allocation38_spill] sm:$0xff] }
 0x229   : > { %v10202_v13 = vadd.f32 %v3879_v34, %v3254_v32  ;;  %v11009_v32 = vld [vmem:[#allocation54_spill] sm:$0xff] }
 0x22a   : > { %6722 = vst [vmem:[%s9104_s29 + $0x140] sm:$0xff] %v5870_v50  ;;  %v5871_v16 = vadd.f32 %v9663_v7, %v4001_v20 }
 0x22c   : > { %5220 = vmatmul.mubr.bf16.gmra.mrb[252].mxu1 %v6640_v61  ;;  %6723 = vst [vmem:[%s9104_s29 + $0x148] sm:$0xff] %v5871_v16  ;;  %v11010_v16 = vld [vmem:[#allocation40_spill] sm:$0xff] }
 0x22d   : > { %7098 = vmatmul.mubr.bf16.gmra.mrb[252].mxu0 %v6704_v22  ;;  %v3258_v15 = vpop.f32.mrb[148].mxu0  ;;  %v3883_v19 = vpop.f32.mrb[148].mxu1 }
 0x22e   : > { %v10208_v27 = vadd.f32 %v3258_v15, %v11004_v43  ;;  %v3260_v62 = vpop.f32.mrb[149].mxu0  ;;  %v4002_v8 = vadd.f32 %v3883_v19, %v11005_v24  ;;  %v3885_v12 = vpop.f32.mrb[149].mxu1  ;;  %v11011_v24 = vld [vmem:[#allocation56_spill] sm:$0xff] }
 0x22f   : > { %v3262_v21 = vpop.f32.mrb[150].mxu0  ;;  %v10211_v49 = vadd.f32 %v3885_v12, %v3260_v62  ;;  %v3887_v39 = vpop.f32.mrb[150].mxu1 }
 0x230   : > { %v10214_v46 = vadd.f32 %v3262_v21, %v11006_v42  ;;  %v3264_v58 = vpop.f32.mrb[151].mxu0  ;;  %v5872_v41 = vadd.f32 %v9663_v7, %v4002_v8  ;;  %v4003_v2 = vadd.f32 %v3887_v39, %v11007_v33  ;;  %v3889_v22 = vpop.f32.mrb[151].mxu1 }
 0x231   : > { %v10218_v0 = vadd.f32 %v3889_v22, %v3264_v58  ;;  %v11012_v58 = vld [vmem:[#allocation42_spill] sm:$0xff] }
 0x232   : > { %6724 = vst [vmem:[%s9104_s29 + $0x150] sm:$0xff] %v5872_v41  ;;  %v5873_v38 = vadd.f32 %v9663_v7, %v4003_v2 }
 0x234   : > { %6725 = vst [vmem:[%s9104_s29 + $0x158] sm:$0xff] %v5873_v38 }
 0x235   : > { %v3268_v14 = vpop.f32.mrb[152].mxu0  ;;  %v3893_v56 = vpop.f32.mrb[152].mxu1 }
 0x236   : > { %v10224_v61 = vadd.f32 %v3268_v14, %v11008_v47  ;;  %v3270_v4 = vpop.f32.mrb[153].mxu0  ;;  %v4004_v50 = vadd.f32 %v3893_v56, %v11009_v32  ;;  %v3895_v63 = vpop.f32.mrb[153].mxu1  ;;  %v11013_v56 = vld [vmem:[#allocation45_spill] sm:$0xff] }
 0x237   : > { %v3272_v20 = vpop.f32.mrb[154].mxu0  ;;  %v10227_v34 = vadd.f32 %v3895_v63, %v3270_v4  ;;  %v3897_v43 = vpop.f32.mrb[154].mxu1 }
 0x238   : > { %v10230_v15 = vadd.f32 %v3272_v20, %v11010_v16  ;;  %v3274_v19 = vpop.f32.mrb[155].mxu0  ;;  %v5874_v62 = vadd.f32 %v9663_v7, %v4004_v50  ;;  %v4005_v8 = vadd.f32 %v3897_v43, %v11011_v24  ;;  %v3899_v12 = vpop.f32.mrb[155].mxu1  ;;  %v10251_v50 = vld [vmem:[%s10714_s2] ss:$0 sm:$0xff]  ;;  %v11014_v20 = vld [vmem:[#allocation57_spill] sm:$0xff] }
 0x239   : > { %v10234_v21 = vadd.f32 %v3899_v12, %v3274_v19  ;;  %v11015_v24 = vld [vmem:[#allocation58_spill] sm:$0xff] }
 0x23a   : > { %6726 = vst [vmem:[%s9104_s29 + $0x160] sm:$0xff] %v5874_v62  ;;  %v5875_v42 = vadd.f32 %v9663_v7, %v4005_v8 }
 0x23c   : > { %6727 = vst [vmem:[%s9104_s29 + $0x168] sm:$0xff] %v5875_v42 }
 0x23d   : > { %v3278_v39 = vpop.f32.mrb[156].mxu0  ;;  %v3903_v33 = vpop.f32.mrb[156].mxu1 }
 0x23e   : > { %v10240_v41 = vadd.f32 %v3278_v39, %v11012_v58  ;;  %v3280_v2 = vpop.f32.mrb[157].mxu0  ;;  %v4006_v22 = vadd.f32 %v3903_v33, %v9453_v1  ;;  %v3905_v38 = vpop.f32.mrb[157].mxu1 }
 0x23f   : > { %v3282_v14 = vpop.f32.mrb[158].mxu0  ;;  %v10243_v47 = vadd.f32 %v3905_v38, %v3280_v2  ;;  %v3907_v32 = vpop.f32.mrb[158].mxu1 }
 0x240   : > { %v10246_v4 = vadd.f32 %v3282_v14, %v11013_v56  ;;  %v3284_v7 = vpop.f32.mrb[159].mxu0  ;;  %v5876_v63 = vadd.f32 %v10251_v50, %v4006_v22  ;;  %v4007_v16 = vadd.f32 %v3907_v32, %v11014_v20  ;;  %v3909_v43 = vpop.f32.mrb[159].mxu1 }
 0x241   : > { %v10255_v1 = vadd.f32 %v3909_v43, %v3284_v7 }
 0x242   : > { %6728 = vst [vmem:[%s9104_s29 + $0x170] sm:$0xff] %v5876_v63  ;;  %v5877_v19 = vadd.f32 %v10251_v50, %v4007_v16  ;;  %v11018_v16 = vld [vmem:[#allocation59_spill] sm:$0xff] }
 0x244   : > { %6729 = vst [vmem:[%s9104_s29 + $0x178] sm:$0xff] %v5877_v19 }
 0x245   : > { %v3288_v62 = vpop.f32.mrb[160].mxu0  ;;  %v3913_v12 = vpop.f32.mrb[160].mxu1 }
 0x246   : > { %v10261_v8 = vadd.f32 %v3288_v62, %v11015_v24  ;;  %v3290_v42 = vpop.f32.mrb[161].mxu0  ;;  %v4008_v39 = vadd.f32 %v3913_v12, %v9515_v37  ;;  %v3915_v58 = vpop.f32.mrb[161].mxu1 }
 0x247   : > { %v3292_v33 = vpop.f32.mrb[162].mxu0  ;;  %v10264_v2 = vadd.f32 %v3915_v58, %v3290_v42  ;;  %v3917_v38 = vpop.f32.mrb[162].mxu1 }
 0x248   : > { %v10267_v22 = vadd.f32 %v3292_v33, %v9518_v40  ;;  %v3294_v14 = vpop.f32.mrb[163].mxu0  ;;  %v5878_v56 = vadd.f32 %v10251_v50, %v4008_v39  ;;  %v4009_v32 = vadd.f32 %v3917_v38, %v9528_v45  ;;  %v3919_v7 = vpop.f32.mrb[163].mxu1 }
 0x249   : > { %11016 = vst [vmem:[#allocation5_spill] sm:$0xff] %v10264_v2  ;;  %v10271_v63 = vadd.f32 %v3919_v7, %v3294_v14 }
 0x24a   : > { %6730 = vst [vmem:[%s9104_s29 + $0x180] sm:$0xff] %v5878_v56  ;;  %v5879_v20 = vadd.f32 %v10251_v50, %v4009_v32 }
 0x24b   : > { %11017 = vst [vmem:[#allocation43_spill] sm:$0xff] %v10271_v63 }
 0x24c   : > { %6731 = vst [vmem:[%s9104_s29 + $0x188] sm:$0xff] %v5879_v20 }
 0x24d   : > { %v3298_v37 = vpop.f32.mrb[164].mxu0  ;;  %v3923_v40 = vpop.f32.mrb[164].mxu1 }
 0x24e   : > { %v10277_v43 = vadd.f32 %v3298_v37, %v11018_v16  ;;  %v3300_v19 = vpop.f32.mrb[165].mxu0  ;;  %v4010_v62 = vadd.f32 %v3923_v40, %v9579_v59  ;;  %v3925_v24 = vpop.f32.mrb[165].mxu1  ;;  %v11021_v37 = vld [vmem:[#allocation60_spill] sm:$0xff] }
 0x24f   : > { %v3302_v12 = vpop.f32.mrb[166].mxu0  ;;  %v10280_v45 = vadd.f32 %v3925_v24, %v3300_v19  ;;  %v3927_v39 = vpop.f32.mrb[166].mxu1 }
 0x250   : > { %v10283_v42 = vadd.f32 %v3302_v12, %v9582_v10  ;;  %v3304_v58 = vpop.f32.mrb[167].mxu0  ;;  %v5880_v33 = vadd.f32 %v10251_v50, %v4010_v62  ;;  %v4011_v38 = vadd.f32 %v3927_v39, %v9592_v31  ;;  %v3929_v14 = vpop.f32.mrb[167].mxu1  ;;  %v11023_v62 = vld [vmem:[#allocation61_spill] sm:$0xff] }
 0x251   : > { %11019 = vst [vmem:[#allocation44_spill] sm:$0xff] %v10280_v45  ;;  %v10287_v56 = vadd.f32 %v3929_v14, %v3304_v58 }
 0x252   : > { %6732 = vst [vmem:[%s9104_s29 + $0x190] sm:$0xff] %v5880_v33  ;;  %v5881_v32 = vadd.f32 %v10251_v50, %v4011_v38  ;;  %v11024_v33 = vld [vmem:[#allocation52_spill] sm:$0xff] }
 0x253   : > { %11020 = vst [vmem:[#allocation53_spill] sm:$0xff] %v10287_v56 }
 0x254   : > { %6733 = vst [vmem:[%s9104_s29 + $0x198] sm:$0xff] %v5881_v32 }
 0x255   : > { %v3308_v59 = vpop.f32.mrb[168].mxu0  ;;  %v3933_v10 = vpop.f32.mrb[168].mxu1 }
 0x256   : > { %v10293_v7 = vadd.f32 %v3308_v59, %v9629_v23  ;;  %v3310_v20 = vpop.f32.mrb[169].mxu0  ;;  %v4012_v16 = vadd.f32 %v3933_v10, %v11021_v37  ;;  %v3935_v40 = vpop.f32.mrb[169].mxu1  ;;  %v11026_v10 = vld [vmem:[#allocation27_spill] sm:$0xff] }
 0x257   : > { %v3312_v19 = vpop.f32.mrb[170].mxu0  ;;  %v10296_v31 = vadd.f32 %v3935_v40, %v3310_v20  ;;  %v3937_v12 = vpop.f32.mrb[170].mxu1 }
 0x258   : > { %v10299_v24 = vadd.f32 %v3312_v19, %v11023_v62  ;;  %v3314_v39 = vpop.f32.mrb[171].mxu0  ;;  %v5882_v58 = vadd.f32 %v10251_v50, %v4012_v16  ;;  %v4013_v38 = vadd.f32 %v3937_v12, %v11024_v33  ;;  %v3939_v23 = vpop.f32.mrb[171].mxu1 }
 0x259   : > { %11022 = vst [vmem:[#allocation10_spill] sm:$0xff] %v10296_v31  ;;  %v10303_v14 = vadd.f32 %v3939_v23, %v3314_v39  ;;  %v11028_v39 = vld [vmem:[#allocation31_spill] sm:$0xff] }
 0x25a   : > { %6734 = vst [vmem:[%s9104_s29 + $0x1a0] sm:$0xff] %v5882_v58  ;;  %v5883_v32 = vadd.f32 %v10251_v50, %v4013_v38 }
 0x25b   : > { %11025 = vst [vmem:[#allocation9_spill] sm:$0xff] %v10303_v14 }
 0x25c   : > { %6735 = vst [vmem:[%s9104_s29 + $0x1a8] sm:$0xff] %v5883_v32  ;;  %v11029_v32 = vld [vmem:[#allocation48_spill] sm:$0xff] }
 0x25d   : > { %v3318_v59 = vpop.f32.mrb[172].mxu0  ;;  %v3943_v37 = vpop.f32.mrb[172].mxu1 }
 0x25e   : > { %v10309_v20 = vadd.f32 %v3318_v59, %v11026_v10  ;;  %v3320_v40 = vpop.f32.mrb[173].mxu0  ;;  %v4014_v19 = vadd.f32 %v3943_v37, %v9725_v30  ;;  %v3945_v16 = vpop.f32.mrb[173].mxu1  ;;  %v11031_v37 = vld [vmem:[#allocation4_spill] sm:$0xff] }
 0x25f   : > { %v3322_v62 = vpop.f32.mrb[174].mxu0  ;;  %v10312_v12 = vadd.f32 %v3945_v16, %v3320_v40  ;;  %v3947_v58 = vpop.f32.mrb[174].mxu1 }
 0x260   : > { %v10315_v33 = vadd.f32 %v3322_v62, %v11028_v39  ;;  %v3324_v38 = vpop.f32.mrb[175].mxu0  ;;  %v5884_v23 = vadd.f32 %v10251_v50, %v4014_v19  ;;  %v4015_v14 = vadd.f32 %v3947_v58, %v11029_v32  ;;  %v3949_v59 = vpop.f32.mrb[175].mxu1  ;;  %v11032_v39 = vld [vmem:[#allocation49_spill] sm:$0xff] }
 0x261   : > { %11027 = vst [vmem:[#allocation46_spill] sm:$0xff] %v10312_v12  ;;  %v10319_v10 = vadd.f32 %v3949_v59, %v3324_v38  ;;  %v11034_v38 = vld [vmem:[#allocation41_spill] sm:$0xff] }
 0x262   : > { %6736 = vst [vmem:[%s9104_s29 + $0x1b0] sm:$0xff] %v5884_v23  ;;  %v5885_v31 = vadd.f32 %v10251_v50, %v4015_v14  ;;  %v11035_v59 = vld [vmem:[#allocation37_spill] sm:$0xff] }
 0x263   : > { %11030 = vst [vmem:[#allocation12_spill] sm:$0xff] %v10319_v10 }
 0x264   : > { %6737 = vst [vmem:[%s9104_s29 + $0x1b8] sm:$0xff] %v5885_v31 }
 0x265   : > { %v3328_v30 = vpop.f32.mrb[176].mxu0  ;;  %v3953_v16 = vpop.f32.mrb[176].mxu1 }
 0x266   : > { %v10325_v40 = vadd.f32 %v3328_v30, %v11031_v37  ;;  %v3330_v62 = vpop.f32.mrb[177].mxu0  ;;  %v4016_v12 = vadd.f32 %v3953_v16, %v11032_v39  ;;  %v3955_v19 = vpop.f32.mrb[177].mxu1 }
 0x267   : > { %v3332_v56 = vpop.f32.mrb[178].mxu0  ;;  %v10328_v58 = vadd.f32 %v3955_v19, %v3330_v62  ;;  %v3957_v23 = vpop.f32.mrb[178].mxu1  ;;  %v11037_v62 = vld [vmem:[#allocation50_spill] sm:$0xff] }
 0x268   : > { %v10331_v32 = vadd.f32 %v3332_v56, %v11034_v38  ;;  %v3334_v14 = vpop.f32.mrb[179].mxu0  ;;  %v5886_v31 = vadd.f32 %v10251_v50, %v4016_v12  ;;  %v4017_v10 = vadd.f32 %v3957_v23, %v11035_v59  ;;  %v3959_v30 = vpop.f32.mrb[179].mxu1  ;;  %v11038_v38 = vld [vmem:[#allocation8_spill] sm:$0xff] }
 0x269   : > { %11033 = vst [vmem:[#allocation13_spill] sm:$0xff] %v10328_v58  ;;  %v10335_v37 = vadd.f32 %v3959_v30, %v3334_v14  ;;  %v11040_v14 = vld [vmem:[#allocation51_spill] sm:$0xff] }
 0x26a   : > { %6738 = vst [vmem:[%s9104_s29 + $0x1c0] sm:$0xff] %v5886_v31  ;;  %v5887_v45 = vadd.f32 %v10251_v50, %v4017_v10  ;;  %v11041_v30 = vld [vmem:[#allocation55_spill] sm:$0xff] }
 0x26b   : > { %11036 = vst [vmem:[#allocation11_spill] sm:$0xff] %v10335_v37 }
 0x26c   : > { %6739 = vst [vmem:[%s9104_s29 + $0x1c8] sm:$0xff] %v5887_v45 }
 0x26d   : > { %v3338_v16 = vpop.f32.mrb[180].mxu0  ;;  %v3963_v56 = vpop.f32.mrb[180].mxu1 }
 0x26e   : > { %v10341_v39 = vadd.f32 %v3338_v16, %v11037_v62  ;;  %v3340_v19 = vpop.f32.mrb[181].mxu0  ;;  %v4018_v58 = vadd.f32 %v3963_v56, %v11038_v38  ;;  %v3965_v12 = vpop.f32.mrb[181].mxu1 }
 0x26f   : > { %v3342_v63 = vpop.f32.mrb[182].mxu0  ;;  %v10344_v23 = vadd.f32 %v3965_v12, %v3340_v19  ;;  %v3967_v31 = vpop.f32.mrb[182].mxu1  ;;  %v11042_v19 = vld [vmem:[#allocation6_spill] sm:$0xff] }
 0x270   : > { %v10347_v59 = vadd.f32 %v3342_v63, %v11040_v14  ;;  %v3344_v10 = vpop.f32.mrb[183].mxu0  ;;  %v5888_v45 = vadd.f32 %v10251_v50, %v4018_v58  ;;  %v4019_v37 = vadd.f32 %v3967_v31, %v11041_v30  ;;  %v3969_v16 = vpop.f32.mrb[183].mxu1 }
 0x271   : > { %11039 = vst [vmem:[#allocation17_spill] sm:$0xff] %v10344_v23  ;;  %v10351_v62 = vadd.f32 %v3969_v16, %v3344_v10 }
 0x272   : > { %6740 = vst [vmem:[%s9104_s29 + $0x1d0] sm:$0xff] %v5888_v45  ;;  %v5889_v2 = vadd.f32 %v10251_v50, %v4019_v37 }
 0x274   : > { %6741 = vst [vmem:[%s9104_s29 + $0x1d8] sm:$0xff] %v5889_v2 }
 0x275   : > { %v3348_v56 = vpop.f32.mrb[184].mxu0  ;;  %v3973_v63 = vpop.f32.mrb[184].mxu1 }
 0x276   : > { %v10357_v38 = vadd.f32 %v3348_v56, %v11042_v19  ;;  %v3350_v12 = vpop.f32.mrb[185].mxu0  ;;  %v4020_v14 = vadd.f32 %v3973_v63, %v9912_v26  ;;  %v3975_v58 = vpop.f32.mrb[185].mxu1 }
 0x277   : > { %v3352_v23 = vpop.f32.mrb[186].mxu0  ;;  %v10360_v31 = vadd.f32 %v3975_v58, %v3350_v12  ;;  %v3977_v45 = vpop.f32.mrb[186].mxu1 }
 0x278   : > { %v10363_v10 = vadd.f32 %v3352_v23, %v9915_v55  ;;  %v3354_v37 = vpop.f32.mrb[187].mxu0  ;;  %v5890_v2 = vadd.f32 %v10251_v50, %v4020_v14  ;;  %v4021_v30 = vadd.f32 %v3977_v45, %v9925_v17  ;;  %v3979_v16 = vpop.f32.mrb[187].mxu1 }
 0x279   : > { %v10367_v56 = vadd.f32 %v3979_v16, %v3354_v37 }
 0x27a   : > { %6742 = vst [vmem:[%s9104_s29 + $0x1e0] sm:$0xff] %v5890_v2  ;;  %v5891_v19 = vadd.f32 %v10251_v50, %v4021_v30 }
 0x27b   : > { %11043 = vst [vmem:[#allocation20_spill] sm:$0xff] %v10367_v56 }
 0x27c   : > { %6743 = vst [vmem:[%s9104_s29 + $0x1e8] sm:$0xff] %v5891_v19 }
 0x27d   : > { %v3358_v26 = vpop.f32.mrb[188].mxu0  ;;  %v3983_v55 = vpop.f32.mrb[188].mxu1 }
 0x27e   : > { %v10373_v63 = vadd.f32 %v3358_v26, %v9963_v29  ;;  %v3360_v23 = vpop.f32.mrb[189].mxu0  ;;  %v4022_v12 = vadd.f32 %v3983_v55, %v9976_v44  ;;  %v3985_v14 = vpop.f32.mrb[189].mxu1 }
 0x27f   : > { %v3362_v58 = vpop.f32.mrb[190].mxu0  ;;  %v10376_v17 = vadd.f32 %v3985_v14, %v3360_v23  ;;  %v3987_v37 = vpop.f32.mrb[190].mxu1 }
 0x280   : > { %v10379_v45 = vadd.f32 %v3362_v58, %v9979_v25  ;;  %v3364_v2 = vpop.f32.mrb[191].mxu0  ;;  %v5892_v30 = vadd.f32 %v10251_v50, %v4022_v12  ;;  %v4023_v16 = vadd.f32 %v3987_v37, %v9994_v28  ;;  %v3989_v29 = vpop.f32.mrb[191].mxu1 }
 0x281   : > { %11044 = vst [vmem:[#allocation14_spill] sm:$0xff] %v10376_v17  ;;  %v10383_v19 = vadd.f32 %v3989_v29, %v3364_v2 }
 0x282   : > { %6744 = vst [vmem:[%s9104_s29 + $0x1f0] sm:$0xff] %v5892_v30  ;;  %v5893_v26 = vadd.f32 %v10251_v50, %v4023_v16 }
 0x283   : > { %11045 = vst [vmem:[#allocation16_spill] sm:$0xff] %v10383_v19 }
 0x284   : > { %6745 = vst [vmem:[%s9104_s29 + $0x1f8] sm:$0xff] %v5893_v26 }
 0x285   : > { %v7023_v44 = vpop.f32.mrb[192].mxu0  ;;  %v5071_v23 = vpop.f32.mrb[192].mxu1 }
 0x286   : > { %v4415_v55 = vadd.f32 %v7023_v44, %v10076_v3  ;;  %v4286_v25 = vpop.f32.mrb[193].mxu0  ;;  %v5073_v58 = vpop.f32.mrb[193].mxu1  ;;  %v11046_v3 = vld [vmem:[#allocation3_spill] sm:$0xff] }
 0x287   : > { %v4413_v14 = vadd.f32 %v4286_v25, %v10033_v5  ;;  %v7024_v17 = vpop.f32.mrb[194].mxu0  ;;  %v10391_v12 = vadd.f32 %v5073_v58, %v10043_v57  ;;  %v5075_v37 = vpop.f32.mrb[194].mxu1 }
 0x288   : > { %v4416_v28 = vadd.f32 %v7024_v17, %v10092_v35  ;;  %v4289_v2 = vpop.f32.mrb[195].mxu0  ;;  %v5077_v29 = vpop.f32.mrb[195].mxu1 }
 0x289   : > { %v5230_v30 = vadd.f32 %v5071_v23, %v4413_v14  ;;  %v4414_v16 = vadd.f32 %v4289_v2, %v10046_v51  ;;  %v10396_v26 = vadd.f32 %v5077_v29, %v11046_v3  ;;  %v11047_v51 = vld [vmem:[#allocation47_spill] sm:$0xff] }
 0x28a   : > { %v11048_v29 = vld [vmem:[#allocation7_spill] sm:$0xff] }
 0x28b   : > { %v5927_v44 = vadd.f32 %v10251_v50, %v5230_v30  ;;  %v5231_v5 = vadd.f32 %v5075_v37, %v4414_v16 }
 0x28d   : > { %6746 = vst [vmem:[%s9104_s29 + $0x200] sm:$0xff] %v5927_v44  ;;  %v5928_v25 = vadd.f32 %v10251_v50, %v5231_v5  ;;  %v7027_v57 = vpop.f32.mrb[196].mxu0  ;;  %v5081_v19 = vpop.f32.mrb[196].mxu1 }
 0x28e   : > { %v4419_v58 = vadd.f32 %v7027_v57, %v10166_v52  ;;  %v4302_v35 = vpop.f32.mrb[197].mxu0  ;;  %v5232_v17 = vadd.f32 %v5081_v19, %v4415_v55  ;;  %v5083_v14 = vpop.f32.mrb[197].mxu1 }
 0x28f   : > { %6747 = vst [vmem:[%s9104_s29 + $0x208] sm:$0xff] %v5928_v25  ;;  %v4417_v23 = vadd.f32 %v4302_v35, %v11047_v51  ;;  %v7028_v2 = vpop.f32.mrb[198].mxu0  ;;  %v10405_v3 = vadd.f32 %v5083_v14, %v11048_v29  ;;  %v5085_v30 = vpop.f32.mrb[198].mxu1  ;;  %v11049_v25 = vld [vmem:[#allocation39_spill] sm:$0xff] }
 0x290   : > { %v4420_v37 = vadd.f32 %v7028_v2, %v10172_v53  ;;  %v4305_v16 = vpop.f32.mrb[199].mxu0  ;;  %v5929_v44 = vadd.f32 %v10251_v50, %v5232_v17  ;;  %v5233_v52 = vadd.f32 %v5085_v30, %v4416_v28  ;;  %v5087_v57 = vpop.f32.mrb[199].mxu1 }
 0x291   : > { %v4418_v5 = vadd.f32 %v4305_v16, %v10133_v18  ;;  %v10411_v56 = vadd.f32 %v5087_v57, %v11049_v25 }
 0x292   : > { %6748 = vst [vmem:[%s9104_s29 + $0x210] sm:$0xff] %v5929_v44  ;;  %v5930_v19 = vadd.f32 %v10251_v50, %v5233_v52 }
 0x294   : > { %6749 = vst [vmem:[%s9104_s29 + $0x218] sm:$0xff] %v5930_v19 }
 0x295   : > { %v7031_v55 = vpop.f32.mrb[200].mxu0  ;;  %v5091_v53 = vpop.f32.mrb[200].mxu1 }
 0x296   : > { %v10417_v35 = vadd.f32 %v7031_v55, %v10208_v27  ;;  %v4318_v51 = vpop.f32.mrb[201].mxu0  ;;  %v5234_v17 = vadd.f32 %v5091_v53, %v4417_v23  ;;  %v5093_v18 = vpop.f32.mrb[201].mxu1 }
 0x297   : > { %v4421_v28 = vadd.f32 %v4318_v51, %v10192_v11  ;;  %v7032_v14 = vpop.f32.mrb[202].mxu0  ;;  %v10421_v2 = vadd.f32 %v5093_v18, %v10130_v6  ;;  %v5095_v30 = vpop.f32.mrb[202].mxu1 }
 0x298   : > { %v10424_v29 = vadd.f32 %v7032_v14, %v10214_v46  ;;  %v4321_v16 = vpop.f32.mrb[203].mxu0  ;;  %v5931_v27 = vadd.f32 %v10251_v50, %v5234_v17  ;;  %v5235_v44 = vadd.f32 %v5095_v30, %v4418_v5  ;;  %v5097_v57 = vpop.f32.mrb[203].mxu1 }
 0x299   : > { %v4422_v52 = vadd.f32 %v4321_v16, %v10198_v9  ;;  %v10429_v23 = vadd.f32 %v5097_v57, %v10145_v54 }
 0x29a   : > { %6750 = vst [vmem:[%s9104_s29 + $0x220] sm:$0xff] %v5931_v27  ;;  %v5932_v11 = vadd.f32 %v10251_v50, %v5235_v44 }
 0x29c   : > { %6751 = vst [vmem:[%s9104_s29 + $0x228] sm:$0xff] %v5932_v11 }
 0x29d   : > { %v7035_v6 = vpop.f32.mrb[204].mxu0  ;;  %v5101_v46 = vpop.f32.mrb[204].mxu1 }
 0x29e   : > { %v10435_v25 = vadd.f32 %v7035_v6, %v10240_v41  ;;  %v4334_v19 = vpop.f32.mrb[205].mxu0  ;;  %v5236_v55 = vadd.f32 %v5101_v46, %v4419_v58  ;;  %v5103_v9 = vpop.f32.mrb[205].mxu1 }
 0x29f   : > { %v4425_v5 = vadd.f32 %v4334_v19, %v10224_v61  ;;  %v7036_v53 = vpop.f32.mrb[206].mxu0  ;;  %v10439_v54 = vadd.f32 %v5103_v9, %v10169_v48  ;;  %v5105_v17 = vpop.f32.mrb[206].mxu1 }
 0x2a0   : > { %v10442_v51 = vadd.f32 %v7036_v53, %v10246_v4  ;;  %v4337_v18 = vpop.f32.mrb[207].mxu0  ;;  %v5933_v41 = vadd.f32 %v10251_v50, %v5236_v55  ;;  %v5237_v14 = vadd.f32 %v5105_v17, %v4420_v37  ;;  %v5107_v16 = vpop.f32.mrb[207].mxu1 }
 0x2a1   : > { %v4426_v30 = vadd.f32 %v4337_v18, %v10230_v15  ;;  %v10447_v58 = vadd.f32 %v5107_v16, %v10176_v60 }
 0x2a2   : > { %6752 = vst [vmem:[%s9104_s29 + $0x230] sm:$0xff] %v5933_v41  ;;  %v5934_v61 = vadd.f32 %v10251_v50, %v5237_v14 }
 0x2a4   : > { %6753 = vst [vmem:[%s9104_s29 + $0x238] sm:$0xff] %v5934_v61 }
 0x2a5   : > { %v7039_v48 = vpop.f32.mrb[208].mxu0  ;;  %v5111_v4 = vpop.f32.mrb[208].mxu1 }
 0x2a6   : > { %v10453_v27 = vadd.f32 %v7039_v48, %v10277_v43  ;;  %v4350_v44 = vpop.f32.mrb[209].mxu0  ;;  %v5238_v57 = vadd.f32 %v5111_v4, %v4421_v28  ;;  %v5113_v15 = vpop.f32.mrb[209].mxu1 }
 0x2a7   : > { %v10456_v37 = vadd.f32 %v4350_v44, %v10261_v8  ;;  %v7040_v11 = vpop.f32.mrb[210].mxu0  ;;  %v10459_v60 = vadd.f32 %v5113_v15, %v10195_v36  ;;  %v5115_v46 = vpop.f32.mrb[210].mxu1 }
 0x2a8   : > { %v10462_v6 = vadd.f32 %v7040_v11, %v10283_v42  ;;  %v4353_v19 = vpop.f32.mrb[211].mxu0  ;;  %v5935_v43 = vadd.f32 %v10251_v50, %v5238_v57  ;;  %v5239_v55 = vadd.f32 %v5115_v46, %v4422_v52  ;;  %v5117_v28 = vpop.f32.mrb[211].mxu1 }
 0x2a9   : > { %v10466_v9 = vadd.f32 %v4353_v19, %v10267_v22  ;;  %v10469_v8 = vadd.f32 %v5117_v28, %v10202_v13 }
 0x2aa   : > { %6754 = vst [vmem:[%s9104_s29 + $0x240] sm:$0xff] %v5935_v43  ;;  %v5936_v53 = vadd.f32 %v10251_v50, %v5239_v55 }
 0x2ac   : > { %6755 = vst [vmem:[%s9104_s29 + $0x248] sm:$0xff] %v5936_v53 }
 0x2ad   : > { %v7043_v36 = vpop.f32.mrb[212].mxu0  ;;  %v5121_v17 = vpop.f32.mrb[212].mxu1 }
 0x2ae   : > { %v10475_v42 = vadd.f32 %v7043_v36, %v10309_v20  ;;  %v4366_v18 = vpop.f32.mrb[213].mxu0  ;;  %v5240_v52 = vadd.f32 %v5121_v17, %v10417_v35  ;;  %v5123_v41 = vpop.f32.mrb[213].mxu1 }
 0x2af   : > { %v10479_v22 = vadd.f32 %v4366_v18, %v10293_v7  ;;  %v7044_v13 = vpop.f32.mrb[214].mxu0  ;;  %v10482_v14 = vadd.f32 %v5123_v41, %v10211_v49  ;;  %v5125_v61 = vpop.f32.mrb[214].mxu1 }
 0x2b0   : > { %v10485_v16 = vadd.f32 %v7044_v13, %v10315_v33  ;;  %v4369_v20 = vpop.f32.mrb[215].mxu0  ;;  %v5937_v48 = vadd.f32 %v10251_v50, %v5240_v52  ;;  %v5241_v4 = vadd.f32 %v5125_v61, %v10424_v29  ;;  %v5127_v35 = vpop.f32.mrb[215].mxu1 }
 0x2b1   : > { %v10490_v44 = vadd.f32 %v4369_v20, %v10299_v24  ;;  %v10493_v7 = vadd.f32 %v5127_v35, %v10218_v0 }
 0x2b2   : > { %6756 = vst [vmem:[%s9104_s29 + $0x250] sm:$0xff] %v5937_v48  ;;  %v5938_v49 = vadd.f32 %v10251_v50, %v5241_v4 }
 0x2b4   : > { %6757 = vst [vmem:[%s9104_s29 + $0x258] sm:$0xff] %v5938_v49 }
 0x2b5   : > { %v7047_v57 = vpop.f32.mrb[216].mxu0  ;;  %v5131_v15 = vpop.f32.mrb[216].mxu1 }
 0x2b6   : > { %v10499_v33 = vadd.f32 %v7047_v57, %v10341_v39  ;;  %v4382_v11 = vpop.f32.mrb[217].mxu0  ;;  %v5242_v29 = vadd.f32 %v5131_v15, %v4425_v5  ;;  %v5133_v46 = vpop.f32.mrb[217].mxu1 }
 0x2b7   : > { %v10502_v24 = vadd.f32 %v4382_v11, %v10325_v40  ;;  %v7048_v19 = vpop.f32.mrb[218].mxu0  ;;  %v10505_v0 = vadd.f32 %v5133_v46, %v10227_v34  ;;  %v5135_v55 = vpop.f32.mrb[218].mxu1  ;;  %v11050_v46 = vld [vmem:[#allocation5_spill] sm:$0xff] }
 0x2b8   : > { %v10508_v43 = vadd.f32 %v7048_v19, %v10347_v59  ;;  %v4385_v28 = vpop.f32.mrb[219].mxu0  ;;  %v5939_v39 = vadd.f32 %v10251_v50, %v5242_v29  ;;  %v5243_v53 = vadd.f32 %v5135_v55, %v4426_v30  ;;  %v5137_v5 = vpop.f32.mrb[219].mxu1 }
 0x2b9   : > { %v10512_v36 = vadd.f32 %v4385_v28, %v10331_v32  ;;  %v10515_v40 = vadd.f32 %v5137_v5, %v10234_v21 }
 0x2ba   : > { %6758 = vst [vmem:[%s9104_s29 + $0x260] sm:$0xff] %v5939_v39  ;;  %v5940_v17 = vadd.f32 %v10251_v50, %v5243_v53 }
 0x2bc   : > { %6759 = vst [vmem:[%s9104_s29 + $0x268] sm:$0xff] %v5940_v17 }
 0x2bd   : > { %v7051_v34 = vpop.f32.mrb[220].mxu0  ;;  %v5141_v18 = vpop.f32.mrb[220].mxu1 }
 0x2be   : > { %v10521_v59 = vadd.f32 %v7051_v34, %v10373_v63  ;;  %v4398_v52 = vpop.f32.mrb[221].mxu0  ;;  %v5244_v30 = vadd.f32 %v5141_v18, %v10435_v25  ;;  %v5143_v41 = vpop.f32.mrb[221].mxu1  ;;  %v11051_v34 = vld [vmem:[#allocation43_spill] sm:$0xff] }
 0x2bf   : > { %v10525_v32 = vadd.f32 %v4398_v52, %v10357_v38  ;;  %v7052_v21 = vpop.f32.mrb[222].mxu0  ;;  %v10528_v13 = vadd.f32 %v5143_v41, %v10243_v47  ;;  %v5145_v20 = vpop.f32.mrb[222].mxu1 }
 0x2c0   : > { %v10531_v61 = vadd.f32 %v7052_v21, %v10379_v45  ;;  %v4401_v63 = vpop.f32.mrb[223].mxu0  ;;  %v5941_v48 = vadd.f32 %v10251_v50, %v5244_v30  ;;  %v5245_v4 = vadd.f32 %v5145_v20, %v10442_v51  ;;  %v5147_v25 = vpop.f32.mrb[223].mxu1 }
 0x2c1   : > { %v10536_v35 = vadd.f32 %v4401_v63, %v10363_v10  ;;  %v10539_v38 = vadd.f32 %v5147_v25, %v10255_v1  ;;  %v11052_v25 = vld [vmem:[#allocation44_spill] sm:$0xff] }
 0x2c2   : > { %6760 = vst [vmem:[%s9104_s29 + $0x270] sm:$0xff] %v5941_v48  ;;  %v5942_v47 = vadd.f32 %v10251_v50, %v5245_v4 }
 0x2c4   : > { %6761 = vst [vmem:[%s9104_s29 + $0x278] sm:$0xff] %v5942_v47 }
 0x2c5   : > { %v5151_v45 = vpop.f32.mrb[224].mxu1 }
 0x2c6   : > { %v7071_v49 = vpop.f32.mrb[224].mxu0  ;;  %v5246_v11 = vadd.f32 %v5151_v45, %v10456_v37  ;;  %v5153_v51 = vpop.f32.mrb[225].mxu1 }
 0x2c7   : > { %v5761_v57 = vadd.f32 %v7071_v49, %v10405_v3  ;;  %v5632_v15 = vpop.f32.mrb[225].mxu0  ;;  %v10549_v19 = vadd.f32 %v5153_v51, %v11050_v46  ;;  %v5155_v55 = vpop.f32.mrb[226].mxu1 }
 0x2c8   : > { %v5759_v10 = vadd.f32 %v5632_v15, %v10391_v12  ;;  %v7072_v29 = vpop.f32.mrb[226].mxu0  ;;  %v5943_v37 = vadd.f32 %v10251_v50, %v5246_v11  ;;  %v5247_v12 = vadd.f32 %v5155_v55, %v10466_v9  ;;  %v5157_v53 = vpop.f32.mrb[227].mxu1 }
 0x2c9   : > { %v5994_v1 = vadd.f32 %v10251_v50, %v5761_v57  ;;  %v5762_v3 = vadd.f32 %v7072_v29, %v10411_v56  ;;  %v5635_v28 = vpop.f32.mrb[227].mxu0  ;;  %v10559_v18 = vadd.f32 %v5157_v53, %v11051_v34  ;;  %v11054_v53 = vld [vmem:[#allocation10_spill] sm:$0xff] }
 0x2ca   : > { %v5992_v39 = vadd.f32 %v10251_v50, %v5759_v10  ;;  %v5760_v5 = vadd.f32 %v5635_v28, %v10396_v26  ;;  %6762 = vst [vmem:[%s9104_s29 + $0x280] sm:$0xff] %v5943_v37  ;;  %v5944_v56 = vadd.f32 %v10251_v50, %v5247_v12  ;;  %v11053_v10 = vld [vmem:[#allocation53_spill] sm:$0xff] }
 0x2cb   : > { %6780 = vst [vmem:[%s9104_s29 + $0x310] sm:$0xff] %v5994_v1  ;;  %v5995_v17 = vadd.f32 %v10251_v50, %v5762_v3 }
 0x2cc   : > { %6778 = vst [vmem:[%s9104_s29 + $0x300] sm:$0xff] %v5992_v39  ;;  %v5993_v52 = vadd.f32 %v10251_v50, %v5760_v5  ;;  %6763 = vst [vmem:[%s9104_s29 + $0x288] sm:$0xff] %v5944_v56 }
 0x2cd   : > { %6781 = vst [vmem:[%s9104_s29 + $0x318] sm:$0xff] %v5995_v17  ;;  %v5161_v9 = vpop.f32.mrb[228].mxu1 }
 0x2ce   : > { %6779 = vst [vmem:[%s9104_s29 + $0x308] sm:$0xff] %v5993_v52  ;;  %v5248_v21 = vadd.f32 %v5161_v9, %v10453_v27  ;;  %v5163_v20 = vpop.f32.mrb[229].mxu1 }
 0x2cf   : > { %v7075_v30 = vpop.f32.mrb[228].mxu0  ;;  %v10573_v47 = vadd.f32 %v5163_v20, %v11052_v25  ;;  %v5165_v49 = vpop.f32.mrb[230].mxu1 }
 0x2d0   : > { %v5765_v41 = vadd.f32 %v7075_v30, %v10439_v54  ;;  %v5648_v26 = vpop.f32.mrb[229].mxu0  ;;  %v5945_v27 = vadd.f32 %v10251_v50, %v5248_v21  ;;  %v5167_v15 = vpop.f32.mrb[231].mxu1 }
 0x2d1   : > { %v5763_v63 = vadd.f32 %v5648_v26, %v10421_v2  ;;  %v7076_v48 = vpop.f32.mrb[230].mxu0  ;;  %v5249_v2 = vadd.f32 %v5165_v49, %v10462_v6  ;;  %v10583_v29 = vadd.f32 %v5167_v15, %v11053_v10 }
 0x2d2   : > { %v5998_v4 = vadd.f32 %v10251_v50, %v5765_v41  ;;  %v5766_v54 = vadd.f32 %v7076_v48, %v10447_v58  ;;  %v5651_v45 = vpop.f32.mrb[231].mxu0  ;;  %6764 = vst [vmem:[%s9104_s29 + $0x290] sm:$0xff] %v5945_v27  ;;  %v11055_v41 = vld [vmem:[#allocation9_spill] sm:$0xff] }
 0x2d3   : > { %v5996_v57 = vadd.f32 %v10251_v50, %v5763_v63  ;;  %v5764_v11 = vadd.f32 %v5651_v45, %v10429_v23  ;;  %v5946_v58 = vadd.f32 %v10251_v50, %v5249_v2  ;;  %v11056_v45 = vld [vmem:[#allocation46_spill] sm:$0xff] }
 0x2d4   : > { %6784 = vst [vmem:[%s9104_s29 + $0x330] sm:$0xff] %v5998_v4  ;;  %v5999_v51 = vadd.f32 %v10251_v50, %v5766_v54 }
 0x2d5   : > { %6782 = vst [vmem:[%s9104_s29 + $0x320] sm:$0xff] %v5996_v57  ;;  %v5997_v1 = vadd.f32 %v10251_v50, %v5764_v11  ;;  %6765 = vst [vmem:[%s9104_s29 + $0x298] sm:$0xff] %v5946_v58  ;;  %v5171_v6 = vpop.f32.mrb[232].mxu1  ;;  %v11057_v58 = vld [vmem:[#allocation12_spill] sm:$0xff] }
 0x2d6   : > { %6785 = vst [vmem:[%s9104_s29 + $0x338] sm:$0xff] %v5999_v51  ;;  %v5250_v3 = vadd.f32 %v5171_v6, %v10479_v22  ;;  %v5173_v28 = vpop.f32.mrb[233].mxu1 }
 0x2d7   : > { %6783 = vst [vmem:[%s9104_s29 + $0x328] sm:$0xff] %v5997_v1  ;;  %v10597_v5 = vadd.f32 %v5173_v28, %v11054_v53  ;;  %v5175_v17 = vpop.f32.mrb[234].mxu1 }
 0x2d8   : > { %v7079_v46 = vpop.f32.mrb[232].mxu0  ;;  %v5947_v22 = vadd.f32 %v10251_v50, %v5250_v3  ;;  %v5177_v52 = vpop.f32.mrb[235].mxu1 }
 0x2d9   : > { %v5769_v55 = vadd.f32 %v7079_v46, %v10482_v14  ;;  %v5664_v23 = vpop.f32.mrb[233].mxu0  ;;  %v10607_v26 = vadd.f32 %v5177_v52, %v11055_v41  ;;  %v11059_v52 = vld [vmem:[#allocation11_spill] sm:$0xff] }
 0x2da   : > { %v5767_v37 = vadd.f32 %v5664_v23, %v10459_v60  ;;  %v7080_v39 = vpop.f32.mrb[234].mxu0  ;;  %v5251_v60 = vadd.f32 %v5175_v17, %v10490_v44  ;;  %6766 = vst [vmem:[%s9104_s29 + $0x2a0] sm:$0xff] %v5947_v22 }
 0x2db   : > { %v6002_v12 = vadd.f32 %v10251_v50, %v5769_v55  ;;  %v5770_v14 = vadd.f32 %v7080_v39, %v10493_v7  ;;  %v5667_v34 = vpop.f32.mrb[235].mxu0 }
 0x2dc   : > { %v6000_v56 = vadd.f32 %v10251_v50, %v5767_v37  ;;  %v5768_v30 = vadd.f32 %v5667_v34, %v10469_v8  ;;  %v5948_v7 = vadd.f32 %v10251_v50, %v5251_v60 }
 0x2dd   : > { %6788 = vst [vmem:[%s9104_s29 + $0x350] sm:$0xff] %v6002_v12  ;;  %v6003_v9 = vadd.f32 %v10251_v50, %v5770_v14  ;;  %v5181_v44 = vpop.f32.mrb[236].mxu1  ;;  %v11058_v12 = vld [vmem:[#allocation13_spill] sm:$0xff] }
 0x2de   : > { %6786 = vst [vmem:[%s9104_s29 + $0x340] sm:$0xff] %v6000_v56  ;;  %v6001_v21 = vadd.f32 %v10251_v50, %v5768_v30  ;;  %6767 = vst [vmem:[%s9104_s29 + $0x2a8] sm:$0xff] %v5948_v7  ;;  %v5252_v48 = vadd.f32 %v5181_v44, %v10475_v42  ;;  %v5183_v4 = vpop.f32.mrb[237].mxu1 }
 0x2df   : > { %6789 = vst [vmem:[%s9104_s29 + $0x358] sm:$0xff] %v6003_v9  ;;  %v5284_v27 = vadd.f32 %v5183_v4, %v11056_v45  ;;  %v5185_v57 = vpop.f32.mrb[238].mxu1 }
 0x2e0   : > { %6787 = vst [vmem:[%s9104_s29 + $0x348] sm:$0xff] %v6001_v21  ;;  %v7083_v20 = vpop.f32.mrb[236].mxu0  ;;  %v5949_v15 = vadd.f32 %v10251_v50, %v5252_v48  ;;  %v5253_v11 = vadd.f32 %v5185_v57, %v10485_v16  ;;  %v11060_v48 = vld [vmem:[#allocation17_spill] sm:$0xff] }
 0x2e1   : > { %v5773_v63 = vadd.f32 %v7083_v20, %v10528_v13  ;;  %v5680_v8 = vpop.f32.mrb[237].mxu0 }
 0x2e2   : > { %v5771_v25 = vadd.f32 %v5680_v8, %v10505_v0  ;;  %v7084_v49 = vpop.f32.mrb[238].mxu0  ;;  %v5187_v0 = vpop.f32.mrb[239].mxu1  ;;  %6768 = vst [vmem:[%s9104_s29 + $0x2b0] sm:$0xff] %v5949_v15 }
 0x2e3   : > { %v6006_v54 = vadd.f32 %v10251_v50, %v5773_v63  ;;  %v5774_v2 = vadd.f32 %v7084_v49, %v10539_v38  ;;  %v5683_v13 = vpop.f32.mrb[239].mxu0  ;;  %v5285_v1 = vadd.f32 %v5187_v0, %v11057_v58  ;;  %v5950_v38 = vadd.f32 %v10251_v50, %v5253_v11 }
 0x2e4   : > { %v6004_v42 = vadd.f32 %v10251_v50, %v5771_v25  ;;  %v5772_v51 = vadd.f32 %v5683_v13, %v10515_v40 }
 0x2e5   : > { %6792 = vst [vmem:[%s9104_s29 + $0x370] sm:$0xff] %v6006_v54  ;;  %v6007_v10 = vadd.f32 %v10251_v50, %v5774_v2  ;;  %6769 = vst [vmem:[%s9104_s29 + $0x2b8] sm:$0xff] %v5950_v38 }
 0x2e6   : > { %6790 = vst [vmem:[%s9104_s29 + $0x360] sm:$0xff] %v6004_v42  ;;  %v6005_v46 = vadd.f32 %v10251_v50, %v5772_v51  ;;  %v5191_v55 = vpop.f32.mrb[240].mxu1 }
 0x2e7   : > { %6793 = vst [vmem:[%s9104_s29 + $0x378] sm:$0xff] %v6007_v10  ;;  %v5254_v23 = vadd.f32 %v5191_v55, %v10502_v24  ;;  %v5193_v3 = vpop.f32.mrb[241].mxu1 }
 0x2e8   : > { %6791 = vst [vmem:[%s9104_s29 + $0x368] sm:$0xff] %v6005_v46  ;;  %v7087_v6 = vpop.f32.mrb[240].mxu0  ;;  %v5286_v53 = vadd.f32 %v5193_v3, %v11058_v12  ;;  %v5195_v17 = vpop.f32.mrb[242].mxu1 }
 0x2e9   : > { %v5777_v16 = vadd.f32 %v7087_v6, %v10573_v47  ;;  %v5696_v40 = vpop.f32.mrb[241].mxu0  ;;  %v5951_v34 = vadd.f32 %v10251_v50, %v5254_v23  ;;  %v5255_v22 = vadd.f32 %v5195_v17, %v10512_v36 }
 0x2ea   : > { %v5775_v28 = vadd.f32 %v5696_v40, %v10549_v19  ;;  %v7088_v37 = vpop.f32.mrb[242].mxu0  ;;  %v5197_v19 = vpop.f32.mrb[243].mxu1 }
 0x2eb   : > { %v6010_v39 = vadd.f32 %v10251_v50, %v5777_v16  ;;  %v5778_v14 = vadd.f32 %v7088_v37, %v10583_v29  ;;  %v5699_v47 = vpop.f32.mrb[243].mxu0  ;;  %v5287_v30 = vadd.f32 %v5197_v19, %v11059_v52  ;;  %6770 = vst [vmem:[%s9104_s29 + $0x2c0] sm:$0xff] %v5951_v34  ;;  %v5952_v29 = vadd.f32 %v10251_v50, %v5255_v22  ;;  %v11061_v37 = vld [vmem:[#allocation20_spill] sm:$0xff]  ;;  %v11062_v22 = vld [vmem:[#allocation14_spill] sm:$0xff] }
 0x2ec   : > { %v6008_v24 = vadd.f32 %v10251_v50, %v5775_v28  ;;  %v5776_v56 = vadd.f32 %v5699_v47, %v10559_v18 }
 0x2ed   : > { %6796 = vst [vmem:[%s9104_s29 + $0x390] sm:$0xff] %v6010_v39  ;;  %v6011_v60 = vadd.f32 %v10251_v50, %v5778_v14  ;;  %6771 = vst [vmem:[%s9104_s29 + $0x2c8] sm:$0xff] %v5952_v29 }
 0x2ee   : > { %6794 = vst [vmem:[%s9104_s29 + $0x380] sm:$0xff] %v6008_v24  ;;  %v6009_v9 = vadd.f32 %v10251_v50, %v5776_v56 }
 0x2ef   : > { %6797 = vst [vmem:[%s9104_s29 + $0x398] sm:$0xff] %v6011_v60  ;;  %v5201_v7 = vpop.f32.mrb[244].mxu1 }
 0x2f0   : > { %6795 = vst [vmem:[%s9104_s29 + $0x388] sm:$0xff] %v6009_v9  ;;  %v7091_v41 = vpop.f32.mrb[244].mxu0  ;;  %v5256_v18 = vadd.f32 %v5201_v7, %v10499_v33  ;;  %v5203_v20 = vpop.f32.mrb[245].mxu1  ;;  %v11063_v7 = vld [vmem:[#allocation16_spill] sm:$0xff] }
 0x2f1   : > { %v5781_v36 = vadd.f32 %v7091_v41, %v5284_v27  ;;  %v5712_v21 = vpop.f32.mrb[245].mxu0  ;;  %v5288_v4 = vadd.f32 %v5203_v20, %v11060_v48  ;;  %v5205_v25 = vpop.f32.mrb[246].mxu1 }
 0x2f2   : > { %v5779_v44 = vadd.f32 %v5712_v21, %v10597_v5  ;;  %v7092_v63 = vpop.f32.mrb[246].mxu0  ;;  %v5953_v45 = vadd.f32 %v10251_v50, %v5256_v18  ;;  %v5257_v27 = vadd.f32 %v5205_v25, %v10508_v43  ;;  %v5207_v57 = vpop.f32.mrb[247].mxu1 }
 0x2f3   : > { %v6014_v8 = vadd.f32 %v10251_v50, %v5781_v36  ;;  %v5782_v49 = vadd.f32 %v7092_v63, %v5285_v1  ;;  %v5715_v54 = vpop.f32.mrb[247].mxu0  ;;  %v5289_v13 = vadd.f32 %v5207_v57, %v10351_v62 }
 0x2f4   : > { %v6012_v33 = vadd.f32 %v10251_v50, %v5779_v44  ;;  %v5780_v5 = vadd.f32 %v5715_v54, %v10607_v26  ;;  %6772 = vst [vmem:[%s9104_s29 + $0x2d0] sm:$0xff] %v5953_v45  ;;  %v5954_v15 = vadd.f32 %v10251_v50, %v5257_v27 }
 0x2f5   : > { %6800 = vst [vmem:[%s9104_s29 + $0x3b0] sm:$0xff] %v6014_v8  ;;  %v6015_v2 = vadd.f32 %v10251_v50, %v5782_v49 }
 0x2f6   : > { %6798 = vst [vmem:[%s9104_s29 + $0x3a0] sm:$0xff] %v6012_v33  ;;  %v6013_v42 = vadd.f32 %v10251_v50, %v5780_v5  ;;  %6773 = vst [vmem:[%s9104_s29 + $0x2d8] sm:$0xff] %v5954_v15 }
 0x2f7   : > { %6801 = vst [vmem:[%s9104_s29 + $0x3b8] sm:$0xff] %v6015_v2  ;;  %v5211_v0 = vpop.f32.mrb[248].mxu1 }
 0x2f8   : > { %6799 = vst [vmem:[%s9104_s29 + $0x3a8] sm:$0xff] %v6013_v42  ;;  %v7095_v11 = vpop.f32.mrb[248].mxu0  ;;  %v5258_v26 = vadd.f32 %v5211_v0, %v10525_v32  ;;  %v5213_v10 = vpop.f32.mrb[249].mxu1 }
 0x2f9   : > { %v5785_v43 = vadd.f32 %v7095_v11, %v5288_v4  ;;  %v5728_v51 = vpop.f32.mrb[249].mxu0  ;;  %v5290_v38 = vadd.f32 %v5213_v10, %v10360_v31  ;;  %v5215_v46 = vpop.f32.mrb[250].mxu1 }
 0x2fa   : > { %v5783_v58 = vadd.f32 %v5728_v51, %v5286_v53  ;;  %v7096_v62 = vpop.f32.mrb[250].mxu0  ;;  %v5955_v16 = vadd.f32 %v10251_v50, %v5258_v26  ;;  %v5259_v32 = vadd.f32 %v5215_v46, %v10536_v35  ;;  %v5217_v23 = vpop.f32.mrb[251].mxu1 }
 0x2fb   : > { %v6018_v1 = vadd.f32 %v10251_v50, %v5785_v43  ;;  %v5786_v6 = vadd.f32 %v7096_v62, %v5289_v13  ;;  %v5731_v55 = vpop.f32.mrb[251].mxu0  ;;  %v5291_v39 = vadd.f32 %v5217_v23, %v11061_v37 }
 0x2fc   : > { %v6016_v40 = vadd.f32 %v10251_v50, %v5783_v58  ;;  %v5784_v3 = vadd.f32 %v5731_v55, %v5287_v30  ;;  %6774 = vst [vmem:[%s9104_s29 + $0x2e0] sm:$0xff] %v5955_v16  ;;  %v5956_v31 = vadd.f32 %v10251_v50, %v5259_v32 }
 0x2fd   : > { %6804 = vst [vmem:[%s9104_s29 + $0x3d0] sm:$0xff] %v6018_v1  ;;  %v6019_v28 = vadd.f32 %v10251_v50, %v5786_v6 }
 0x2fe   : > { %6802 = vst [vmem:[%s9104_s29 + $0x3c0] sm:$0xff] %v6016_v40  ;;  %v6017_v12 = vadd.f32 %v10251_v50, %v5784_v3  ;;  %6775 = vst [vmem:[%s9104_s29 + $0x2e8] sm:$0xff] %v5956_v31  ;;  %v7190_v50 = vld [vmem:[%s10714_s2] ss:$0 sm:$0xff] }
 0x2ff   : > { %6805 = vst [vmem:[%s9104_s29 + $0x3d8] sm:$0xff] %v6019_v28  ;;  %v5221_v17 = vpop.f32.mrb[252].mxu1 }
 0x300   : > { %6803 = vst [vmem:[%s9104_s29 + $0x3c8] sm:$0xff] %v6017_v12  ;;  %v7099_v53 = vpop.f32.mrb[252].mxu0  ;;  %v5260_v35 = vadd.f32 %v5221_v17, %v10521_v59  ;;  %v5223_v47 = vpop.f32.mrb[253].mxu1 }
 0x301   : > { %v5744_v14 = vpop.f32.mrb[253].mxu0  ;;  %v5292_v19 = vadd.f32 %v5223_v47, %v11062_v22  ;;  %v5225_v56 = vpop.f32.mrb[254].mxu1 }
 0x302   : > { %v5787_v34 = vadd.f32 %v5744_v14, %v5290_v38  ;;  %v7100_v24 = vpop.f32.mrb[254].mxu0  ;;  %v5957_v52 = vadd.f32 %v7190_v50, %v5260_v35  ;;  %v5261_v59 = vadd.f32 %v5225_v56, %v10531_v61  ;;  %v5227_v29 = vpop.f32.mrb[255].mxu1 }
 0x303   : > { %v5747_v60 = vpop.f32.mrb[255].mxu0  ;;  %v5789_v41 = vadd.f32 %v7099_v53, %v5292_v19  ;;  %v5293_v36 = vadd.f32 %v5227_v29, %v11063_v7 }
 0x304   : > { %v6020_v30 = vadd.f32 %v7190_v50, %v5787_v34  ;;  %v5788_v9 = vadd.f32 %v5747_v60, %v5291_v39  ;;  %6776 = vst [vmem:[%s9104_s29 + $0x2f0] sm:$0xff] %v5957_v52  ;;  %v5958_v21 = vadd.f32 %v7190_v50, %v5261_v59 }
 0x305   : > { %v6022_v20 = vadd.f32 %v7190_v50, %v5789_v41  ;;  %v5790_v44 = vadd.f32 %v7100_v24, %v5293_v36 }
 0x306   : > { %6806 = vst [vmem:[%s9104_s29 + $0x3e0] sm:$0xff] %v6020_v30  ;;  %v6021_v18 = vadd.f32 %v7190_v50, %v5788_v9  ;;  %6777 = vst [vmem:[%s9104_s29 + $0x2f8] sm:$0xff] %v5958_v21 }
 0x307   : > { %6808 = vst [vmem:[%s9104_s29 + $0x3f0] sm:$0xff] %v6022_v20  ;;  %v6023_v63 = vadd.f32 %v7190_v50, %v5790_v44 }
 0x308   : > { %6807 = vst [vmem:[%s9104_s29 + $0x3e8] sm:$0xff] %v6021_v18 }
 0x309   : > { %6809 = vst [vmem:[%s9104_s29 + $0x3f8] sm:$0xff] %v6023_v63 }
 0x30a PF: > { %s13_s14 = sadd.s32 1, %s7213_s14   ;;  %s11064_s12 = smov %s7209_s13 }
 0x30b   : > { %p10_p5 = scmp.ge.s32.totalorder %s13_s14, 4   ;;  %s11065_s13 = smov %s11067_s15 }
 0x30d   :  { %12 = sbr.rel (!%p10_p5) target bundleno = 2 (0x2), region = 74 }

</bundles_post_ra>
